<compile_context>
chip_gen: v7x
topology: tpu7x:2x2x1
jax: 0.10.0
libtpu: 0.0.40
codegen_flags: <defaults>
</compile_context>

<pallas_src>
import functools
import math

import jax
import jax.numpy as jnp
from jax.experimental import pallas as pl
from jax.experimental.pallas import tpu as pltpu


# ---------------------------------------------------------------------------
# Kernels
# ---------------------------------------------------------------------------
def gat_project_kernel(x_ref, waug_ref, haug_ref, *, mxu_dtype):
    """Fused projection for ALL heads + both attention logits.

    x_ref    : [T, Fin]
    waug_ref : [Fin, HFaug_pad]  = [W_all(padded) | W·a_src | W·a_dst | 0-pad]
    haug_ref : [T, HFaug_pad]    single lane-dense store of the MXU result
    """
    x = x_ref[...].astype(mxu_dtype)
    w = waug_ref[...].astype(mxu_dtype)
    haug_ref[...] = jnp.dot(x, w, preferred_element_type=jnp.float32)


def gat_attention_kernel(adjt_ref, esrct_ref, edst_ref, hfeat_ref, bias_ref,
                         out_ref, *, heads, fout_pad, activation,
                         negative_slope, mxu_dtype):
    """Masked softmax attention + weighted aggregation for one dst-node tile.

    adjt_ref  : [T, N]               (adj^T; row i = incoming edges of dst i)
    esrct_ref : [H, N]               (e_src^T, resident)
    edst_ref  : [T, H]
    hfeat_ref : [H, N, fout_pad]     (head-major source features, resident)
    bias_ref  : [1, H*fout_pad]
    out_ref   : [T, H*fout_pad]      (single lane-dense store per grid step)
    """
    adj_t = adjt_ref[...].astype(jnp.float32)          # [T, N]
    mask = adj_t > 0.0
    neg_inf = jnp.float32(-1e30)

    accs = []
    # TODO(synk): for very large T*N switch this static unroll to lax.fori_loop
    # (or source-tile with online softmax) to bound the [T,N] temporaries.
    for h in range(heads):
        e_d = edst_ref[:, h:h + 1]                      # [T, 1]
        e_s = esrct_ref[h:h + 1, :]                     # [1, N]
        s = e_d + e_s                                   # [T, N]
        s = jnp.where(s > 0, s, negative_slope * s)     # leaky_relu
        s = jnp.where(mask, s, neg_inf)

        m = jnp.max(s, axis=-1, keepdims=True)          # finite: self-loop row
        p = jnp.exp(s - m)                              # masked -> exactly 0
        denom = jnp.sum(p, axis=-1, keepdims=True)
        r = pl.reciprocal(denom, approx=True)           # EUP
        r = r * (2.0 - denom * r)                       # one Newton step

        # Fold edge_weight into the message; normalize AFTER the matmul so the
        # 1/denom multiply is [T,fout] instead of an extra [T,N] pass.
        msg = (p * adj_t).astype(mxu_dtype)             # [T, N]
        hh = hfeat_ref[h]                               # [N, fout_pad] (free)
        acc = jnp.dot(msg, hh, preferred_element_type=jnp.float32)
        accs.append(acc * r)                            # [T, fout_pad]

    out = accs[0] if heads == 1 else jnp.concatenate(accs, axis=-1)
    out = out + bias_ref[...]                           # [T, H*fout_pad]

    if activation == "elu":
        out = jnp.where(out > 0, out, jnp.exp(out) - 1.0)
    elif activation == "log_softmax":                   # only used with H == 1
        # Padded logits carry bias = -1e30 -> exp underflows to exactly 0, so
        # the padded lanes never contaminate the denominator.
        zm = jnp.max(out, axis=-1, keepdims=True)
        z = out - zm
        out = z - jnp.log(jnp.sum(jnp.exp(z), axis=-1, keepdims=True))

    out_ref[...] = out                                  # one lane-dense store


# ---------------------------------------------------------------------------
# Sizing helpers (generation-aware)
# ---------------------------------------------------------------------------
def _vmem_capacity_bytes():
    try:
        info = pltpu.get_tpu_info()
        cap = getattr(info, "vmem_capacity_bytes", None)
        if cap:
            return int(cap)
    except Exception:
        pass
    return 64 * 1024 * 1024          # conservative fallback (v7x per-TC)


def _pick_tile(n, per_row_bytes, fixed_bytes, capacity, min_steps=2):
    """Largest row tile (divides n, %8==0) whose footprint fits the budget,
    preferring tilings with >= min_steps grid steps (megacore / 2-TC)."""
    budget = int(capacity * 0.85) - fixed_bytes
    cands = [t for t in (2048, 1024, 512, 256, 128, 64, 32, 16, 8)
             if t <= n and n % t == 0]
    if not cands:
        return n
    for t in cands:
        if n // t >= min_steps and t * per_row_bytes <= budget:
            return t
    for t in cands:
        if t * per_row_bytes <= budget:
            return t
    return cands[-1]


# ---------------------------------------------------------------------------
# Wrappers
# ---------------------------------------------------------------------------
def gat_layer(x, adj_t, w, att_src, att_dst, bias, *, activation,
              mxu_dtype=jnp.float32, negative_slope=0.2):
    """One GATConv layer. Returns concatenated per-head output [N, H*Fout]."""
    H, Fin, Fout = w.shape
    N = x.shape[0]
    assert N % 8 == 0, "node count must be a multiple of 8"
    assert activation != "log_softmax" or H == 1

    # Pad per-head width so H*fout_pad is a multiple of 128: lane-dense output
    # stores and full-width MXU result columns (layer 2: nclass=8 -> 128).
    per = 128 // math.gcd(H, 128)
    fout_pad = ((Fout + per - 1) // per) * per
    HFp = H * fout_pad
    HFaug = HFp + 2 * H
    HFaug_pad = ((HFaug + 127) // 128) * 128

    # --- parameter-side prep (tiny, plain XLA) ----------------------------
    w_pad = jnp.pad(w, ((0, 0), (0, 0), (0, fout_pad - Fout)))
    w_all = jnp.transpose(w_pad, (1, 0, 2)).reshape(Fin, HFp)
    a_src_cols = jnp.einsum("hif,hf->ih", w, att_src[:, 0, :])     # [Fin, H]
    a_dst_cols = jnp.einsum("hif,hf->ih", w, att_dst[:, 0, :])     # [Fin, H]
    w_aug = jnp.concatenate([w_all, a_src_cols, a_dst_cols], axis=1)
    w_aug = jnp.pad(w_aug, ((0, 0), (0, HFaug_pad - HFaug)))
    bias_pad_val = -1e30 if activation == "log_softmax" else 0.0
    bias_c = jnp.pad(bias, ((0, 0), (0, 0), (0, fout_pad - Fout)),
                     constant_values=bias_pad_val).reshape(1, HFp)

    cap = _vmem_capacity_bytes()

    # --- kernel 1: fused projection, single lane-dense output -------------
    per_row_p = 4 * (2 * Fin + 3 * HFaug_pad)
    fixed_p = 2 * Fin * HFaug_pad * 4 + (2 << 20)
    tile_p = _pick_tile(N, per_row_p, fixed_p, cap)
    haug = pl.pallas_call(
        functools.partial(gat_project_kernel, mxu_dtype=mxu_dtype),
        out_shape=jax.ShapeDtypeStruct((N, HFaug_pad), jnp.float32),
        grid=(N // tile_p,),
        in_specs=[pl.BlockSpec((tile_p, Fin), lambda i: (i, 0)),
                  pl.BlockSpec((Fin, HFaug_pad), lambda i: (0, 0))],
        out_specs=pl.BlockSpec((tile_p, HFaug_pad), lambda i: (i, 0)),
        compiler_params=pltpu.CompilerParams(
            dimension_semantics=("parallel",)),
    )(x, w_aug)

    # Cheap XLA splits (O(N*HF)): head-major hfeat in mxu_dtype, e_src^T rows.
    hfeat = (haug[:, :HFp].reshape(N, H, fout_pad)
             .transpose(1, 0, 2).astype(mxu_dtype))                # [H,N,Fp]
    e_src_t = jnp.transpose(haug[:, HFp:HFp + H])                  # [H, N]
    e_dst = haug[:, HFp + H:HFp + 2 * H]                           # [N, H]

    # --- kernel 2: attention + aggregation over destination-node tiles ----
    adj_bytes = jnp.dtype(adj_t.dtype).itemsize
    mxu_bytes = jnp.dtype(mxu_dtype).itemsize
    fixed_d = (2 * H * N * 4                          # e_src_t (resident, 2 bufs)
               + 2 * H * N * fout_pad * mxu_bytes     # hfeat   (resident, 2 bufs)
               + 2 * HFp * 4                          # bias
               + (2 << 20))                           # misc headroom
    per_row_d = (2 * N * adj_bytes                    # adj_t tile (2 bufs)
                 + 2 * HFp * 4                        # out tile (2 bufs)
                 + 2 * H * 4                          # e_dst tile
                 + 5 * N * 4                          # s/p/msg f32 temporaries
                 + N * mxu_bytes)                     # msg cast
    tile_d = _pick_tile(N, per_row_d, fixed_d, cap)
    need = fixed_d + tile_d * per_row_d
    vmem_limit = int(min(max(need + (8 << 20), 32 << 20), cap - (4 << 20)))
    # TODO(synk): for very large N, add a source-tile grid axis with online
    # softmax + scalar-prefetched block-sparsity skipping.

    out_full = pl.pallas_call(
        functools.partial(gat_attention_kernel, heads=H, fout_pad=fout_pad,
                          activation=activation,
                          negative_slope=negative_slope, mxu_dtype=mxu_dtype),
        out_shape=jax.ShapeDtypeStruct((N, HFp), jnp.float32),
        grid=(N // tile_d,),
        in_specs=[pl.BlockSpec((tile_d, N), lambda i: (i, 0)),     # adj_t tile
                  pl.BlockSpec((H, N), lambda i: (0, 0)),          # e_src^T
                  pl.BlockSpec((tile_d, H), lambda i: (i, 0)),     # e_dst tile
                  pl.BlockSpec((H, N, fout_pad), lambda i: (0, 0, 0)),  # hfeat
                  pl.BlockSpec((1, HFp), lambda i: (0, 0))],       # bias
        out_specs=pl.BlockSpec((tile_d, HFp), lambda i: (i, 0)),
        compiler_params=pltpu.CompilerParams(
            dimension_semantics=("parallel",),
            vmem_limit_bytes=vmem_limit),
    )(adj_t, e_src_t, e_dst, hfeat, bias_c)

    if fout_pad != Fout:
        out = out_full.reshape(N, H, fout_pad)[:, :, :Fout].reshape(N, H * Fout)
    else:
        out = out_full
    return out


def gat_forward(x, adj, params, *, mxu_dtype=jnp.float32,
                adj_dtype=jnp.float32):
    """Full GAT.forward (eval mode, mode='t'): log_softmax logits [N, nclass]."""
    adj_t = jnp.transpose(adj).astype(adj_dtype)   # [N_dst, N_src], both layers

    # dropout on x: identity in eval mode.
    x1 = gat_layer(x, adj_t, params["w1"], params["att_src1"],
                   params["att_dst1"], params["b1"],
                   activation="elu", mxu_dtype=mxu_dtype)
    # dropout again: identity in eval mode.
    out = gat_layer(x1, adj_t, params["w2"], params["att_src2"],
                    params["att_dst2"], params["b2"],
                    activation="log_softmax", mxu_dtype=mxu_dtype)
    return out


# ---------------------------------------------------------------------------
# Pure-JAX reference (module semantics, f32)
# ---------------------------------------------------------------------------
def _reference_forward(x, adj, params):
    def conv(xin, w, asrc, adst, b):
        h = jnp.einsum("nf,hfo->hno", xin, w)                      # [H, N, Fout]
        e_src = jnp.sum(h * asrc, axis=-1)                         # [H, N]
        e_dst = jnp.sum(h * adst, axis=-1)                         # [H, N]
        s = e_dst[:, :, None] + e_src[:, None, :]                  # [H, Nd, Ns]
        s = jnp.where(s > 0, s, 0.2 * s)
        adj_t = jnp.transpose(adj)
        mask = adj_t > 0
        s = jnp.where(mask[None], s, -1e30)
        p = jnp.exp(s - jnp.max(s, axis=-1, keepdims=True))
        p = jnp.where(mask[None], p, 0.0)
        alpha = p / jnp.sum(p, axis=-1, keepdims=True)
        msg = alpha * adj_t[None]
        out = jnp.einsum("hij,hjo->hio", msg, h) + b               # [H, N, Fout]
        return out

    h1 = conv(x, params["w1"], params["att_src1"], params["att_dst1"], params["b1"])
    h1 = jnp.where(h1 > 0, h1, jnp.exp(h1) - 1.0)
    H, N, nhid = h1.shape
    x1 = jnp.transpose(h1, (1, 0, 2)).reshape(N, H * nhid)
    o = conv(x1, params["w2"], params["att_src2"], params["att_dst2"], params["b2"])[0]
    return jax.nn.log_softmax(o, axis=1)


# ---------------------------------------------------------------------------
if __name__ == "__main__":
    # Small, deterministic problem.
    N, nfeat, nhid, heads, nclass = 128, 32, 16, 8, 8

    key = jax.random.PRNGKey(0)
    keys = jax.random.split(key, 10)

    x = jax.random.normal(keys[0], (N, nfeat), dtype=jnp.float32)

    # Random symmetric binary adjacency (no self edges), then add self-loops
    # (mirrors Dpr2Pyg: adj_selfloop = adj + I; edge_weight = its values).
    logits = jax.random.uniform(keys[1], (N, N))
    a = (logits < 0.05).astype(jnp.float32)
    a = jnp.clip(a + a.T, 0.0, 1.0)
    a = a * (1.0 - jnp.eye(N, dtype=jnp.float32))    # zero diagonal
    adj = a + jnp.eye(N, dtype=jnp.float32)          # self-loop weight 1

    def glorot(k, shape, fan_in, fan_out):
        lim = jnp.sqrt(6.0 / (fan_in + fan_out))
        return jax.random.uniform(k, shape, jnp.float32, -lim, lim)

    params = {
        "w1": glorot(keys[2], (heads, nfeat, nhid), nfeat, heads * nhid),
        "att_src1": glorot(keys[3], (heads, 1, nhid), nhid, 1),
        "att_dst1": glorot(keys[4], (heads, 1, nhid), nhid, 1),
        "b1": jnp.zeros((heads, 1, nhid), jnp.float32),
        "w2": glorot(keys[5], (1, heads * nhid, nclass), heads * nhid, nclass),
        "att_src2": glorot(keys[6], (1, 1, nclass), nclass, 1),
        "att_dst2": glorot(keys[7], (1, 1, nclass), nclass, 1),
        "b2": jnp.zeros((1, 1, nclass), jnp.float32),
    }

    ref = _reference_forward(x, adj, params)

    # f32 path: must match the module semantics tightly.
    fwd_f32 = jax.jit(functools.partial(gat_forward, mxu_dtype=jnp.float32,
                                        adj_dtype=jnp.float32))
    out = jax.block_until_ready(fwd_f32(x, adj, params))
    assert out.shape == (N, nclass)
    assert jnp.max(jnp.abs(out - ref)) < 1e-4, "f32 kernel mismatch vs reference"
    assert jnp.max(jnp.abs(jnp.sum(jnp.exp(out), axis=1) - 1.0)) < 1e-4

    # bf16 MXU + bf16 adjacency (v6e/v7x production setting): elementwise math
    # stays f32, so log_softmax rows still normalize exactly; values track f32
    # loosely. Adjacency values here are 0/1 so the bf16 cast is exact.
    fwd_bf16 = jax.jit(functools.partial(gat_forward, mxu_dtype=jnp.bfloat16,
                                         adj_dtype=jnp.bfloat16))
    out_bf = jax.block_until_ready(fwd_bf16(x, adj, params))
    assert bool(jnp.all(jnp.isfinite(out_bf)))
    assert jnp.max(jnp.abs(jnp.sum(jnp.exp(out_bf), axis=1) - 1.0)) < 1e-3
    assert jnp.max(jnp.abs(out_bf - ref)) < 0.3, "bf16 kernel drifted too far"

    # TODO(synk): dropout (input + attention) is omitted — forward is eval-mode.
    print("KERNEL_OK")
</pallas_src>

<mosaic_0001>
module attributes {stable_mosaic.version = 11 : i64} {
  func.func @gat_project_kernel(%arg0: i32, %arg1: memref<64x32xf32, #tpu.memory_space<vmem>>, %arg2: memref<32x256xf32, #tpu.memory_space<vmem>>, %arg3: memref<64x256xf32, #tpu.memory_space<vmem>>) attributes {dimension_semantics = [#tpu.dimension_semantics<parallel>], iteration_bounds = array<i64: 2>, scalar_prefetch = 0 : i64, scratch_operands = 0 : i64, tpu.core_type = #tpu.core_type<tc>, window_params = [{transform_indices = @transform_0, window_bounds = array<i64: 64, 32>}, {pipeline_mode = #tpu.pipeline_mode<synchronous>, transform_indices = @transform_1, window_bounds = array<i64: 32, 256>}, {transform_indices = @transform_2, window_bounds = array<i64: 64, 256>}]} {
    %c0 = arith.constant 0 : index
    %c0_0 = arith.constant 0 : index
    %0 = vector.load %arg1[%c0, %c0_0] : memref<64x32xf32, #tpu.memory_space<vmem>>, vector<64x32xf32>
    %c0_1 = arith.constant 0 : index
    %c0_2 = arith.constant 0 : index
    %1 = vector.load %arg2[%c0_1, %c0_2] : memref<32x256xf32, #tpu.memory_space<vmem>>, vector<32x256xf32>
    %cst = arith.constant dense<0.000000e+00> : vector<64x256xf32>
    %2 = tpu.matmul %0, %1, %cst {dimension_numbers = #tpu.dot_dimension_numbers<[1], [0], [0], [1], [0, 0, 1, 1], [], []>} : vector<64x32xf32>, vector<32x256xf32>, vector<64x256xf32> -> vector<64x256xf32>
    %c0_3 = arith.constant 0 : index
    %c0_4 = arith.constant 0 : index
    %3 = vector.load %arg3[%c0_3, %c0_4] : memref<64x256xf32, #tpu.memory_space<vmem>>, vector<64x256xf32>
    tpu.vector_store %arg3[%c0_3, %c0_4], %2 {strides = array<i32>} : memref<64x256xf32, #tpu.memory_space<vmem>>, vector<64x256xf32>,
    return
  }
  func.func @transform_0(%arg0: i32) -> (i32, i32) {
    %c0_i32 = arith.constant 0 : i32
    %c0_i32_0 = arith.constant 0 : i32
    return %arg0, %c0_i32 : i32, i32
  }
  func.func @transform_1(%arg0: i32) -> (i32, i32) {
    %c0_i32 = arith.constant 0 : i32
    %c0_i32_0 = arith.constant 0 : i32
    %c0_i32_1 = arith.constant 0 : i32
    return %c0_i32, %c0_i32_0 : i32, i32
  }
  func.func @transform_2(%arg0: i32) -> (i32, i32) {
    %c0_i32 = arith.constant 0 : i32
    %c0_i32_0 = arith.constant 0 : i32
    return %arg0, %c0_i32 : i32, i32
  }
}

module attributes {stable_mosaic.version = 11 : i64} {
  func.func @gat_attention_kernel(%arg0: i32, %arg1: memref<64x128xf32, #tpu.memory_space<vmem>>, %arg2: memref<8x128xf32, #tpu.memory_space<vmem>>, %arg3: memref<64x8xf32, #tpu.memory_space<vmem>>, %arg4: memref<8x128x16xf32, #tpu.memory_space<vmem>>, %arg5: memref<1x128xf32, #tpu.memory_space<vmem>>, %arg6: memref<64x128xf32, #tpu.memory_space<vmem>>) attributes {dimension_semantics = [#tpu.dimension_semantics<parallel>], iteration_bounds = array<i64: 2>, scalar_prefetch = 0 : i64, scratch_operands = 0 : i64, tpu.core_type = #tpu.core_type<tc>, window_params = [{transform_indices = @transform_0, window_bounds = array<i64: 64, 128>}, {pipeline_mode = #tpu.pipeline_mode<synchronous>, transform_indices = @transform_1, window_bounds = array<i64: 8, 128>}, {transform_indices = @transform_2, window_bounds = array<i64: 64, 8>}, {pipeline_mode = #tpu.pipeline_mode<synchronous>, transform_indices = @transform_3, window_bounds = array<i64: 8, 128, 16>}, {pipeline_mode = #tpu.pipeline_mode<synchronous>, transform_indices = @transform_4, window_bounds = array<i64: 1, 128>}, {transform_indices = @transform_5, window_bounds = array<i64: 64, 128>}]} {
    %c0 = arith.constant 0 : index
    %c0_0 = arith.constant 0 : index
    %0 = vector.load %arg1[%c0, %c0_0] : memref<64x128xf32, #tpu.memory_space<vmem>>, vector<64x128xf32>
    %cst = arith.constant 0.000000e+00 : f32
    %1 = vector.broadcast %cst : f32 to vector<64x128xf32>
    %2 = arith.cmpf ogt, %0, %1 : vector<64x128xf32>
    %c0_1 = arith.constant 0 : index
    %c0_2 = arith.constant 0 : index
    %3 = vector.load %arg3[%c0_1, %c0_2] : memref<64x8xf32, #tpu.memory_space<vmem>>, vector<64x1xf32>
    %c0_3 = arith.constant 0 : index
    %c0_4 = arith.constant 0 : index
    %4 = vector.load %arg2[%c0_3, %c0_4] : memref<8x128xf32, #tpu.memory_space<vmem>>, vector<1x128xf32>
    %5 = vector.broadcast %3 : vector<64x1xf32> to vector<64x128xf32>
    %6 = vector.broadcast %4 : vector<1x128xf32> to vector<64x128xf32>
    %7 = arith.addf %5, %6 : vector<64x128xf32>
    %cst_5 = arith.constant 0.000000e+00 : f32
    %8 = vector.broadcast %cst_5 : f32 to vector<64x128xf32>
    %9 = arith.cmpf ogt, %7, %8 : vector<64x128xf32>
    %cst_6 = arith.constant 2.000000e-01 : f32
    %10 = vector.broadcast %cst_6 : f32 to vector<64x128xf32>
    %11 = arith.mulf %10, %7 : vector<64x128xf32>
    %12 = arith.select %9, %7, %11 : vector<64x128xi1>, vector<64x128xf32>
    %cst_7 = arith.constant -1.000000e+30 : f32
    %13 = vector.broadcast %cst_7 : f32 to vector<64x128xf32>
    %14 = arith.select %2, %12, %13 : vector<64x128xi1>, vector<64x128xf32>
    %cst_8 = arith.constant dense<0xFF800000> : vector<64xf32>
    %15 = vector.multi_reduction <maximumf>, %14, %cst_8 [1] : vector<64x128xf32> to vector<64xf32>
    %16 = vector.shape_cast %15 : vector<64xf32> to vector<64x1xf32>
    %17 = vector.broadcast %16 : vector<64x1xf32> to vector<64x128xf32>
    %18 = arith.subf %14, %17 : vector<64x128xf32>
    %19 = math.exp %18 : vector<64x128xf32>
    %cst_9 = arith.constant dense<0.000000e+00> : vector<64xf32>
    %20 = vector.multi_reduction <add>, %19, %cst_9 [1] : vector<64x128xf32> to vector<64xf32>
    %21 = vector.shape_cast %20 : vector<64xf32> to vector<64x1xf32>
    %22 = tpu.reciprocal %21 {approx = true} : vector<64x1xf32> -> vector<64x1xf32>
    %23 = arith.mulf %21, %22 : vector<64x1xf32>
    %cst_10 = arith.constant 2.000000e+00 : f32
    %24 = vector.broadcast %cst_10 : f32 to vector<64x1xf32>
    %25 = arith.subf %24, %23 : vector<64x1xf32>
    %26 = arith.mulf %22, %25 : vector<64x1xf32>
    %27 = arith.mulf %19, %0 : vector<64x128xf32>
    %c0_11 = arith.constant 0 : index
    %c0_12 = arith.constant 0 : index
    %c0_13 = arith.constant 0 : index
    %28 = vector.load %arg4[%c0_11, %c0_12, %c0_13] : memref<8x128x16xf32, #tpu.memory_space<vmem>>, vector<1x128x16xf32>
    %29 = vector.shape_cast %28 : vector<1x128x16xf32> to vector<128x16xf32>
    %cst_14 = arith.constant dense<0.000000e+00> : vector<64x16xf32>
    %30 = tpu.matmul %27, %29, %cst_14 {dimension_numbers = #tpu.dot_dimension_numbers<[1], [0], [0], [1], [0, 0, 1, 1], [], []>} : vector<64x128xf32>, vector<128x16xf32>, vector<64x16xf32> -> vector<64x16xf32>
    %31 = vector.broadcast %26 : vector<64x1xf32> to vector<64x16xf32>
    %32 = arith.mulf %30, %31 : vector<64x16xf32>
    %c0_15 = arith.constant 0 : index
    %c1 = arith.constant 1 : index
    %33 = vector.load %arg3[%c0_15, %c1] : memref<64x8xf32, #tpu.memory_space<vmem>>, vector<64x1xf32>
    %c1_16 = arith.constant 1 : index
    %c0_17 = arith.constant 0 : index
    %34 = vector.load %arg2[%c1_16, %c0_17] : memref<8x128xf32, #tpu.memory_space<vmem>>, vector<1x128xf32>
    %35 = vector.broadcast %33 : vector<64x1xf32> to vector<64x128xf32>
    %36 = vector.broadcast %34 : vector<1x128xf32> to vector<64x128xf32>
    %37 = arith.addf %35, %36 : vector<64x128xf32>
    %cst_18 = arith.constant 0.000000e+00 : f32
    %38 = vector.broadcast %cst_18 : f32 to vector<64x128xf32>
    %39 = arith.cmpf ogt, %37, %38 : vector<64x128xf32>
    %cst_19 = arith.constant 2.000000e-01 : f32
    %40 = vector.broadcast %cst_19 : f32 to vector<64x128xf32>
    %41 = arith.mulf %40, %37 : vector<64x128xf32>
    %42 = arith.select %39, %37, %41 : vector<64x128xi1>, vector<64x128xf32>
    %cst_20 = arith.constant -1.000000e+30 : f32
    %43 = vector.broadcast %cst_20 : f32 to vector<64x128xf32>
    %44 = arith.select %2, %42, %43 : vector<64x128xi1>, vector<64x128xf32>
    %cst_21 = arith.constant dense<0xFF800000> : vector<64xf32>
    %45 = vector.multi_reduction <maximumf>, %44, %cst_21 [1] : vector<64x128xf32> to vector<64xf32>
    %46 = vector.shape_cast %45 : vector<64xf32> to vector<64x1xf32>
    %47 = vector.broadcast %46 : vector<64x1xf32> to vector<64x128xf32>
    %48 = arith.subf %44, %47 : vector<64x128xf32>
    %49 = math.exp %48 : vector<64x128xf32>
    %cst_22 = arith.constant dense<0.000000e+00> : vector<64xf32>
    %50 = vector.multi_reduction <add>, %49, %cst_22 [1] : vector<64x128xf32> to vector<64xf32>
    %51 = vector.shape_cast %50 : vector<64xf32> to vector<64x1xf32>
    %52 = tpu.reciprocal %51 {approx = true} : vector<64x1xf32> -> vector<64x1xf32>
    %53 = arith.mulf %51, %52 : vector<64x1xf32>
    %cst_23 = arith.constant 2.000000e+00 : f32
    %54 = vector.broadcast %cst_23 : f32 to vector<64x1xf32>
    %55 = arith.subf %54, %53 : vector<64x1xf32>
    %56 = arith.mulf %52, %55 : vector<64x1xf32>
    %57 = arith.mulf %49, %0 : vector<64x128xf32>
    %c1_24 = arith.constant 1 : index
    %c0_25 = arith.constant 0 : index
    %c0_26 = arith.constant 0 : index
    %58 = vector.load %arg4[%c1_24, %c0_25, %c0_26] : memref<8x128x16xf32, #tpu.memory_space<vmem>>, vector<1x128x16xf32>
    %59 = vector.shape_cast %58 : vector<1x128x16xf32> to vector<128x16xf32>
    %cst_27 = arith.constant dense<0.000000e+00> : vector<64x16xf32>
    %60 = tpu.matmul %57, %59, %cst_27 {dimension_numbers = #tpu.dot_dimension_numbers<[1], [0], [0], [1], [0, 0, 1, 1], [], []>} : vector<64x128xf32>, vector<128x16xf32>, vector<64x16xf32> -> vector<64x16xf32>
    %61 = vector.broadcast %56 : vector<64x1xf32> to vector<64x16xf32>
    %62 = arith.mulf %60, %61 : vector<64x16xf32>
    %c0_28 = arith.constant 0 : index
    %c2 = arith.constant 2 : index
    %63 = vector.load %arg3[%c0_28, %c2] : memref<64x8xf32, #tpu.memory_space<vmem>>, vector<64x1xf32>
    %c2_29 = arith.constant 2 : index
    %c0_30 = arith.constant 0 : index
    %64 = vector.load %arg2[%c2_29, %c0_30] : memref<8x128xf32, #tpu.memory_space<vmem>>, vector<1x128xf32>
    %65 = vector.broadcast %63 : vector<64x1xf32> to vector<64x128xf32>
    %66 = vector.broadcast %64 : vector<1x128xf32> to vector<64x128xf32>
    %67 = arith.addf %65, %66 : vector<64x128xf32>
    %cst_31 = arith.constant 0.000000e+00 : f32
    %68 = vector.broadcast %cst_31 : f32 to vector<64x128xf32>
    %69 = arith.cmpf ogt, %67, %68 : vector<64x128xf32>
    %cst_32 = arith.constant 2.000000e-01 : f32
    %70 = vector.broadcast %cst_32 : f32 to vector<64x128xf32>
    %71 = arith.mulf %70, %67 : vector<64x128xf32>
    %72 = arith.select %69, %67, %71 : vector<64x128xi1>, vector<64x128xf32>
    %cst_33 = arith.constant -1.000000e+30 : f32
    %73 = vector.broadcast %cst_33 : f32 to vector<64x128xf32>
    %74 = arith.select %2, %72, %73 : vector<64x128xi1>, vector<64x128xf32>
    %cst_34 = arith.constant dense<0xFF800000> : vector<64xf32>
    %75 = vector.multi_reduction <maximumf>, %74, %cst_34 [1] : vector<64x128xf32> to vector<64xf32>
    %76 = vector.shape_cast %75 : vector<64xf32> to vector<64x1xf32>
    %77 = vector.broadcast %76 : vector<64x1xf32> to vector<64x128xf32>
    %78 = arith.subf %74, %77 : vector<64x128xf32>
    %79 = math.exp %78 : vector<64x128xf32>
    %cst_35 = arith.constant dense<0.000000e+00> : vector<64xf32>
    %80 = vector.multi_reduction <add>, %79, %cst_35 [1] : vector<64x128xf32> to vector<64xf32>
    %81 = vector.shape_cast %80 : vector<64xf32> to vector<64x1xf32>
    %82 = tpu.reciprocal %81 {approx = true} : vector<64x1xf32> -> vector<64x1xf32>
    %83 = arith.mulf %81, %82 : vector<64x1xf32>
    %cst_36 = arith.constant 2.000000e+00 : f32
    %84 = vector.broadcast %cst_36 : f32 to vector<64x1xf32>
    %85 = arith.subf %84, %83 : vector<64x1xf32>
    %86 = arith.mulf %82, %85 : vector<64x1xf32>
    %87 = arith.mulf %79, %0 : vector<64x128xf32>
    %c2_37 = arith.constant 2 : index
    %c0_38 = arith.constant 0 : index
    %c0_39 = arith.constant 0 : index
    %88 = vector.load %arg4[%c2_37, %c0_38, %c0_39] : memref<8x128x16xf32, #tpu.memory_space<vmem>>, vector<1x128x16xf32>
    %89 = vector.shape_cast %88 : vector<1x128x16xf32> to vector<128x16xf32>
    %cst_40 = arith.constant dense<0.000000e+00> : vector<64x16xf32>
    %90 = tpu.matmul %87, %89, %cst_40 {dimension_numbers = #tpu.dot_dimension_numbers<[1], [0], [0], [1], [0, 0, 1, 1], [], []>} : vector<64x128xf32>, vector<128x16xf32>, vector<64x16xf32> -> vector<64x16xf32>
    %91 = vector.broadcast %86 : vector<64x1xf32> to vector<64x16xf32>
    %92 = arith.mulf %90, %91 : vector<64x16xf32>
    %c0_41 = arith.constant 0 : index
    %c3 = arith.constant 3 : index
    %93 = vector.load %arg3[%c0_41, %c3] : memref<64x8xf32, #tpu.memory_space<vmem>>, vector<64x1xf32>
    %c3_42 = arith.constant 3 : index
    %c0_43 = arith.constant 0 : index
    %94 = vector.load %arg2[%c3_42, %c0_43] : memref<8x128xf32, #tpu.memory_space<vmem>>, vector<1x128xf32>
    %95 = vector.broadcast %93 : vector<64x1xf32> to vector<64x128xf32>
    %96 = vector.broadcast %94 : vector<1x128xf32> to vector<64x128xf32>
    %97 = arith.addf %95, %96 : vector<64x128xf32>
    %cst_44 = arith.constant 0.000000e+00 : f32
    %98 = vector.broadcast %cst_44 : f32 to vector<64x128xf32>
    %99 = arith.cmpf ogt, %97, %98 : vector<64x128xf32>
    %cst_45 = arith.constant 2.000000e-01 : f32
    %100 = vector.broadcast %cst_45 : f32 to vector<64x128xf32>
    %101 = arith.mulf %100, %97 : vector<64x128xf32>
    %102 = arith.select %99, %97, %101 : vector<64x128xi1>, vector<64x128xf32>
    %cst_46 = arith.constant -1.000000e+30 : f32
    %103 = vector.broadcast %cst_46 : f32 to vector<64x128xf32>
    %104 = arith.select %2, %102, %103 : vector<64x128xi1>, vector<64x128xf32>
    %cst_47 = arith.constant dense<0xFF800000> : vector<64xf32>
    %105 = vector.multi_reduction <maximumf>, %104, %cst_47 [1] : vector<64x128xf32> to vector<64xf32>
    %106 = vector.shape_cast %105 : vector<64xf32> to vector<64x1xf32>
    %107 = vector.broadcast %106 : vector<64x1xf32> to vector<64x128xf32>
    %108 = arith.subf %104, %107 : vector<64x128xf32>
    %109 = math.exp %108 : vector<64x128xf32>
    %cst_48 = arith.constant dense<0.000000e+00> : vector<64xf32>
    %110 = vector.multi_reduction <add>, %109, %cst_48 [1] : vector<64x128xf32> to vector<64xf32>
    %111 = vector.shape_cast %110 : vector<64xf32> to vector<64x1xf32>
    %112 = tpu.reciprocal %111 {approx = true} : vector<64x1xf32> -> vector<64x1xf32>
    %113 = arith.mulf %111, %112 : vector<64x1xf32>
    %cst_49 = arith.constant 2.000000e+00 : f32
    %114 = vector.broadcast %cst_49 : f32 to vector<64x1xf32>
    %115 = arith.subf %114, %113 : vector<64x1xf32>
    %116 = arith.mulf %112, %115 : vector<64x1xf32>
    %117 = arith.mulf %109, %0 : vector<64x128xf32>
    %c3_50 = arith.constant 3 : index
    %c0_51 = arith.constant 0 : index
    %c0_52 = arith.constant 0 : index
    %118 = vector.load %arg4[%c3_50, %c0_51, %c0_52] : memref<8x128x16xf32, #tpu.memory_space<vmem>>, vector<1x128x16xf32>
    %119 = vector.shape_cast %118 : vector<1x128x16xf32> to vector<128x16xf32>
    %cst_53 = arith.constant dense<0.000000e+00> : vector<64x16xf32>
    %120 = tpu.matmul %117, %119, %cst_53 {dimension_numbers = #tpu.dot_dimension_numbers<[1], [0], [0], [1], [0, 0, 1, 1], [], []>} : vector<64x128xf32>, vector<128x16xf32>, vector<64x16xf32> -> vector<64x16xf32>
    %121 = vector.broadcast %116 : vector<64x1xf32> to vector<64x16xf32>
    %122 = arith.mulf %120, %121 : vector<64x16xf32>
    %c0_54 = arith.constant 0 : index
    %c4 = arith.constant 4 : index
    %123 = vector.load %arg3[%c0_54, %c4] : memref<64x8xf32, #tpu.memory_space<vmem>>, vector<64x1xf32>
    %c4_55 = arith.constant 4 : index
    %c0_56 = arith.constant 0 : index
    %124 = vector.load %arg2[%c4_55, %c0_56] : memref<8x128xf32, #tpu.memory_space<vmem>>, vector<1x128xf32>
    %125 = vector.broadcast %123 : vector<64x1xf32> to vector<64x128xf32>
    %126 = vector.broadcast %124 : vector<1x128xf32> to vector<64x128xf32>
    %127 = arith.addf %125, %126 : vector<64x128xf32>
    %cst_57 = arith.constant 0.000000e+00 : f32
    %128 = vector.broadcast %cst_57 : f32 to vector<64x128xf32>
    %129 = arith.cmpf ogt, %127, %128 : vector<64x128xf32>
    %cst_58 = arith.constant 2.000000e-01 : f32
    %130 = vector.broadcast %cst_58 : f32 to vector<64x128xf32>
    %131 = arith.mulf %130, %127 : vector<64x128xf32>
    %132 = arith.select %129, %127, %131 : vector<64x128xi1>, vector<64x128xf32>
    %cst_59 = arith.constant -1.000000e+30 : f32
    %133 = vector.broadcast %cst_59 : f32 to vector<64x128xf32>
    %134 = arith.select %2, %132, %133 : vector<64x128xi1>, vector<64x128xf32>
    %cst_60 = arith.constant dense<0xFF800000> : vector<64xf32>
    %135 = vector.multi_reduction <maximumf>, %134, %cst_60 [1] : vector<64x128xf32> to vector<64xf32>
    %136 = vector.shape_cast %135 : vector<64xf32> to vector<64x1xf32>
    %137 = vector.broadcast %136 : vector<64x1xf32> to vector<64x128xf32>
    %138 = arith.subf %134, %137 : vector<64x128xf32>
    %139 = math.exp %138 : vector<64x128xf32>
    %cst_61 = arith.constant dense<0.000000e+00> : vector<64xf32>
    %140 = vector.multi_reduction <add>, %139, %cst_61 [1] : vector<64x128xf32> to vector<64xf32>
    %141 = vector.shape_cast %140 : vector<64xf32> to vector<64x1xf32>
    %142 = tpu.reciprocal %141 {approx = true} : vector<64x1xf32> -> vector<64x1xf32>
    %143 = arith.mulf %141, %142 : vector<64x1xf32>
    %cst_62 = arith.constant 2.000000e+00 : f32
    %144 = vector.broadcast %cst_62 : f32 to vector<64x1xf32>
    %145 = arith.subf %144, %143 : vector<64x1xf32>
    %146 = arith.mulf %142, %145 : vector<64x1xf32>
    %147 = arith.mulf %139, %0 : vector<64x128xf32>
    %c4_63 = arith.constant 4 : index
    %c0_64 = arith.constant 0 : index
    %c0_65 = arith.constant 0 : index
    %148 = vector.load %arg4[%c4_63, %c0_64, %c0_65] : memref<8x128x16xf32, #tpu.memory_space<vmem>>, vector<1x128x16xf32>
    %149 = vector.shape_cast %148 : vector<1x128x16xf32> to vector<128x16xf32>
    %cst_66 = arith.constant dense<0.000000e+00> : vector<64x16xf32>
    %150 = tpu.matmul %147, %149, %cst_66 {dimension_numbers = #tpu.dot_dimension_numbers<[1], [0], [0], [1], [0, 0, 1, 1], [], []>} : vector<64x128xf32>, vector<128x16xf32>, vector<64x16xf32> -> vector<64x16xf32>
    %151 = vector.broadcast %146 : vector<64x1xf32> to vector<64x16xf32>
    %152 = arith.mulf %150, %151 : vector<64x16xf32>
    %c0_67 = arith.constant 0 : index
    %c5 = arith.constant 5 : index
    %153 = vector.load %arg3[%c0_67, %c5] : memref<64x8xf32, #tpu.memory_space<vmem>>, vector<64x1xf32>
    %c5_68 = arith.constant 5 : index
    %c0_69 = arith.constant 0 : index
    %154 = vector.load %arg2[%c5_68, %c0_69] : memref<8x128xf32, #tpu.memory_space<vmem>>, vector<1x128xf32>
    %155 = vector.broadcast %153 : vector<64x1xf32> to vector<64x128xf32>
    %156 = vector.broadcast %154 : vector<1x128xf32> to vector<64x128xf32>
    %157 = arith.addf %155, %156 : vector<64x128xf32>
    %cst_70 = arith.constant 0.000000e+00 : f32
    %158 = vector.broadcast %cst_70 : f32 to vector<64x128xf32>
    %159 = arith.cmpf ogt, %157, %158 : vector<64x128xf32>
    %cst_71 = arith.constant 2.000000e-01 : f32
    %160 = vector.broadcast %cst_71 : f32 to vector<64x128xf32>
    %161 = arith.mulf %160, %157 : vector<64x128xf32>
    %162 = arith.select %159, %157, %161 : vector<64x128xi1>, vector<64x128xf32>
    %cst_72 = arith.constant -1.000000e+30 : f32
    %163 = vector.broadcast %cst_72 : f32 to vector<64x128xf32>
    %164 = arith.select %2, %162, %163 : vector<64x128xi1>, vector<64x128xf32>
    %cst_73 = arith.constant dense<0xFF800000> : vector<64xf32>
    %165 = vector.multi_reduction <maximumf>, %164, %cst_73 [1] : vector<64x128xf32> to vector<64xf32>
    %166 = vector.shape_cast %165 : vector<64xf32> to vector<64x1xf32>
    %167 = vector.broadcast %166 : vector<64x1xf32> to vector<64x128xf32>
    %168 = arith.subf %164, %167 : vector<64x128xf32>
    %169 = math.exp %168 : vector<64x128xf32>
    %cst_74 = arith.constant dense<0.000000e+00> : vector<64xf32>
    %170 = vector.multi_reduction <add>, %169, %cst_74 [1] : vector<64x128xf32> to vector<64xf32>
    %171 = vector.shape_cast %170 : vector<64xf32> to vector<64x1xf32>
    %172 = tpu.reciprocal %171 {approx = true} : vector<64x1xf32> -> vector<64x1xf32>
    %173 = arith.mulf %171, %172 : vector<64x1xf32>
    %cst_75 = arith.constant 2.000000e+00 : f32
    %174 = vector.broadcast %cst_75 : f32 to vector<64x1xf32>
    %175 = arith.subf %174, %173 : vector<64x1xf32>
    %176 = arith.mulf %172, %175 : vector<64x1xf32>
    %177 = arith.mulf %169, %0 : vector<64x128xf32>
    %c5_76 = arith.constant 5 : index
    %c0_77 = arith.constant 0 : index
    %c0_78 = arith.constant 0 : index
    %178 = vector.load %arg4[%c5_76, %c0_77, %c0_78] : memref<8x128x16xf32, #tpu.memory_space<vmem>>, vector<1x128x16xf32>
    %179 = vector.shape_cast %178 : vector<1x128x16xf32> to vector<128x16xf32>
    %cst_79 = arith.constant dense<0.000000e+00> : vector<64x16xf32>
    %180 = tpu.matmul %177, %179, %cst_79 {dimension_numbers = #tpu.dot_dimension_numbers<[1], [0], [0], [1], [0, 0, 1, 1], [], []>} : vector<64x128xf32>, vector<128x16xf32>, vector<64x16xf32> -> vector<64x16xf32>
    %181 = vector.broadcast %176 : vector<64x1xf32> to vector<64x16xf32>
    %182 = arith.mulf %180, %181 : vector<64x16xf32>
    %c0_80 = arith.constant 0 : index
    %c6 = arith.constant 6 : index
    %183 = vector.load %arg3[%c0_80, %c6] : memref<64x8xf32, #tpu.memory_space<vmem>>, vector<64x1xf32>
    %c6_81 = arith.constant 6 : index
    %c0_82 = arith.constant 0 : index
    %184 = vector.load %arg2[%c6_81, %c0_82] : memref<8x128xf32, #tpu.memory_space<vmem>>, vector<1x128xf32>
    %185 = vector.broadcast %183 : vector<64x1xf32> to vector<64x128xf32>
    %186 = vector.broadcast %184 : vector<1x128xf32> to vector<64x128xf32>
    %187 = arith.addf %185, %186 : vector<64x128xf32>
    %cst_83 = arith.constant 0.000000e+00 : f32
    %188 = vector.broadcast %cst_83 : f32 to vector<64x128xf32>
    %189 = arith.cmpf ogt, %187, %188 : vector<64x128xf32>
    %cst_84 = arith.constant 2.000000e-01 : f32
    %190 = vector.broadcast %cst_84 : f32 to vector<64x128xf32>
    %191 = arith.mulf %190, %187 : vector<64x128xf32>
    %192 = arith.select %189, %187, %191 : vector<64x128xi1>, vector<64x128xf32>
    %cst_85 = arith.constant -1.000000e+30 : f32
    %193 = vector.broadcast %cst_85 : f32 to vector<64x128xf32>
    %194 = arith.select %2, %192, %193 : vector<64x128xi1>, vector<64x128xf32>
    %cst_86 = arith.constant dense<0xFF800000> : vector<64xf32>
    %195 = vector.multi_reduction <maximumf>, %194, %cst_86 [1] : vector<64x128xf32> to vector<64xf32>
    %196 = vector.shape_cast %195 : vector<64xf32> to vector<64x1xf32>
    %197 = vector.broadcast %196 : vector<64x1xf32> to vector<64x128xf32>
    %198 = arith.subf %194, %197 : vector<64x128xf32>
    %199 = math.exp %198 : vector<64x128xf32>
    %cst_87 = arith.constant dense<0.000000e+00> : vector<64xf32>
    %200 = vector.multi_reduction <add>, %199, %cst_87 [1] : vector<64x128xf32> to vector<64xf32>
    %201 = vector.shape_cast %200 : vector<64xf32> to vector<64x1xf32>
    %202 = tpu.reciprocal %201 {approx = true} : vector<64x1xf32> -> vector<64x1xf32>
    %203 = arith.mulf %201, %202 : vector<64x1xf32>
    %cst_88 = arith.constant 2.000000e+00 : f32
    %204 = vector.broadcast %cst_88 : f32 to vector<64x1xf32>
    %205 = arith.subf %204, %203 : vector<64x1xf32>
    %206 = arith.mulf %202, %205 : vector<64x1xf32>
    %207 = arith.mulf %199, %0 : vector<64x128xf32>
    %c6_89 = arith.constant 6 : index
    %c0_90 = arith.constant 0 : index
    %c0_91 = arith.constant 0 : index
    %208 = vector.load %arg4[%c6_89, %c0_90, %c0_91] : memref<8x128x16xf32, #tpu.memory_space<vmem>>, vector<1x128x16xf32>
    %209 = vector.shape_cast %208 : vector<1x128x16xf32> to vector<128x16xf32>
    %cst_92 = arith.constant dense<0.000000e+00> : vector<64x16xf32>
    %210 = tpu.matmul %207, %209, %cst_92 {dimension_numbers = #tpu.dot_dimension_numbers<[1], [0], [0], [1], [0, 0, 1, 1], [], []>} : vector<64x128xf32>, vector<128x16xf32>, vector<64x16xf32> -> vector<64x16xf32>
    %211 = vector.broadcast %206 : vector<64x1xf32> to vector<64x16xf32>
    %212 = arith.mulf %210, %211 : vector<64x16xf32>
    %c0_93 = arith.constant 0 : index
    %c7 = arith.constant 7 : index
    %213 = vector.load %arg3[%c0_93, %c7] : memref<64x8xf32, #tpu.memory_space<vmem>>, vector<64x1xf32>
    %c7_94 = arith.constant 7 : index
    %c0_95 = arith.constant 0 : index
    %214 = vector.load %arg2[%c7_94, %c0_95] : memref<8x128xf32, #tpu.memory_space<vmem>>, vector<1x128xf32>
    %215 = vector.broadcast %213 : vector<64x1xf32> to vector<64x128xf32>
    %216 = vector.broadcast %214 : vector<1x128xf32> to vector<64x128xf32>
    %217 = arith.addf %215, %216 : vector<64x128xf32>
    %cst_96 = arith.constant 0.000000e+00 : f32
    %218 = vector.broadcast %cst_96 : f32 to vector<64x128xf32>
    %219 = arith.cmpf ogt, %217, %218 : vector<64x128xf32>
    %cst_97 = arith.constant 2.000000e-01 : f32
    %220 = vector.broadcast %cst_97 : f32 to vector<64x128xf32>
    %221 = arith.mulf %220, %217 : vector<64x128xf32>
    %222 = arith.select %219, %217, %221 : vector<64x128xi1>, vector<64x128xf32>
    %cst_98 = arith.constant -1.000000e+30 : f32
    %223 = vector.broadcast %cst_98 : f32 to vector<64x128xf32>
    %224 = arith.select %2, %222, %223 : vector<64x128xi1>, vector<64x128xf32>
    %cst_99 = arith.constant dense<0xFF800000> : vector<64xf32>
    %225 = vector.multi_reduction <maximumf>, %224, %cst_99 [1] : vector<64x128xf32> to vector<64xf32>
    %226 = vector.shape_cast %225 : vector<64xf32> to vector<64x1xf32>
    %227 = vector.broadcast %226 : vector<64x1xf32> to vector<64x128xf32>
    %228 = arith.subf %224, %227 : vector<64x128xf32>
    %229 = math.exp %228 : vector<64x128xf32>
    %cst_100 = arith.constant dense<0.000000e+00> : vector<64xf32>
    %230 = vector.multi_reduction <add>, %229, %cst_100 [1] : vector<64x128xf32> to vector<64xf32>
    %231 = vector.shape_cast %230 : vector<64xf32> to vector<64x1xf32>
    %232 = tpu.reciprocal %231 {approx = true} : vector<64x1xf32> -> vector<64x1xf32>
    %233 = arith.mulf %231, %232 : vector<64x1xf32>
    %cst_101 = arith.constant 2.000000e+00 : f32
    %234 = vector.broadcast %cst_101 : f32 to vector<64x1xf32>
    %235 = arith.subf %234, %233 : vector<64x1xf32>
    %236 = arith.mulf %232, %235 : vector<64x1xf32>
    %237 = arith.mulf %229, %0 : vector<64x128xf32>
    %c7_102 = arith.constant 7 : index
    %c0_103 = arith.constant 0 : index
    %c0_104 = arith.constant 0 : index
    %238 = vector.load %arg4[%c7_102, %c0_103, %c0_104] : memref<8x128x16xf32, #tpu.memory_space<vmem>>, vector<1x128x16xf32>
    %239 = vector.shape_cast %238 : vector<1x128x16xf32> to vector<128x16xf32>
    %cst_105 = arith.constant dense<0.000000e+00> : vector<64x16xf32>
    %240 = tpu.matmul %237, %239, %cst_105 {dimension_numbers = #tpu.dot_dimension_numbers<[1], [0], [0], [1], [0, 0, 1, 1], [], []>} : vector<64x128xf32>, vector<128x16xf32>, vector<64x16xf32> -> vector<64x16xf32>
    %241 = vector.broadcast %236 : vector<64x1xf32> to vector<64x16xf32>
    %242 = arith.mulf %240, %241 : vector<64x16xf32>
    %243 = tpu.concatenate %32, %62, %92, %122, %152, %182, %212, %242 in 1 : vector<64x16xf32>, vector<64x16xf32>, vector<64x16xf32>, vector<64x16xf32>, vector<64x16xf32>, vector<64x16xf32>, vector<64x16xf32>, vector<64x16xf32> -> vector<64x128xf32>
    %c0_106 = arith.constant 0 : index
    %c0_107 = arith.constant 0 : index
    %244 = vector.load %arg5[%c0_106, %c0_107] : memref<1x128xf32, #tpu.memory_space<vmem>>, vector<1x128xf32>
    %245 = vector.broadcast %244 : vector<1x128xf32> to vector<64x128xf32>
    %246 = arith.addf %243, %245 : vector<64x128xf32>
    %cst_108 = arith.constant 0.000000e+00 : f32
    %247 = vector.broadcast %cst_108 : f32 to vector<64x128xf32>
    %248 = arith.cmpf ogt, %246, %247 : vector<64x128xf32>
    %249 = math.exp %246 : vector<64x128xf32>
    %cst_109 = arith.constant 1.000000e+00 : f32
    %250 = vector.broadcast %cst_109 : f32 to vector<64x128xf32>
    %251 = arith.subf %249, %250 : vector<64x128xf32>
    %252 = arith.select %248, %246, %251 : vector<64x128xi1>, vector<64x128xf32>
    %c0_110 = arith.constant 0 : index
    %c0_111 = arith.constant 0 : index
    %253 = vector.load %arg6[%c0_110, %c0_111] : memref<64x128xf32, #tpu.memory_space<vmem>>, vector<64x128xf32>
    tpu.vector_store %arg6[%c0_110, %c0_111], %252 {strides = array<i32>} : memref<64x128xf32, #tpu.memory_space<vmem>>, vector<64x128xf32>,
    return
  }
  func.func @transform_0(%arg0: i32) -> (i32, i32) {
    %c0_i32 = arith.constant 0 : i32
    %c0_i32_0 = arith.constant 0 : i32
    return %arg0, %c0_i32 : i32, i32
  }
  func.func @transform_1(%arg0: i32) -> (i32, i32) {
    %c0_i32 = arith.constant 0 : i32
    %c0_i32_0 = arith.constant 0 : i32
    %c0_i32_1 = arith.constant 0 : i32
    return %c0_i32, %c0_i32_0 : i32, i32
  }
  func.func @transform_2(%arg0: i32) -> (i32, i32) {
    %c0_i32 = arith.constant 0 : i32
    %c0_i32_0 = arith.constant 0 : i32
    return %arg0, %c0_i32 : i32, i32
  }
  func.func @transform_3(%arg0: i32) -> (i32, i32, i32) {
    %c0_i32 = arith.constant 0 : i32
    %c0_i32_0 = arith.constant 0 : i32
    %c0_i32_1 = arith.constant 0 : i32
    %c0_i32_2 = arith.constant 0 : i32
    return %c0_i32, %c0_i32_0, %c0_i32_1 : i32, i32, i32
  }
  func.func @transform_4(%arg0: i32) -> (i32, i32) {
    %c0_i32 = arith.constant 0 : i32
    %c0_i32_0 = arith.constant 0 : i32
    %c0_i32_1 = arith.constant 0 : i32
    return %c0_i32, %c0_i32_0 : i32, i32
  }
  func.func @transform_5(%arg0: i32) -> (i32, i32) {
    %c0_i32 = arith.constant 0 : i32
    %c0_i32_0 = arith.constant 0 : i32
    return %arg0, %c0_i32 : i32, i32
  }
}

module attributes {stable_mosaic.version = 11 : i64} {
  func.func @gat_project_kernel(%arg0: i32, %arg1: memref<64x128xf32, #tpu.memory_space<vmem>>, %arg2: memref<128x256xf32, #tpu.memory_space<vmem>>, %arg3: memref<64x256xf32, #tpu.memory_space<vmem>>) attributes {dimension_semantics = [#tpu.dimension_semantics<parallel>], iteration_bounds = array<i64: 2>, scalar_prefetch = 0 : i64, scratch_operands = 0 : i64, tpu.core_type = #tpu.core_type<tc>, window_params = [{transform_indices = @transform_0, window_bounds = array<i64: 64, 128>}, {pipeline_mode = #tpu.pipeline_mode<synchronous>, transform_indices = @transform_1, window_bounds = array<i64: 128, 256>}, {transform_indices = @transform_2, window_bounds = array<i64: 64, 256>}]} {
    %c0 = arith.constant 0 : index
    %c0_0 = arith.constant 0 : index
    %0 = vector.load %arg1[%c0, %c0_0] : memref<64x128xf32, #tpu.memory_space<vmem>>, vector<64x128xf32>
    %c0_1 = arith.constant 0 : index
    %c0_2 = arith.constant 0 : index
    %1 = vector.load %arg2[%c0_1, %c0_2] : memref<128x256xf32, #tpu.memory_space<vmem>>, vector<128x256xf32>
    %cst = arith.constant dense<0.000000e+00> : vector<64x256xf32>
    %2 = tpu.matmul %0, %1, %cst {dimension_numbers = #tpu.dot_dimension_numbers<[1], [0], [0], [1], [0, 0, 1, 1], [], []>} : vector<64x128xf32>, vector<128x256xf32>, vector<64x256xf32> -> vector<64x256xf32>
    %c0_3 = arith.constant 0 : index
    %c0_4 = arith.constant 0 : index
    %3 = vector.load %arg3[%c0_3, %c0_4] : memref<64x256xf32, #tpu.memory_space<vmem>>, vector<64x256xf32>
    tpu.vector_store %arg3[%c0_3, %c0_4], %2 {strides = array<i32>} : memref<64x256xf32, #tpu.memory_space<vmem>>, vector<64x256xf32>,
    return
  }
  func.func @transform_0(%arg0: i32) -> (i32, i32) {
    %c0_i32 = arith.constant 0 : i32
    %c0_i32_0 = arith.constant 0 : i32
    return %arg0, %c0_i32 : i32, i32
  }
  func.func @transform_1(%arg0: i32) -> (i32, i32) {
    %c0_i32 = arith.constant 0 : i32
    %c0_i32_0 = arith.constant 0 : i32
    %c0_i32_1 = arith.constant 0 : i32
    return %c0_i32, %c0_i32_0 : i32, i32
  }
  func.func @transform_2(%arg0: i32) -> (i32, i32) {
    %c0_i32 = arith.constant 0 : i32
    %c0_i32_0 = arith.constant 0 : i32
    return %arg0, %c0_i32 : i32, i32
  }
}

module attributes {stable_mosaic.version = 11 : i64} {
  func.func @gat_attention_kernel(%arg0: i32, %arg1: memref<64x128xf32, #tpu.memory_space<vmem>>, %arg2: memref<1x128xf32, #tpu.memory_space<vmem>>, %arg3: memref<64x1xf32, #tpu.memory_space<vmem>>, %arg4: memref<1x128x128xf32, #tpu.memory_space<vmem>>, %arg5: memref<1x128xf32, #tpu.memory_space<vmem>>, %arg6: memref<64x128xf32, #tpu.memory_space<vmem>>) attributes {dimension_semantics = [#tpu.dimension_semantics<parallel>], iteration_bounds = array<i64: 2>, scalar_prefetch = 0 : i64, scratch_operands = 0 : i64, tpu.core_type = #tpu.core_type<tc>, window_params = [{transform_indices = @transform_0, window_bounds = array<i64: 64, 128>}, {pipeline_mode = #tpu.pipeline_mode<synchronous>, transform_indices = @transform_1, window_bounds = array<i64: 1, 128>}, {transform_indices = @transform_2, window_bounds = array<i64: 64, 1>}, {pipeline_mode = #tpu.pipeline_mode<synchronous>, transform_indices = @transform_3, window_bounds = array<i64: 1, 128, 128>}, {pipeline_mode = #tpu.pipeline_mode<synchronous>, transform_indices = @transform_4, window_bounds = array<i64: 1, 128>}, {transform_indices = @transform_5, window_bounds = array<i64: 64, 128>}]} {
    %c0 = arith.constant 0 : index
    %c0_0 = arith.constant 0 : index
    %0 = vector.load %arg1[%c0, %c0_0] : memref<64x128xf32, #tpu.memory_space<vmem>>, vector<64x128xf32>
    %cst = arith.constant 0.000000e+00 : f32
    %1 = vector.broadcast %cst : f32 to vector<64x128xf32>
    %2 = arith.cmpf ogt, %0, %1 : vector<64x128xf32>
    %c0_1 = arith.constant 0 : index
    %c0_2 = arith.constant 0 : index
    %3 = vector.load %arg3[%c0_1, %c0_2] : memref<64x1xf32, #tpu.memory_space<vmem>>, vector<64x1xf32>
    %c0_3 = arith.constant 0 : index
    %c0_4 = arith.constant 0 : index
    %4 = vector.load %arg2[%c0_3, %c0_4] : memref<1x128xf32, #tpu.memory_space<vmem>>, vector<1x128xf32>
    %5 = vector.broadcast %3 : vector<64x1xf32> to vector<64x128xf32>
    %6 = vector.broadcast %4 : vector<1x128xf32> to vector<64x128xf32>
    %7 = arith.addf %5, %6 : vector<64x128xf32>
    %cst_5 = arith.constant 0.000000e+00 : f32
    %8 = vector.broadcast %cst_5 : f32 to vector<64x128xf32>
    %9 = arith.cmpf ogt, %7, %8 : vector<64x128xf32>
    %cst_6 = arith.constant 2.000000e-01 : f32
    %10 = vector.broadcast %cst_6 : f32 to vector<64x128xf32>
    %11 = arith.mulf %10, %7 : vector<64x128xf32>
    %12 = arith.select %9, %7, %11 : vector<64x128xi1>, vector<64x128xf32>
    %cst_7 = arith.constant -1.000000e+30 : f32
    %13 = vector.broadcast %cst_7 : f32 to vector<64x128xf32>
    %14 = arith.select %2, %12, %13 : vector<64x128xi1>, vector<64x128xf32>
    %cst_8 = arith.constant dense<0xFF800000> : vector<64xf32>
    %15 = vector.multi_reduction <maximumf>, %14, %cst_8 [1] : vector<64x128xf32> to vector<64xf32>
    %16 = vector.shape_cast %15 : vector<64xf32> to vector<64x1xf32>
    %17 = vector.broadcast %16 : vector<64x1xf32> to vector<64x128xf32>
    %18 = arith.subf %14, %17 : vector<64x128xf32>
    %19 = math.exp %18 : vector<64x128xf32>
    %cst_9 = arith.constant dense<0.000000e+00> : vector<64xf32>
    %20 = vector.multi_reduction <add>, %19, %cst_9 [1] : vector<64x128xf32> to vector<64xf32>
    %21 = vector.shape_cast %20 : vector<64xf32> to vector<64x1xf32>
    %22 = tpu.reciprocal %21 {approx = true} : vector<64x1xf32> -> vector<64x1xf32>
    %23 = arith.mulf %21, %22 : vector<64x1xf32>
    %cst_10 = arith.constant 2.000000e+00 : f32
    %24 = vector.broadcast %cst_10 : f32 to vector<64x1xf32>
    %25 = arith.subf %24, %23 : vector<64x1xf32>
    %26 = arith.mulf %22, %25 : vector<64x1xf32>
    %27 = arith.mulf %19, %0 : vector<64x128xf32>
    %c0_11 = arith.constant 0 : index
    %c0_12 = arith.constant 0 : index
    %c0_13 = arith.constant 0 : index
    %28 = vector.load %arg4[%c0_11, %c0_12, %c0_13] : memref<1x128x128xf32, #tpu.memory_space<vmem>>, vector<1x128x128xf32>
    %29 = vector.shape_cast %28 : vector<1x128x128xf32> to vector<128x128xf32>
    %cst_14 = arith.constant dense<0.000000e+00> : vector<64x128xf32>
    %30 = tpu.matmul %27, %29, %cst_14 {dimension_numbers = #tpu.dot_dimension_numbers<[1], [0], [0], [1], [0, 0, 1, 1], [], []>} : vector<64x128xf32>, vector<128x128xf32>, vector<64x128xf32> -> vector<64x128xf32>
    %31 = vector.broadcast %26 : vector<64x1xf32> to vector<64x128xf32>
    %32 = arith.mulf %30, %31 : vector<64x128xf32>
    %c0_15 = arith.constant 0 : index
    %c0_16 = arith.constant 0 : index
    %33 = vector.load %arg5[%c0_15, %c0_16] : memref<1x128xf32, #tpu.memory_space<vmem>>, vector<1x128xf32>
    %34 = vector.broadcast %33 : vector<1x128xf32> to vector<64x128xf32>
    %35 = arith.addf %32, %34 : vector<64x128xf32>
    %cst_17 = arith.constant dense<0xFF800000> : vector<64xf32>
    %36 = vector.multi_reduction <maximumf>, %35, %cst_17 [1] : vector<64x128xf32> to vector<64xf32>
    %37 = vector.shape_cast %36 : vector<64xf32> to vector<64x1xf32>
    %38 = vector.broadcast %37 : vector<64x1xf32> to vector<64x128xf32>
    %39 = arith.subf %35, %38 : vector<64x128xf32>
    %40 = math.exp %39 : vector<64x128xf32>
    %cst_18 = arith.constant dense<0.000000e+00> : vector<64xf32>
    %41 = vector.multi_reduction <add>, %40, %cst_18 [1] : vector<64x128xf32> to vector<64xf32>
    %42 = vector.shape_cast %41 : vector<64xf32> to vector<64x1xf32>
    %43 = math.log %42 : vector<64x1xf32>
    %44 = vector.broadcast %43 : vector<64x1xf32> to vector<64x128xf32>
    %45 = arith.subf %39, %44 : vector<64x128xf32>
    %c0_19 = arith.constant 0 : index
    %c0_20 = arith.constant 0 : index
    %46 = vector.load %arg6[%c0_19, %c0_20] : memref<64x128xf32, #tpu.memory_space<vmem>>, vector<64x128xf32>
    tpu.vector_store %arg6[%c0_19, %c0_20], %45 {strides = array<i32>} : memref<64x128xf32, #tpu.memory_space<vmem>>, vector<64x128xf32>,
    return
  }
  func.func @transform_0(%arg0: i32) -> (i32, i32) {
    %c0_i32 = arith.constant 0 : i32
    %c0_i32_0 = arith.constant 0 : i32
    return %arg0, %c0_i32 : i32, i32
  }
  func.func @transform_1(%arg0: i32) -> (i32, i32) {
    %c0_i32 = arith.constant 0 : i32
    %c0_i32_0 = arith.constant 0 : i32
    %c0_i32_1 = arith.constant 0 : i32
    return %c0_i32, %c0_i32_0 : i32, i32
  }
  func.func @transform_2(%arg0: i32) -> (i32, i32) {
    %c0_i32 = arith.constant 0 : i32
    %c0_i32_0 = arith.constant 0 : i32
    return %arg0, %c0_i32 : i32, i32
  }
  func.func @transform_3(%arg0: i32) -> (i32, i32, i32) {
    %c0_i32 = arith.constant 0 : i32
    %c0_i32_0 = arith.constant 0 : i32
    %c0_i32_1 = arith.constant 0 : i32
    %c0_i32_2 = arith.constant 0 : i32
    return %c0_i32, %c0_i32_0, %c0_i32_1 : i32, i32, i32
  }
  func.func @transform_4(%arg0: i32) -> (i32, i32) {
    %c0_i32 = arith.constant 0 : i32
    %c0_i32_0 = arith.constant 0 : i32
    %c0_i32_1 = arith.constant 0 : i32
    return %c0_i32, %c0_i32_0 : i32, i32
  }
  func.func @transform_5(%arg0: i32) -> (i32, i32) {
    %c0_i32 = arith.constant 0 : i32
    %c0_i32_0 = arith.constant 0 : i32
    return %arg0, %c0_i32 : i32, i32
  }
}

</mosaic_0001>

<bundles_post_ra>
// kernel: gat_forward.4
= control target key start
LH: loop header
LB: loop body
LE: loop exit
PB: predicated region body
PF: predicated region fallthrough
CT: control target
= control target key end

     0   :  { %s443_s9 = smov 0   ;;  %s514_s0 = inlined_call_operand.vmem [shape: f32[128,32], index: 0, kind: input, shape index: {}]   ;;  %s515_s1 = inlined_call_operand.vmem [shape: f32[32,256], index: 1, kind: input, shape index: {}]   ;;  %s516_s2 = inlined_call_operand.vmem [shape: f32[128,256], index: 2, kind: output, shape index: {}]  }
   0x1 LB: > { %s377_s10 = sadd.s32 4294967295, %s425_s9   ;;  %p381_p0 = scmp.ge.s32.totalorder %s425_s9, 1  ;;  %s425_s9 = sphi %s443_s9, %s12_s9  }
   0x2   : > { %p113_p1 = scmp.lt.s32.totalorder %s425_s9, 3 }
   0x4   : > { %p114_p2 = pnand %p381_p0, %p113_p1 }
   0x5   : > { %v158_v0 = vld [vmem:[%s515_s1 + $0x8] sm:$0xff] (!%p114_p2)  ;;  %v160_v1 = vld [vmem:[%s515_s1 + $0x18] sm:$0xff] (!%p114_p2)  ;;  %v157_v2 = vld [vmem:[%s515_s1] sm:$0xff] (!%p114_p2)  ;;  %s382_s17 = sshll.u32 (!%p114_p2), %s377_s10, 3  ;;  %v427_v7 = vmov (!%p114_p2), 0.0   ;;  %vm165_vm0 = vcmask (!%p114_p2), 261120  }
   0x6   : > { %117 = sbr.rel (%p114_p2) target bundleno = 244 (0xf4), region = 28  ;;  %v398_v3 = vpack.c.bf16 (!%p114_p2), %v160_v1, %v158_v0  ;;  %v159_v4 = vld [vmem:[%s515_s1 + $0x10] sm:$0xff] (!%p114_p2)  ;;  %v162_v5 = vld [vmem:[%s515_s1 + $0x28] sm:$0xff] (!%p114_p2)  ;;  %v164_v6 = vld [vmem:[%s515_s1 + $0x38] sm:$0xff] (!%p114_p2)  ;;  %254 = vmatprep.mubr.f32.mxu0 (!%p114_p2), %v427_v7  ;;  %278 = vmatprep.mubr.f32.mxu1 (!%p114_p2), %v427_v7  ;;  %p137_p3 = scmp.lt.s32.totalorder (!%p114_p2), %s382_s17, 15 }
   0x7   : > { %v400_v8 = vpack.c.bf16 (!%p114_p2), %v159_v4, %v157_v2  ;;  %v402_v9 = vpack.c.bf16 (!%p114_p2), %v164_v6, %v162_v5  ;;  %v161_v10 = vld [vmem:[%s515_s1 + $0x20] sm:$0xff] (!%p114_p2)  ;;  %v163_v11 = vld [vmem:[%s515_s1 + $0x30] sm:$0xff] (!%p114_p2) }
   0x8   : > { %399 = vmatprep.subr.bf16.mxu0 (!%p114_p2), %v398_v3  ;;  %406 = vmatprep.subr.bf16.mxu1 (!%p114_p2), %v398_v3  ;;  %v404_v12 = vpack.c.bf16 (!%p114_p2), %v163_v11, %v161_v10 }
   0x9   : > { %401 = vmatpush1.bf16.msra.mxu0 (!%p114_p2), %v400_v8  ;;  %408 = vmatpush1.bf16.msra.mxu1 (!%p114_p2), %v400_v8 }
   0xa   : > { %403 = vmatprep.subr.bf16.mxu0 (!%p114_p2), %v402_v9  ;;  %407 = vmatprep.subr.bf16.mxu1 (!%p114_p2), %v402_v9 }
   0xd   : > { %s518_s17 = smov (!%p137_p3, %s382_s17), 15  ;;  %405 = vmatpush1.bf16.msra.mxu0 %v404_v12  ;;  %409 = vmatpush1.bf16.msra.mxu1 %v404_v12 }
   0xe   : > { %s383_s28 = sshll.u32 %s518_s17, 3  ;;  %s397_s4 = sshll.u32 %s518_s17, 4 }
   0xf   : > { %s140_s3 = scalar_lea.vmem %s514_s0, %s383_s28  ;;  %s493_s7 = scalar_lea.vmem %s516_s2, %s397_s4 }
  0x10   : > { %v149_v13 = vld [vmem:[%s140_s3] sm:$0xff]  ;;  %v150_v15 = vld [vmem:[%s140_s3 + $0x8] sm:$0xff]  ;;  %v151_v17 = vld [vmem:[%s140_s3 + $0x10] sm:$0xff] }
  0x11   : > { %v153_v14 = vld [vmem:[%s140_s3 + $0x20] sm:$0xff]  ;;  %387 = vmatmul.mubr.msk.f32.vlgmr.msra.gmra.mrb[0].mxu0 %vm165_vm0, %v149_v13  ;;  %v154_v16 = vld [vmem:[%s140_s3 + $0x28] sm:$0xff]  ;;  %v155_v18 = vld [vmem:[%s140_s3 + $0x30] sm:$0xff] }
  0x12   : > { %391 = vmatmul.mubr.msk.f32.vlgmr.msra.gmra.mrb[0].mxu1 %vm165_vm0, %v153_v14  ;;  %260 = vmatprep.mubr.f32.mxu0 %v427_v7  ;;  %v152_v19 = vld [vmem:[%s140_s3 + $0x18] sm:$0xff] }
  0x13   : > { %284 = vmatprep.mubr.f32.mxu1 %v427_v7  ;;  %v156_v20 = vld [vmem:[%s140_s3 + $0x38] sm:$0xff] }
  0x15   : > { %388 = vmatmul.mubr.msk.f32.gmra.mrb[2].mxu0 %vm165_vm0, %v150_v15 }
  0x16   : > { %392 = vmatmul.mubr.msk.f32.gmra.mrb[2].mxu1 %vm165_vm0, %v154_v16  ;;  %266 = vmatprep.mubr.f32.mxu0 %v427_v7 }
  0x17   : > { %290 = vmatprep.mubr.f32.mxu1 %v427_v7 }
  0x19   : > { %389 = vmatmul.mubr.msk.f32.gmra.mrb[4].mxu0 %vm165_vm0, %v151_v17 }
  0x1a   : > { %393 = vmatmul.mubr.msk.f32.gmra.mrb[4].mxu1 %vm165_vm0, %v155_v18  ;;  %272 = vmatprep.mubr.f32.mxu0 %v427_v7 }
  0x1b   : > { %296 = vmatprep.mubr.f32.mxu1 %v427_v7 }
  0x1d   : > { %390 = vmatmul.mubr.msk.f32.gmra.mrb[6].mxu0 %vm165_vm0, %v152_v19 }
  0x1e   : > { %394 = vmatmul.mubr.msk.f32.gmra.mrb[6].mxu1 %vm165_vm0, %v156_v20 }
  0xe4   : > { %v256_v21 = vpop.f32.mrb[0].mxu0 }
  0xe5   : > { %v280_v22 = vpop.f32.mrb[0].mxu1  ;;  %303 = vst [vmem:[%s493_s7] sm:$0xff] %v256_v21  ;;  %v258_v23 = vpop.f32.mrb[1].mxu0 }
  0xe6   : > { %311 = vst [vmem:[%s493_s7 + $0x40] sm:$0xff] %v280_v22  ;;  %v282_v24 = vpop.f32.mrb[1].mxu1  ;;  %304 = vst [vmem:[%s493_s7 + $0x8] sm:$0xff] %v258_v23 }
  0xe7   : > { %312 = vst [vmem:[%s493_s7 + $0x48] sm:$0xff] %v282_v24 }
  0xe8   : > { %v262_v25 = vpop.f32.mrb[2].mxu0 }
  0xe9   : > { %v286_v26 = vpop.f32.mrb[2].mxu1  ;;  %305 = vst [vmem:[%s493_s7 + $0x10] sm:$0xff] %v262_v25  ;;  %v264_v27 = vpop.f32.mrb[3].mxu0 }
  0xea   : > { %313 = vst [vmem:[%s493_s7 + $0x50] sm:$0xff] %v286_v26  ;;  %v288_v28 = vpop.f32.mrb[3].mxu1  ;;  %306 = vst [vmem:[%s493_s7 + $0x18] sm:$0xff] %v264_v27 }
  0xeb   : > { %314 = vst [vmem:[%s493_s7 + $0x58] sm:$0xff] %v288_v28 }
  0xec   : > { %v268_v29 = vpop.f32.mrb[4].mxu0 }
  0xed   : > { %v292_v30 = vpop.f32.mrb[4].mxu1  ;;  %307 = vst [vmem:[%s493_s7 + $0x20] sm:$0xff] %v268_v29  ;;  %v270_v31 = vpop.f32.mrb[5].mxu0 }
  0xee   : > { %315 = vst [vmem:[%s493_s7 + $0x60] sm:$0xff] %v292_v30  ;;  %v294_v32 = vpop.f32.mrb[5].mxu1  ;;  %308 = vst [vmem:[%s493_s7 + $0x28] sm:$0xff] %v270_v31 }
  0xef   : > { %316 = vst [vmem:[%s493_s7 + $0x68] sm:$0xff] %v294_v32 }
  0xf0   : > { %v274_v33 = vpop.f32.mrb[6].mxu0 }
  0xf1   : > { %v298_v34 = vpop.f32.mrb[6].mxu1  ;;  %309 = vst [vmem:[%s493_s7 + $0x30] sm:$0xff] %v274_v33  ;;  %v276_v35 = vpop.f32.mrb[7].mxu0 }
  0xf2   : > { %317 = vst [vmem:[%s493_s7 + $0x70] sm:$0xff] %v298_v34  ;;  %v300_v36 = vpop.f32.mrb[7].mxu1  ;;  %310 = vst [vmem:[%s493_s7 + $0x38] sm:$0xff] %v276_v35 }
  0xf3   : > { %318 = vst [vmem:[%s493_s7 + $0x78] sm:$0xff] %v300_v36 }
  0xf4 PF: > { %s12_s9 = sadd.s32 1, %s425_s9  }
  0xf5   : > { %p9_p4 = scmp.ge.s32.totalorder %s12_s9, 4  }
  0xf7   :  { %11 = sbr.rel (!%p9_p4) target bundleno = 1 (0x1), region = 58 }

// kernel: gat_forward.6
= control target key start
LH: loop header
LB: loop body
LE: loop exit
PB: predicated region body
PF: predicated region fallthrough
CT: control target
= control target key end

     0   :  { %s470_s9 = smov 0   ;;  %s615_s0 = inlined_call_operand.vmem [shape: f32[128,128], index: 0, kind: input, shape index: {}]   ;;  %s616_s1 = inlined_call_operand.vmem [shape: f32[128,256], index: 1, kind: input, shape index: {}]   ;;  %s617_s2 = inlined_call_operand.vmem [shape: f32[128,256], index: 2, kind: output, shape index: {}]  }
   0x1 LB: > { %s376_s10 = sadd.s32 4294967295, %s452_s9   ;;  %p380_p0 = scmp.ge.s32.totalorder %s452_s9, 1  ;;  %s452_s9 = sphi %s470_s9, %s12_s9  }
   0x2   : > { %p113_p1 = scmp.lt.s32.totalorder %s452_s9, 3 }
   0x4   : > { %p114_p2 = pnand %p380_p0, %p113_p1 }
   0x5   : > { %v158_v0 = vld [vmem:[%s616_s1 + $0x8] sm:$0xff] (!%p114_p2)  ;;  %v160_v1 = vld [vmem:[%s616_s1 + $0x18] sm:$0xff] (!%p114_p2)  ;;  %v157_v2 = vld [vmem:[%s616_s1] sm:$0xff] (!%p114_p2)  ;;  %v454_v7 = vmov (!%p114_p2), 0.0   ;;  %s381_s29 = sshll.u32 (!%p114_p2), %s376_s10, 3 }
   0x6   : > { %117 = sbr.rel (%p114_p2) target bundleno = 266 (0x10a), region = 28  ;;  %v389_v3 = vpack.c.bf16 (!%p114_p2), %v160_v1, %v158_v0  ;;  %v159_v4 = vld [vmem:[%s616_s1 + $0x10] sm:$0xff] (!%p114_p2)  ;;  %v162_v5 = vld [vmem:[%s616_s1 + $0x28] sm:$0xff] (!%p114_p2)  ;;  %v164_v6 = vld [vmem:[%s616_s1 + $0x38] sm:$0xff] (!%p114_p2)  ;;  %253 = vmatprep.mubr.f32.mxu0 (!%p114_p2), %v454_v7  ;;  %277 = vmatprep.mubr.f32.mxu1 (!%p114_p2), %v454_v7  ;;  %p137_p3 = scmp.lt.s32.totalorder (!%p114_p2), %s381_s29, 15 }
   0x7   : > { %v391_v8 = vpack.c.bf16 (!%p114_p2), %v159_v4, %v157_v2  ;;  %v393_v9 = vpack.c.bf16 (!%p114_p2), %v164_v6, %v162_v5  ;;  %v161_v10 = vld [vmem:[%s616_s1 + $0x20] sm:$0xff] (!%p114_p2)  ;;  %v163_v11 = vld [vmem:[%s616_s1 + $0x30] sm:$0xff] (!%p114_p2)  ;;  %v166_v12 = vld [vmem:[%s616_s1 + $0x48] sm:$0xff] (!%p114_p2) }
   0x8   : > { %390 = vmatprep.subr.bf16.mxu0 (!%p114_p2), %v389_v3  ;;  %421 = vmatprep.subr.bf16.mxu1 (!%p114_p2), %v389_v3  ;;  %v168_v13 = vld [vmem:[%s616_s1 + $0x58] sm:$0xff] (!%p114_p2)  ;;  %v395_v14 = vpack.c.bf16 (!%p114_p2), %v163_v11, %v161_v10  ;;  %v165_v16 = vld [vmem:[%s616_s1 + $0x40] sm:$0xff] (!%p114_p2)  ;;  %v167_v17 = vld [vmem:[%s616_s1 + $0x50] sm:$0xff] (!%p114_p2) }
   0x9   : > { %392 = vmatpush1.bf16.msra.mxu0 (!%p114_p2), %v391_v8  ;;  %429 = vmatpush1.bf16.msra.mxu1 (!%p114_p2), %v391_v8  ;;  %v397_v15 = vpack.c.bf16 (!%p114_p2), %v168_v13, %v166_v12  ;;  %v170_v18 = vld [vmem:[%s616_s1 + $0x68] sm:$0xff] (!%p114_p2)  ;;  %v172_v19 = vld [vmem:[%s616_s1 + $0x78] sm:$0xff] (!%p114_p2)  ;;  %v399_v20 = vpack.c.bf16 (!%p114_p2), %v167_v17, %v165_v16  ;;  %v169_v22 = vld [vmem:[%s616_s1 + $0x60] sm:$0xff] (!%p114_p2) }
   0xa   : > { %394 = vmatprep.subr.bf16.mxu0 (!%p114_p2), %v393_v9  ;;  %422 = vmatprep.subr.bf16.mxu1 (!%p114_p2), %v393_v9  ;;  %v401_v21 = vpack.c.bf16 (!%p114_p2), %v172_v19, %v170_v18  ;;  %v171_v23 = vld [vmem:[%s616_s1 + $0x70] sm:$0xff] (!%p114_p2)  ;;  %v174_v24 = vld [vmem:[%s616_s1 + $0x88] sm:$0xff] (!%p114_p2)  ;;  %v176_v25 = vld [vmem:[%s616_s1 + $0x98] sm:$0xff] (!%p114_p2) }
   0xb   : > { %v403_v26 = vpack.c.bf16 (!%p114_p2), %v171_v23, %v169_v22  ;;  %v405_v27 = vpack.c.bf16 (!%p114_p2), %v176_v25, %v174_v24  ;;  %v173_v28 = vld [vmem:[%s616_s1 + $0x80] sm:$0xff] (!%p114_p2)  ;;  %v175_v29 = vld [vmem:[%s616_s1 + $0x90] sm:$0xff] (!%p114_p2)  ;;  %v178_v30 = vld [vmem:[%s616_s1 + $0xa8] sm:$0xff] (!%p114_p2) }
   0xc   : > { %v180_v31 = vld [vmem:[%s616_s1 + $0xb8] sm:$0xff] (!%p114_p2)  ;;  %v407_v32 = vpack.c.bf16 (!%p114_p2), %v175_v29, %v173_v28  ;;  %v177_v34 = vld [vmem:[%s616_s1 + $0xa0] sm:$0xff] (!%p114_p2)  ;;  %v179_v35 = vld [vmem:[%s616_s1 + $0xb0] sm:$0xff] (!%p114_p2) }
   0xd   : > { %396 = vmatpush1.bf16.msra.mxu0 %v395_v14  ;;  %430 = vmatpush1.bf16.msra.mxu1 %v395_v14  ;;  %v409_v33 = vpack.c.bf16 %v180_v31, %v178_v30  ;;  %v182_v36 = vld [vmem:[%s616_s1 + $0xc8] sm:$0xff]  ;;  %v184_v37 = vld [vmem:[%s616_s1 + $0xd8] sm:$0xff]  ;;  %v411_v38 = vpack.c.bf16 %v179_v35, %v177_v34  ;;  %v181_v40 = vld [vmem:[%s616_s1 + $0xc0] sm:$0xff]  ;;  %s619_s29 = smov (!%p137_p3, %s381_s29), 15 }
   0xe   : > { %398 = vmatprep.subr.bf16.mxu0 %v397_v15  ;;  %423 = vmatprep.subr.bf16.mxu1 %v397_v15  ;;  %v413_v39 = vpack.c.bf16 %v184_v37, %v182_v36  ;;  %v183_v41 = vld [vmem:[%s616_s1 + $0xd0] sm:$0xff]  ;;  %v186_v42 = vld [vmem:[%s616_s1 + $0xe8] sm:$0xff]  ;;  %v188_v43 = vld [vmem:[%s616_s1 + $0xf8] sm:$0xff]  ;;  %s382_s23 = sshll.u32 %s619_s29, 3  ;;  %s388_s27 = sshll.u32 %s619_s29, 4 }
   0xf   : > { %v415_v44 = vpack.c.bf16 %v183_v41, %v181_v40  ;;  %v417_v45 = vpack.c.bf16 %v188_v43, %v186_v42  ;;  %v185_v46 = vld [vmem:[%s616_s1 + $0xe0] sm:$0xff]  ;;  %v187_v47 = vld [vmem:[%s616_s1 + $0xf0] sm:$0xff]  ;;  %s140_s26 = scalar_lea.vmem %s615_s0, %s382_s23  ;;  %s594_s3 = scalar_lea.vmem %s617_s2, %s388_s27 }
  0x10   : > { %v419_v48 = vpack.c.bf16 %v187_v47, %v185_v46  ;;  %v149_v49 = vld [vmem:[%s140_s26] sm:$0xff]  ;;  %v150_v51 = vld [vmem:[%s140_s26 + $0x8] sm:$0xff]  ;;  %v151_v53 = vld [vmem:[%s140_s26 + $0x10] sm:$0xff] }
  0x11   : > { %400 = vmatpush1.bf16.msra.mxu0 %v399_v20  ;;  %431 = vmatpush1.bf16.msra.mxu1 %v399_v20  ;;  %v153_v50 = vld [vmem:[%s140_s26 + $0x20] sm:$0xff]  ;;  %v154_v52 = vld [vmem:[%s140_s26 + $0x28] sm:$0xff]  ;;  %v155_v54 = vld [vmem:[%s140_s26 + $0x30] sm:$0xff] }
  0x12   : > { %402 = vmatprep.subr.bf16.mxu0 %v401_v21  ;;  %424 = vmatprep.subr.bf16.mxu1 %v401_v21  ;;  %v152_v55 = vld [vmem:[%s140_s26 + $0x18] sm:$0xff] }
  0x13   : > { %v156_v56 = vld [vmem:[%s140_s26 + $0x38] sm:$0xff] }
  0x15   : > { %404 = vmatpush1.bf16.msra.mxu0 %v403_v26  ;;  %432 = vmatpush1.bf16.msra.mxu1 %v403_v26 }
  0x16   : > { %406 = vmatprep.subr.bf16.mxu0 %v405_v27  ;;  %425 = vmatprep.subr.bf16.mxu1 %v405_v27 }
  0x19   : > { %408 = vmatpush1.bf16.msra.mxu0 %v407_v32  ;;  %433 = vmatpush1.bf16.msra.mxu1 %v407_v32 }
  0x1a   : > { %410 = vmatprep.subr.bf16.mxu0 %v409_v33  ;;  %426 = vmatprep.subr.bf16.mxu1 %v409_v33 }
  0x1d   : > { %412 = vmatpush1.bf16.msra.mxu0 %v411_v38  ;;  %434 = vmatpush1.bf16.msra.mxu1 %v411_v38 }
  0x1e   : > { %414 = vmatprep.subr.bf16.mxu0 %v413_v39  ;;  %427 = vmatprep.subr.bf16.mxu1 %v413_v39 }
  0x21   : > { %416 = vmatpush1.bf16.msra.mxu0 %v415_v44  ;;  %435 = vmatpush1.bf16.msra.mxu1 %v415_v44 }
  0x22   : > { %418 = vmatprep.subr.bf16.mxu0 %v417_v45  ;;  %428 = vmatprep.subr.bf16.mxu1 %v417_v45 }
  0x25   : > { %420 = vmatpush1.bf16.msra.mxu0 %v419_v48  ;;  %436 = vmatpush1.bf16.msra.mxu1 %v419_v48 }
  0x28   : > { %254 = vmatmul.mubr.f32.vlgmr.msra.gmra.mrb[0].mxu0 %v149_v49  ;;  %278 = vmatmul.mubr.f32.vlgmr.msra.gmra.mrb[0].mxu1 %v153_v50 }
  0x29   : > { %259 = vmatprep.mubr.f32.mxu0 %v454_v7  ;;  %283 = vmatprep.mubr.f32.mxu1 %v454_v7 }
  0x2c   : > { %260 = vmatmul.mubr.f32.gmra.mrb[2].mxu0 %v150_v51  ;;  %284 = vmatmul.mubr.f32.gmra.mrb[2].mxu1 %v154_v52 }
  0x2d   : > { %265 = vmatprep.mubr.f32.mxu0 %v454_v7  ;;  %289 = vmatprep.mubr.f32.mxu1 %v454_v7 }
  0x30   : > { %266 = vmatmul.mubr.f32.gmra.mrb[4].mxu0 %v151_v53  ;;  %290 = vmatmul.mubr.f32.gmra.mrb[4].mxu1 %v155_v54 }
  0x31   : > { %271 = vmatprep.mubr.f32.mxu0 %v454_v7  ;;  %295 = vmatprep.mubr.f32.mxu1 %v454_v7 }
  0x34   : > { %272 = vmatmul.mubr.f32.gmra.mrb[6].mxu0 %v152_v55  ;;  %296 = vmatmul.mubr.f32.gmra.mrb[6].mxu1 %v156_v56 }
  0xfb   : > { %v255_v57 = vpop.f32.mrb[0].mxu0  ;;  %v279_v58 = vpop.f32.mrb[0].mxu1 }
  0xfc   : > { %302 = vst [vmem:[%s594_s3] sm:$0xff] %v255_v57  ;;  %310 = vst [vmem:[%s594_s3 + $0x40] sm:$0xff] %v279_v58  ;;  %v257_v59 = vpop.f32.mrb[1].mxu0  ;;  %v281_v60 = vpop.f32.mrb[1].mxu1 }
  0xfd   : > { %303 = vst [vmem:[%s594_s3 + $0x8] sm:$0xff] %v257_v59  ;;  %311 = vst [vmem:[%s594_s3 + $0x48] sm:$0xff] %v281_v60 }
  0xff   : > { %v261_v61 = vpop.f32.mrb[2].mxu0  ;;  %v285_v62 = vpop.f32.mrb[2].mxu1 }
 0x100   : > { %304 = vst [vmem:[%s594_s3 + $0x10] sm:$0xff] %v261_v61  ;;  %312 = vst [vmem:[%s594_s3 + $0x50] sm:$0xff] %v285_v62  ;;  %v263_v63 = vpop.f32.mrb[3].mxu0  ;;  %v287_v0 = vpop.f32.mrb[3].mxu1 }
 0x101   : > { %305 = vst [vmem:[%s594_s3 + $0x18] sm:$0xff] %v263_v63  ;;  %313 = vst [vmem:[%s594_s3 + $0x58] sm:$0xff] %v287_v0 }
 0x103   : > { %v267_v1 = vpop.f32.mrb[4].mxu0  ;;  %v291_v2 = vpop.f32.mrb[4].mxu1 }
 0x104   : > { %306 = vst [vmem:[%s594_s3 + $0x20] sm:$0xff] %v267_v1  ;;  %314 = vst [vmem:[%s594_s3 + $0x60] sm:$0xff] %v291_v2  ;;  %v269_v3 = vpop.f32.mrb[5].mxu0  ;;  %v293_v4 = vpop.f32.mrb[5].mxu1 }
 0x105   : > { %307 = vst [vmem:[%s594_s3 + $0x28] sm:$0xff] %v269_v3  ;;  %315 = vst [vmem:[%s594_s3 + $0x68] sm:$0xff] %v293_v4 }
 0x107   : > { %v273_v5 = vpop.f32.mrb[6].mxu0  ;;  %v297_v6 = vpop.f32.mrb[6].mxu1 }
 0x108   : > { %308 = vst [vmem:[%s594_s3 + $0x30] sm:$0xff] %v273_v5  ;;  %316 = vst [vmem:[%s594_s3 + $0x70] sm:$0xff] %v297_v6  ;;  %v275_v7 = vpop.f32.mrb[7].mxu0  ;;  %v299_v8 = vpop.f32.mrb[7].mxu1 }
 0x109   : > { %309 = vst [vmem:[%s594_s3 + $0x38] sm:$0xff] %v275_v7  ;;  %317 = vst [vmem:[%s594_s3 + $0x78] sm:$0xff] %v299_v8 }
 0x10a PF: > { %s12_s9 = sadd.s32 1, %s452_s9  }
 0x10b   : > { %p9_p4 = scmp.ge.s32.totalorder %s12_s9, 4  }
 0x10d   :  { %11 = sbr.rel (!%p9_p4) target bundleno = 1 (0x1), region = 58 }

// kernel: gat_forward.7
= control target key start
LH: loop header
LB: loop body
LE: loop exit
PB: predicated region body
PF: predicated region fallthrough
CT: control target
= control target key end

     0   :  { %s1002_s18 = smov 0   ;;  %s1203_s0 = inlined_call_operand.vmem [shape: f32[128,128], index: 0, kind: input, shape index: {}]   ;;  %s1204_s1 = inlined_call_operand.vmem [shape: f32[1,128], index: 1, kind: input, shape index: {}]   ;;  %s1205_s2 = inlined_call_operand.vmem [shape: f32[128,1], index: 2, kind: input, shape index: {}]   ;;  %s1206_s3 = inlined_call_operand.vmem [shape: f32[1,128,128], index: 3, kind: input, shape index: {}]   ;;  %s1207_s4 = inlined_call_operand.vmem [shape: f32[1,128], index: 4, kind: input, shape index: {}]   ;;  %s1208_s5 = inlined_call_operand.vmem [shape: f32[128,128], index: 5, kind: output, shape index: {}]  }
   0x1 LB: > { %s757_s19 = sadd.s32 4294967295, %s969_s18   ;;  %p761_p0 = scmp.ge.s32.totalorder %s969_s18, 1  ;;  %s969_s18 = sphi %s1002_s18, %s15_s18  }
   0x2   : > { %p199_p1 = scmp.lt.s32.totalorder %s969_s18, 3 }
   0x4   : > { %p200_p2 = pnand %p761_p0, %p199_p1 }
   0x5   : > { %s762_s20 = sshll.u32 (!%p200_p2), %s757_s19, 3  ;;  %v971_v0 = vmov (!%p200_p2), 0   ;;  %v457_v9 = vld [vmem:[%s1206_s3] sm:$0xff] (!%p200_p2)  ;;  %v458_v10 = vld [vmem:[%s1206_s3 + $0x8] sm:$0xff] (!%p200_p2)  ;;  %v459_v11 = vld [vmem:[%s1206_s3 + $0x10] sm:$0xff] (!%p200_p2) }
   0x6   : > { %203 = sbr.rel (%p200_p2) target bundleno = 859 (0x35b), region = 40  ;;  %898 = vset.pattern.permute.xlu1 (!%p200_p2), %v971_v0  ;;  %897 = vset.pattern.permute.xlu0 (!%p200_p2), %v971_v0  ;;  %p233_p3 = scmp.lt.s32.totalorder (!%p200_p2), %s762_s20, 15  ;;  %v840_v12 = vpack.c.bf16 (!%p200_p2), %v458_v10, %v457_v9  ;;  %v460_v13 = vld [vmem:[%s1206_s3 + $0x18] sm:$0xff] (!%p200_p2)  ;;  %v461_v15 = vld [vmem:[%s1206_s3 + $0x20] sm:$0xff] (!%p200_p2)  ;;  %v462_v16 = vld [vmem:[%s1206_s3 + $0x28] sm:$0xff] (!%p200_p2) }
   0x7   : > { %v844_v14 = vpack.c.bf16 (!%p200_p2), %v460_v13, %v459_v11  ;;  %v848_v17 = vpack.c.bf16 (!%p200_p2), %v462_v16, %v461_v15  ;;  %v768_v18 = vld [vmem:[%s1204_s1] ss:$0 sm:$0xff] (!%p200_p2)  ;;  %v467_v9 = vld [vmem:[%s1206_s3 + $0x50] sm:$0xff] (!%p200_p2)  ;;  %v468_v10 = vld [vmem:[%s1206_s3 + $0x58] sm:$0xff] (!%p200_p2) }
   0x8   : > { %841 = vmatprep.subr.bf16.mxu0 (!%p200_p2), %v840_v12  ;;  %872 = vmatprep.subr.bf16.mxu1 (!%p200_p2), %v840_v12  ;;  %v860_v11 = vpack.c.bf16 (!%p200_p2), %v468_v10, %v467_v9  ;;  %v470_v13 = vld [vmem:[%s1206_s3 + $0x68] sm:$0xff] (!%p200_p2)  ;;  %v471_v15 = vld [vmem:[%s1206_s3 + $0x70] sm:$0xff] (!%p200_p2)  ;;  %v472_v16 = vld [vmem:[%s1206_s3 + $0x78] sm:$0xff] (!%p200_p2) }
   0x9   : > { %843 = vmatpush3.bf16.msra.mxu0 (!%p200_p2), %v840_v12  ;;  %880 = vmatpush3.bf16.msra.mxu1 (!%p200_p2), %v840_v12  ;;  %v469_v12 = vld [vmem:[%s1206_s3 + $0x60] sm:$0xff] (!%p200_p2) }
   0xa   : > { %845 = vmatprep.subr.bf16.mxu0 (!%p200_p2), %v844_v14  ;;  %873 = vmatprep.subr.bf16.mxu1 (!%p200_p2), %v844_v14 }
   0xd   : > { %s1210_s20 = smov (!%p233_p3, %s762_s20), 15  ;;  %847 = vmatpush3.bf16.msra.mxu0 %v844_v14  ;;  %881 = vmatpush3.bf16.msra.mxu1 %v844_v14  ;;  %v864_v14 = vpack.c.bf16 %v470_v13, %v469_v12 }
   0xe   : > { %s1010_s21 = sshll.u32 %s1210_s20, 3  ;;  %849 = vmatprep.subr.bf16.mxu0 %v848_v17  ;;  %874 = vmatprep.subr.bf16.mxu1 %v848_v17 }
   0xf   : > { %s242_s24 = scalar_lea.vmem %s1205_s2, %s1010_s21  ;;  %s1038_s14 = scalar_lea.vmem %s1203_s0, %s1010_s21 }
  0x10   : > { %v267_v1 = vld [vmem:[%s242_s24 + $0x8] sm:$0xff]  ;;  %v266_v2 = vld [vmem:[%s242_s24] sm:$0xff]  ;;  %v272_v5 = vld [vmem:[%s242_s24 + $0x30] sm:$0xff]  ;;  %s1182_s19 = scalar_lea.vmem %s1208_s5, %s1010_s21 }
  0x11   : > { %282 = vperm.xlu1 %898, %v267_v1   ;;  %277 = vperm.xlu0 %897, %v266_v2   ;;  %v271_v3 = vld [vmem:[%s242_s24 + $0x28] sm:$0xff]  ;;  %v270_v4 = vld [vmem:[%s242_s24 + $0x20] sm:$0xff]  ;;  %v268_v6 = vld [vmem:[%s242_s24 + $0x10] sm:$0xff] }
  0x12   : > { %v273_v7 = vld [vmem:[%s242_s24 + $0x38] sm:$0xff]  ;;  %851 = vmatpush3.bf16.msra.mxu0 %v848_v17  ;;  %882 = vmatpush3.bf16.msra.mxu1 %v848_v17  ;;  %v1044_v19 = vld [vmem:[%s1038_s14] sm:$0xff]  ;;  %v1048_v24 = vld [vmem:[%s1038_s14 + $0x8] sm:$0xff]  ;;  %v868_v17 = vpack.c.bf16 %v472_v16, %v471_v15 }
  0x13   : > { %v269_v8 = vld [vmem:[%s242_s24 + $0x18] sm:$0xff]  ;;  %vm258_vm0 = vcmp.gt.f32.partialorder %v1044_v19, 0.0  ;;  %v1051_v27 = vld [vmem:[%s1038_s14 + $0x20] sm:$0xff]  ;;  %vm259_vm4 = vcmp.gt.f32.partialorder %v1048_v24, 0.0  ;;  %v1058_v34 = vld [vmem:[%s1038_s14 + $0x28] sm:$0xff] }
  0x14   : > { %vm262_vm3 = vcmp.gt.f32.partialorder %v1051_v27, 0.0  ;;  %v1062_v38 = vld [vmem:[%s1038_s14 + $0x10] sm:$0xff]  ;;  %vm263_vm7 = vcmp.gt.f32.partialorder %v1058_v34, 0.0  ;;  %v1080_v50 = vld [vmem:[%s1038_s14 + $0x18] sm:$0xff] }
  0x15   : > { %302 = vperm.xlu1 %898, %v271_v3   ;;  %297 = vperm.xlu0 %897, %v270_v4   ;;  %vm260_vm8 = vcmp.gt.f32.partialorder %v1062_v38, 0.0  ;;  %v1075_v46 = vld [vmem:[%s1038_s14 + $0x30] sm:$0xff]  ;;  %vm261_vm11 = vcmp.gt.f32.partialorder %v1080_v50, 0.0  ;;  %v1093_v61 = vld [vmem:[%s1038_s14 + $0x38] sm:$0xff] }
  0x16   : > { %vm264_vm12 = vcmp.gt.f32.partialorder %v1075_v46, 0.0  ;;  %vm265_vm15 = vcmp.gt.f32.partialorder %v1093_v61, 0.0  ;;  %v463_v2 = vld [vmem:[%s1206_s3 + $0x30] sm:$0xff]  ;;  %v464_v3 = vld [vmem:[%s1206_s3 + $0x38] sm:$0xff] }
  0x17   : > { %v852_v4 = vpack.c.bf16 %v464_v3, %v463_v2 }
  0x19   : > { %307 = vperm.xlu1 %898, %v272_v5   ;;  %287 = vperm.xlu0 %897, %v268_v6   ;;  %v465_v6 = vld [vmem:[%s1206_s3 + $0x40] sm:$0xff] }
  0x1a   : > { %853 = vmatprep.subr.bf16.mxu0 %v852_v4  ;;  %875 = vmatprep.subr.bf16.mxu1 %v852_v4 }
  0x1b   : > { %855 = vmatpush3.bf16.msra.mxu0 %v852_v4  ;;  %883 = vmatpush3.bf16.msra.mxu1 %v852_v4 }
  0x1d   : > { %312 = vperm.xlu1 %898, %v273_v7   ;;  %292 = vperm.xlu0 %897, %v269_v8   ;;  %v466_v7 = vld [vmem:[%s1206_s3 + $0x48] sm:$0xff] }
  0x1e   : > { %v856_v8 = vpack.c.bf16 %v466_v7, %v465_v6 }
  0x20   : > { %857 = vmatprep.subr.bf16.mxu0 %v856_v8  ;;  %876 = vmatprep.subr.bf16.mxu1 %v856_v8 }
  0x21   : > { %859 = vmatpush3.bf16.msra.mxu0 %v856_v8  ;;  %884 = vmatpush3.bf16.msra.mxu1 %v856_v8 }
  0x22   : > { %861 = vmatprep.subr.bf16.mxu0 %v860_v11  ;;  %877 = vmatprep.subr.bf16.mxu1 %v860_v11 }
  0x25   : > { %863 = vmatpush3.bf16.msra.mxu0 %v860_v11  ;;  %885 = vmatpush3.bf16.msra.mxu1 %v860_v11 }
  0x26   : > { %865 = vmatprep.subr.bf16.mxu0 %v864_v14  ;;  %878 = vmatprep.subr.bf16.mxu1 %v864_v14 }
  0x29   : > { %867 = vmatpush3.bf16.msra.mxu0 %v864_v14  ;;  %886 = vmatpush3.bf16.msra.mxu1 %v864_v14 }
  0x2a   : > { %869 = vmatprep.subr.bf16.mxu0 %v868_v17  ;;  %879 = vmatprep.subr.bf16.mxu1 %v868_v17 }
  0x2d   : > { %871 = vmatpush3.bf16.msra.mxu0 %v868_v17  ;;  %887 = vmatpush3.bf16.msra.mxu1 %v868_v17 }
  0x90   : > { %v283_v20 = vpop.permute.xlu1 %282  ;;  %v278_v21 = vpop.permute.xlu0 %277 }
  0x91   : > { %v322_v22 = vadd.f32 %v768_v18, %v283_v20  ;;  %v321_v23 = vadd.f32 %v768_v18, %v278_v21 }
  0x93   : > { %v338_v25 = vmul.f32 0.2, %v322_v22  ;;  %v337_v26 = vmul.f32 0.2, %v321_v23  ;;  %vm329_vm1 = vcmp.gt.f32.partialorder %v321_v23, 0.0  ;;  %vm330_vm2 = vcmp.gt.f32.partialorder %v322_v22, 0.0 }
  0x94   : > { %v303_v28 = vpop.permute.xlu1 %302  ;;  %v298_v29 = vpop.permute.xlu0 %297 }
  0x95   : > { %v326_v30 = vadd.f32 %v768_v18, %v303_v28  ;;  %v325_v31 = vadd.f32 %v768_v18, %v298_v29  ;;  %v345_v32 = vsel %vm329_vm1, %v321_v23, %v337_v26  ;;  %v346_v37 = vsel %vm330_vm2, %v322_v22, %v338_v25 }
  0x96   : > { %v1053_v33 = vsel %vm258_vm0, %v345_v32, -1e+30  ;;  %v1071_v45 = vsel %vm259_vm4, %v346_v37, -1e+30 }
  0x97   : > { %v342_v35 = vmul.f32 0.2, %v326_v30  ;;  %v341_v36 = vmul.f32 0.2, %v325_v31  ;;  %361 = vmax.xlane.f32.xlu0 %v1053_v33  ;;  %vm333_vm5 = vcmp.gt.f32.partialorder %v325_v31, 0.0  ;;  %vm334_vm6 = vcmp.gt.f32.partialorder %v326_v30, 0.0 }
  0x98   : > { %v308_v39 = vpop.permute.xlu1 %307  ;;  %v288_v40 = vpop.permute.xlu0 %287 }
  0x99   : > { %v327_v41 = vadd.f32 %v768_v18, %v308_v39  ;;  %v323_v42 = vadd.f32 %v768_v18, %v288_v40  ;;  %v349_v43 = vsel %vm333_vm5, %v325_v31, %v341_v36  ;;  %v350_v49 = vsel %vm334_vm6, %v326_v30, %v342_v35 }
  0x9a   : > { %v1067_v44 = vsel %vm262_vm3, %v349_v43, -1e+30  ;;  %v1086_v57 = vsel %vm263_vm7, %v350_v49, -1e+30 }
  0x9b   : > { %v343_v47 = vmul.f32 0.2, %v327_v41  ;;  %v339_v48 = vmul.f32 0.2, %v323_v42  ;;  %369 = vmax.xlane.f32.xlu1 %v1067_v44  ;;  %363 = vmax.xlane.f32.xlu0 %v1071_v45  ;;  %vm331_vm9 = vcmp.gt.f32.partialorder %v323_v42, 0.0  ;;  %vm335_vm10 = vcmp.gt.f32.partialorder %v327_v41, 0.0 }
  0x9c   : > { %v313_v51 = vpop.permute.xlu1 %312  ;;  %v293_v52 = vpop.permute.xlu0 %292 }
  0x9d   : > { %v328_v53 = vadd.f32 %v768_v18, %v313_v51  ;;  %v324_v54 = vadd.f32 %v768_v18, %v293_v52  ;;  %v347_v55 = vsel %vm331_vm9, %v323_v42, %v339_v48  ;;  %v351_v60 = vsel %vm335_vm10, %v327_v41, %v343_v47 }
  0x9e   : > { %v1082_v56 = vsel %vm260_vm8, %v347_v55, -1e+30  ;;  %v1097_v0 = vsel %vm264_vm12, %v351_v60, -1e+30 }
  0x9f   : > { %v344_v58 = vmul.f32 0.2, %v328_v53  ;;  %v340_v59 = vmul.f32 0.2, %v324_v54  ;;  %365 = vmax.xlane.f32.xlu1 %v1082_v56  ;;  %371 = vmax.xlane.f32.xlu0 %v1086_v57  ;;  %vm332_vm13 = vcmp.gt.f32.partialorder %v324_v54, 0.0  ;;  %vm336_vm14 = vcmp.gt.f32.partialorder %v328_v53, 0.0 }
  0xa1   : > { %v348_v62 = vsel %vm332_vm13, %v324_v54, %v340_v59  ;;  %v352_v1 = vsel %vm336_vm14, %v328_v53, %v344_v58 }
  0xa2   : > { %v1095_v63 = vsel %vm261_vm11, %v348_v62, -1e+30  ;;  %v1108_v5 = vsel %vm265_vm15, %v352_v1, -1e+30 }
  0xa3   : > { %367 = vmax.xlane.f32.xlu1 %v1095_v63  ;;  %373 = vmax.xlane.f32.xlu0 %v1097_v0 }
  0xa7   : > { %375 = vmax.xlane.f32.xlu0 %v1108_v5 }
 0x124   : > { %v362_v18 = vpop.xlane.xlu0 %361 }
 0x125   : > { %v377_v20 = vsub.f32 %v1053_v33, %v362_v18 }
 0x127   : > { %v385_v21 = vmul.f32 1.442695, %v377_v20 }
 0x128   : > { %v370_v22 = vpop.xlane.xlu1 %369  ;;  %v364_v23 = vpop.xlane.xlu0 %363 }
 0x129   : > { %899 = vpow2.f32 %v385_v21  ;;  %v381_v25 = vsub.f32 %v1067_v44, %v370_v22  ;;  %v378_v26 = vsub.f32 %v1071_v45, %v364_v23 }
 0x12b   : > { %v393_v28 = vmul.f32 1.442695, %v381_v25  ;;  %v387_v29 = vmul.f32 1.442695, %v378_v26  ;;  %v769_v25 = vld [vmem:[%s1207_s4] ss:$0 sm:$0xff] }
 0x12c   : > { %v366_v30 = vpop.xlane.xlu1 %365  ;;  %v372_v31 = vpop.xlane.xlu0 %371 }
 0x12d   : > { %901 = vpow2.f32 %v393_v28  ;;  %v379_v32 = vsub.f32 %v1082_v56, %v366_v30  ;;  %v382_v35 = vsub.f32 %v1086_v57, %v372_v31 }
 0x12e   : > { %903 = vpow2.f32 %v387_v29 }
 0x12f   : > { %v389_v36 = vmul.f32 1.442695, %v379_v32  ;;  %v395_v33 = vmul.f32 1.442695, %v382_v35 }
 0x130   : > { %v368_v37 = vpop.xlane.xlu1 %367  ;;  %v374_v39 = vpop.xlane.xlu0 %373 }
 0x131   : > { %905 = vpow2.f32 %v389_v36  ;;  %v380_v40 = vsub.f32 %v1095_v63, %v368_v37  ;;  %v383_v41 = vsub.f32 %v1097_v0, %v374_v39 }
 0x132   : > { %907 = vpow2.f32 %v395_v33 }
 0x133   : > { %v900_v42 = vpop.eup %899  ;;  %v391_v43 = vmul.f32 1.442695, %v380_v40  ;;  %v397_v44 = vmul.f32 1.442695, %v383_v41 }
 0x134   : > { %401 = vadd.xlane.f32.xlu1 %v900_v42  ;;  %v376_v45 = vpop.xlane.xlu0 %375  ;;  %v449_v47 = vmul.f32 %v900_v42, %v1044_v19 }
 0x135   : > { %909 = vpow2.f32 %v391_v43  ;;  %v384_v48 = vsub.f32 %v1108_v5, %v376_v45 }
 0x136   : > { %911 = vpow2.f32 %v397_v44  ;;  %828 = vmatprep.mubr.f32.mxu0 %v449_v47 }
 0x137   : > { %v902_v49 = vpop.eup %901  ;;  %v399_v51 = vmul.f32 1.442695, %v384_v48 }
 0x138   : > { %v904_v52 = vpop.eup %903  ;;  %v453_v53 = vmul.f32 %v902_v49, %v1051_v27 }
 0x139   : > { %913 = vpow2.f32 %v399_v51  ;;  %403 = vadd.xlane.f32.xlu0 %v904_v52  ;;  %v450_v54 = vmul.f32 %v904_v52, %v1048_v24 }
 0x13a   : > { %834 = vmatprep.mubr.f32.mxu1 %v453_v53 }
 0x13b   : > { %v906_v55 = vpop.eup %905  ;;  %829 = vmatmul.mubr.f32.vlgmr.msra.gmra.mrb[0].mxu0 %v450_v54 }
 0x13c   : > { %v908_v56 = vpop.eup %907  ;;  %405 = vadd.xlane.f32.xlu1 %v906_v55  ;;  %v451_v19 = vmul.f32 %v906_v55, %v1062_v38 }
 0x13d   : > { %v454_v57 = vmul.f32 %v908_v56, %v1058_v34 }
 0x13e   : > { %831 = vmatprep.mubr.f32.mxu0 %v451_v19 }
 0x13f   : > { %v910_v58 = vpop.eup %909  ;;  %835 = vmatmul.mubr.f32.vlgmr.msra.gmra.mrb[0].mxu1 %v454_v57 }
 0x140   : > { %v912_v59 = vpop.eup %911  ;;  %409 = vadd.xlane.f32.xlu1 %v902_v49  ;;  %407 = vadd.xlane.f32.xlu0 %v910_v58  ;;  %v452_v27 = vmul.f32 %v910_v58, %v1080_v50 }
 0x141   : > { %v455_v60 = vmul.f32 %v912_v59, %v1075_v46 }
 0x142   : > { %832 = vmatmul.mubr.f32.gmra.mrb[2].mxu0 %v452_v27 }
 0x143   : > { %v914_v24 = vpop.eup %913  ;;  %837 = vmatprep.mubr.f32.mxu1 %v455_v60 }
 0x144   : > { %411 = vadd.xlane.f32.xlu0 %v908_v56  ;;  %413 = vadd.xlane.f32.xlu1 %v912_v59  ;;  %v456_v62 = vmul.f32 %v914_v24, %v1093_v61 }
 0x146   : > { %838 = vmatmul.mubr.f32.gmra.mrb[2].mxu1 %v456_v62 }
 0x148   : > { %415 = vadd.xlane.f32.xlu0 %v914_v24 }
 0x1c1   : > { %v402_v38 = vpop.xlane.xlu1 %401 }
 0x1c6   : > { %v404_v34 = vpop.xlane.xlu0 %403 }
 0x1c7   : > { %915 = vrcp.f32 %v404_v34 }
 0x1c8   : > { %917 = vrcp.f32 %v402_v38 }
 0x1c9   : > { %v406_v0 = vpop.xlane.xlu1 %405 }
 0x1cd   : > { %v408_v63 = vpop.xlane.xlu0 %407  ;;  %v410_v2 = vpop.xlane.xlu1 %409 }
 0x1d1   : > { %v412_v1 = vpop.xlane.xlu0 %411  ;;  %v414_v50 = vpop.xlane.xlu1 %413 }
 0x1d2   : > { %919 = vrcp.f32 %v412_v1  ;;  %v916_v3 = vpop.eup %915 }
 0x1d3   : > { %921 = vrcp.f32 %v410_v2  ;;  %v918_v4 = vpop.eup %917  ;;  %v426_v61 = vmul.f32 %v916_v3, %v404_v34 }
 0x1d4   : > { %923 = vrcp.f32 %v408_v63  ;;  %v425_v6 = vmul.f32 %v918_v4, %v402_v38 }
 0x1d5   : > { %925 = vrcp.f32 %v406_v0  ;;  %v416_v46 = vpop.xlane.xlu0 %415  ;;  %v434_v9 = vsub.f32 2.0, %v426_v61 }
 0x1d6   : > { %927 = vrcp.f32 %v416_v46  ;;  %v433_v12 = vsub.f32 2.0, %v425_v6 }
 0x1d7   : > { %929 = vrcp.f32 %v414_v50  ;;  %v442_v18 = vmul.f32 %v916_v3, %v434_v9 }
 0x1d8   : > { %v441_v23 = vmul.f32 %v918_v4, %v433_v12 }
 0x1dc   : > { %v920_v5 = vpop.eup %919 }
 0x1dd   : > { %v922_v7 = vpop.eup %921  ;;  %v430_v10 = vmul.f32 %v920_v5, %v412_v1 }
 0x1de   : > { %v924_v8 = vpop.eup %923  ;;  %v429_v13 = vmul.f32 %v922_v7, %v410_v2 }
 0x1df   : > { %v926_v11 = vpop.eup %925  ;;  %v428_v14 = vmul.f32 %v924_v8, %v408_v63  ;;  %v438_v17 = vsub.f32 2.0, %v430_v10 }
 0x1e0   : > { %v928_v15 = vpop.eup %927  ;;  %v427_v16 = vmul.f32 %v926_v11, %v406_v0  ;;  %v437_v21 = vsub.f32 2.0, %v429_v13 }
 0x1e1   : > { %v930_v20 = vpop.eup %929  ;;  %v436_v29 = vsub.f32 2.0, %v428_v14  ;;  %v432_v30 = vmul.f32 %v928_v15, %v416_v46  ;;  %v446_v36 = vmul.f32 %v920_v5, %v438_v17 }
 0x1e2   : > { %v435_v32 = vsub.f32 2.0, %v427_v16  ;;  %v431_v35 = vmul.f32 %v930_v20, %v414_v50  ;;  %v445_v39 = vmul.f32 %v922_v7, %v437_v21 }
 0x1e3   : > { %v440_v43 = vsub.f32 2.0, %v432_v30  ;;  %v444_v45 = vmul.f32 %v924_v8, %v436_v29 }
 0x1e4   : > { %v439_v47 = vsub.f32 2.0, %v431_v35  ;;  %v443_v49 = vmul.f32 %v926_v11, %v435_v32 }
 0x1e5   : > { %v448_v56 = vmul.f32 %v928_v15, %v440_v43 }
 0x1e6   : > { %v447_v58 = vmul.f32 %v930_v20, %v439_v47 }
 0x20e   : > { %v830_v22 = vpop.f32.mrb[0].mxu0 }
 0x20f   : > { %v579_v26 = vmul.f32 %v830_v22, %v442_v18  ;;  %v539_v28 = vpop.f32.mrb[1].mxu0 }
 0x210   : > { %v578_v31 = vmul.f32 %v539_v28, %v441_v23 }
 0x211   : > { %v594_v33 = vadd.f32 %v769_v25, %v579_v26 }
 0x212   : > { %v836_v37 = vpop.f32.mrb[0].mxu1  ;;  %v593_v40 = vadd.f32 %v769_v25, %v578_v31 }
 0x213   : > { %v583_v41 = vmul.f32 %v836_v37, %v446_v36  ;;  %v559_v42 = vpop.f32.mrb[1].mxu1  ;;  %603 = vmax.xlane.f32.xlu0 %v594_v33 }
 0x214   : > { %v582_v44 = vmul.f32 %v559_v42, %v445_v39  ;;  %601 = vmax.xlane.f32.xlu1 %v593_v40 }
 0x215   : > { %v833_v48 = vpop.f32.mrb[2].mxu0  ;;  %v598_v51 = vadd.f32 %v769_v25, %v583_v41 }
 0x216   : > { %v581_v52 = vmul.f32 %v833_v48, %v444_v45  ;;  %v549_v53 = vpop.f32.mrb[3].mxu0  ;;  %v597_v54 = vadd.f32 %v769_v25, %v582_v44 }
 0x217   : > { %v580_v55 = vmul.f32 %v549_v53, %v443_v49  ;;  %611 = vmax.xlane.f32.xlu0 %v598_v51 }
 0x218   : > { %609 = vmax.xlane.f32.xlu1 %v597_v54  ;;  %v596_v19 = vadd.f32 %v769_v25, %v581_v52 }
 0x219   : > { %v839_v57 = vpop.f32.mrb[2].mxu1  ;;  %v595_v59 = vadd.f32 %v769_v25, %v580_v55 }
 0x21a   : > { %v585_v27 = vmul.f32 %v839_v57, %v448_v56  ;;  %v569_v60 = vpop.f32.mrb[3].mxu1 }
 0x21b   : > { %v584_v24 = vmul.f32 %v569_v60, %v447_v58  ;;  %607 = vmax.xlane.f32.xlu0 %v596_v19 }
 0x21c   : > { %605 = vmax.xlane.f32.xlu1 %v595_v59  ;;  %v600_v62 = vadd.f32 %v769_v25, %v585_v27 }
 0x21d   : > { %v599_v34 = vadd.f32 %v769_v25, %v584_v24 }
 0x21f   : > { %615 = vmax.xlane.f32.xlu0 %v600_v62 }
 0x220   : > { %613 = vmax.xlane.f32.xlu1 %v599_v34 }
 0x2a0   : > { %v604_v38 = vpop.xlane.xlu0 %603 }
 0x2a1   : > { %v1154_v63 = vsub.f32 %v594_v33, %v604_v38  ;;  %v602_v0 = vpop.xlane.xlu1 %601 }
 0x2a2   : > { %v1156_v1 = vsub.f32 %v593_v40, %v602_v0 }
 0x2a3   : > { %v627_v2 = vmul.f32 1.442695, %v1154_v63 }
 0x2a4   : > { %v625_v46 = vmul.f32 1.442695, %v1156_v1  ;;  %v612_v50 = vpop.xlane.xlu0 %611 }
 0x2a5   : > { %931 = vpow2.f32 %v627_v2  ;;  %v1160_v3 = vsub.f32 %v598_v51, %v612_v50  ;;  %v610_v4 = vpop.xlane.xlu1 %609 }
 0x2a6   : > { %933 = vpow2.f32 %v625_v46  ;;  %v1162_v61 = vsub.f32 %v597_v54, %v610_v4 }
 0x2a7   : > { %v635_v5 = vmul.f32 1.442695, %v1160_v3 }
 0x2a8   : > { %v633_v6 = vmul.f32 1.442695, %v1162_v61  ;;  %v608_v7 = vpop.xlane.xlu0 %607 }
 0x2a9   : > { %935 = vpow2.f32 %v635_v5  ;;  %v1166_v8 = vsub.f32 %v596_v19, %v608_v7  ;;  %v606_v9 = vpop.xlane.xlu1 %605 }
 0x2aa   : > { %937 = vpow2.f32 %v633_v6  ;;  %v1168_v10 = vsub.f32 %v595_v59, %v606_v9 }
 0x2ab   : > { %v631_v11 = vmul.f32 1.442695, %v1166_v8 }
 0x2ac   : > { %v629_v12 = vmul.f32 1.442695, %v1168_v10  ;;  %v616_v13 = vpop.xlane.xlu0 %615 }
 0x2ad   : > { %939 = vpow2.f32 %v631_v11  ;;  %v1172_v14 = vsub.f32 %v600_v62, %v616_v13  ;;  %v614_v15 = vpop.xlane.xlu1 %613 }
 0x2ae   : > { %941 = vpow2.f32 %v629_v12  ;;  %v1174_v16 = vsub.f32 %v599_v34, %v614_v15 }
 0x2af   : > { %v932_v17 = vpop.eup %931  ;;  %v639_v18 = vmul.f32 1.442695, %v1172_v14 }
 0x2b0   : > { %v934_v20 = vpop.eup %933  ;;  %v637_v21 = vmul.f32 1.442695, %v1174_v16  ;;  %643 = vadd.xlane.f32.xlu0 %v932_v17 }
 0x2b1   : > { %943 = vpow2.f32 %v639_v18  ;;  %641 = vadd.xlane.f32.xlu1 %v934_v20 }
 0x2b2   : > { %945 = vpow2.f32 %v637_v21 }
 0x2b3   : > { %v936_v22 = vpop.eup %935 }
 0x2b4   : > { %v938_v23 = vpop.eup %937  ;;  %651 = vadd.xlane.f32.xlu0 %v936_v22 }
 0x2b5   : > { %649 = vadd.xlane.f32.xlu1 %v938_v23 }
 0x2b7   : > { %v940_v25 = vpop.eup %939 }
 0x2b8   : > { %v942_v26 = vpop.eup %941  ;;  %647 = vadd.xlane.f32.xlu0 %v940_v25 }
 0x2b9   : > { %645 = vadd.xlane.f32.xlu1 %v942_v26 }
 0x2bb   : > { %v944_v28 = vpop.eup %943 }
 0x2bc   : > { %v946_v29 = vpop.eup %945  ;;  %655 = vadd.xlane.f32.xlu0 %v944_v28 }
 0x2bd   : > { %653 = vadd.xlane.f32.xlu1 %v946_v29 }
 0x33d   : > { %v644_v30 = vpop.xlane.xlu0 %643 }
 0x33e   : > { %947 = vlog2.f32 %v644_v30  ;;  %v642_v31 = vpop.xlane.xlu1 %641 }
 0x33f   : > { %949 = vlog2.f32 %v642_v31 }
 0x341   : > { %v652_v32 = vpop.xlane.xlu0 %651 }
 0x342   : > { %951 = vlog2.f32 %v652_v32  ;;  %v650_v35 = vpop.xlane.xlu1 %649 }
 0x343   : > { %953 = vlog2.f32 %v650_v35 }
 0x345   : > { %v648_v36 = vpop.xlane.xlu0 %647 }
 0x346   : > { %955 = vlog2.f32 %v648_v36  ;;  %v646_v33 = vpop.xlane.xlu1 %645 }
 0x347   : > { %957 = vlog2.f32 %v646_v33 }
 0x348   : > { %v948_v37 = vpop.eup %947 }
 0x349   : > { %v950_v39 = vpop.eup %949  ;;  %v660_v40 = vmul.f32 0.6931472, %v948_v37  ;;  %v656_v41 = vpop.xlane.xlu0 %655 }
 0x34a   : > { %v658_v42 = vmul.f32 0.6931472, %v950_v39  ;;  %959 = vlog2.f32 %v656_v41  ;;  %v654_v43 = vpop.xlane.xlu1 %653 }
 0x34b   : > { %v674_v44 = vsub.f32 %v1154_v63, %v660_v40  ;;  %961 = vlog2.f32 %v654_v43 }
 0x34c   : > { %v952_v45 = vpop.eup %951  ;;  %v673_v47 = vsub.f32 %v1156_v1, %v658_v42 }
 0x34d   : > { %v954_v48 = vpop.eup %953  ;;  %682 = vst [vmem:[%s1182_s19 + $0x8] sm:$0xff] %v674_v44  ;;  %v668_v49 = vmul.f32 0.6931472, %v952_v45 }
 0x34e   : > { %681 = vst [vmem:[%s1182_s19] sm:$0xff] %v673_v47  ;;  %v666_v51 = vmul.f32 0.6931472, %v954_v48 }
 0x34f   : > { %v678_v52 = vsub.f32 %v1160_v3, %v668_v49 }
 0x350   : > { %v956_v53 = vpop.eup %955  ;;  %v677_v54 = vsub.f32 %v1162_v61, %v666_v51 }
 0x351   : > { %v958_v55 = vpop.eup %957  ;;  %686 = vst [vmem:[%s1182_s19 + $0x28] sm:$0xff] %v678_v52  ;;  %v664_v56 = vmul.f32 0.6931472, %v956_v53 }
 0x352   : > { %685 = vst [vmem:[%s1182_s19 + $0x20] sm:$0xff] %v677_v54  ;;  %v662_v19 = vmul.f32 0.6931472, %v958_v55 }
 0x353   : > { %v676_v57 = vsub.f32 %v1166_v8, %v664_v56 }
 0x354   : > { %v960_v58 = vpop.eup %959  ;;  %v675_v59 = vsub.f32 %v1168_v10, %v662_v19 }
 0x355   : > { %v962_v27 = vpop.eup %961  ;;  %684 = vst [vmem:[%s1182_s19 + $0x18] sm:$0xff] %v676_v57  ;;  %v672_v60 = vmul.f32 0.6931472, %v960_v58 }
 0x356   : > { %683 = vst [vmem:[%s1182_s19 + $0x10] sm:$0xff] %v675_v59  ;;  %v670_v24 = vmul.f32 0.6931472, %v962_v27 }
 0x357   : > { %v680_v62 = vsub.f32 %v1172_v14, %v672_v60 }
 0x358   : > { %v679_v34 = vsub.f32 %v1174_v16, %v670_v24 }
 0x359   : > { %688 = vst [vmem:[%s1182_s19 + $0x38] sm:$0xff] %v680_v62 }
 0x35a   : > { %687 = vst [vmem:[%s1182_s19 + $0x30] sm:$0xff] %v679_v34 }
 0x35b PF: > { %s15_s18 = sadd.s32 1, %s969_s18  }
 0x35c   : > { %p12_p4 = scmp.ge.s32.totalorder %s15_s18, 4  }
 0x35e   :  { %14 = sbr.rel (!%p12_p4) target bundleno = 1 (0x1), region = 73 }

// kernel: gat_forward.5
= control target key start
LH: loop header
LB: loop body
LE: loop exit
PB: predicated region body
PF: predicated region fallthrough
CT: control target
= control target key end

     0   :  { %s4465_s18 = smov 0   ;;  %s6249_s0 = inlined_call_operand.vmem [shape: f32[128,128], index: 0, kind: input, shape index: {}]   ;;  %s6250_s1 = inlined_call_operand.vmem [shape: f32[8,128], index: 1, kind: input, shape index: {}]   ;;  %s6251_s2 = inlined_call_operand.vmem [shape: f32[128,8], index: 2, kind: input, shape index: {}]   ;;  %s6252_s3 = inlined_call_operand.vmem [shape: f32[8,128,16], index: 3, kind: input, shape index: {}]   ;;  %s6253_s4 = inlined_call_operand.vmem [shape: f32[1,128], index: 4, kind: input, shape index: {}]   ;;  %s6254_s5 = inlined_call_operand.vmem [shape: f32[128,128], index: 5, kind: output, shape index: {}]  }
   0x1 LB: > { %s3123_s19 = sadd.s32 4294967295, %s4418_s18   ;;  %p3127_p0 = scmp.ge.s32.totalorder %s4418_s18, 1  ;;  %s4418_s18 = sphi %s4465_s18, %s15_s18  }
   0x2   : > { %p199_p1 = scmp.lt.s32.totalorder %s4418_s18, 3 }
   0x4   : > { %p200_p2 = pnand %p3127_p0, %p199_p1 }
   0x6   : > { %203 = sbr.rel (%p200_p2) target bundleno = 1669 (0x685), region = 40 }
   0xd   : > { %s3128_s20 = sshll.u32 %s3123_s19, 3  ;;  %v4420_v0 = vmov 0   ;;  %v4421_v9 = vmov 1   ;;  %v4422_v10 = vmov 2   ;;  %v455_v11 = vld [vmem:[%s6252_s3] sm:$0xff]  ;;  %v456_v12 = vld [vmem:[%s6252_s3 + $0x8] sm:$0xff] }
   0xe   : > { %4089 = vset.pattern.permute.xlu1 %v4420_v0  ;;  %4088 = vset.pattern.permute.xlu0 %v4420_v0  ;;  %p233_p3 = scmp.lt.s32.totalorder %s3128_s20, 15  ;;  %v457_v13 = vld [vmem:[%s6252_s3 + $0x10] sm:$0xff]  ;;  %v3809_v14 = vpack.c.bf16 %v456_v12, %v455_v11  ;;  %v458_v15 = vld [vmem:[%s6252_s3 + $0x18] sm:$0xff]  ;;  %v459_v17 = vld [vmem:[%s6252_s3 + $0x20] sm:$0xff]  ;;  %s4429_s15 = smov 32  }
   0xf   : > { %v3813_v16 = vpack.c.bf16 %v458_v15, %v457_v13  ;;  %v460_v18 = vld [vmem:[%s6252_s3 + $0x28] sm:$0xff]  ;;  %v3134_v20 = vld [vmem:[%s6250_s1] ss:$0 sm:$0xff]  ;;  %v4592_v58 = vld [vmem:[%s6250_s1 + $0x1] ss:$0 sm:$0xff]  ;;  %s4430_s16 = smov 48  }
  0x10   : > { %s6396_s20 = smov (!%p233_p3, %s3128_s20), 15  ;;  %3810 = vmatprep.subr.bf16.mxu0 %v3809_v14  ;;  %v3817_v19 = vpack.c.bf16 %v460_v18, %v459_v17  ;;  %v461_v17 = vld [vmem:[%s6252_s3 + $0x30] sm:$0xff]  ;;  %v462_v18 = vld [vmem:[%s6252_s3 + $0x38] sm:$0xff]  ;;  %s4431_s17 = smov 64  }
  0x11   : > { %s4473_s21 = sshll.u32 %s6396_s20, 3  ;;  %3812 = vmatpush3.bf16.msra.mxu0 %v3809_v14  ;;  %s4432_s19 = smov 80  }
  0x12   : > { %s4479_s24 = scalar_lea.vmem %s6251_s2, %s4473_s21  ;;  %3814 = vmatprep.subr.bf16.mxu0 %v3813_v16  ;;  %s4543_s14 = scalar_lea.vmem %s6249_s0, %s4473_s21 }
  0x13   : > { %v4482_v1 = vld [vmem:[%s4479_s24 + $0x10] sm:$0xff]  ;;  %v4485_v2 = vld [vmem:[%s4479_s24] sm:$0xff]  ;;  %v4490_v3 = vld [vmem:[%s4479_s24 + $0x18] sm:$0xff]  ;;  %s4433_s20 = smov 96   ;;  %s4434_s22 = smov 112  }
  0x14   : > { %287 = vperm.xlu1 %4089, %v4482_v1   ;;  %277 = vperm.xlu0 %4088, %v4485_v2   ;;  %v4493_v4 = vld [vmem:[%s4479_s24 + $0x8] sm:$0xff]  ;;  %v4501_v6 = vld [vmem:[%s4479_s24 + $0x20] sm:$0xff]  ;;  %v4506_v7 = vld [vmem:[%s4479_s24 + $0x38] sm:$0xff]  ;;  %s6232_s28 = scalar_lea.vmem %s6254_s5, %s4473_s21 }
  0x15   : > { %v4498_v5 = vld [vmem:[%s4479_s24 + $0x28] sm:$0xff]  ;;  %v4509_v8 = vld [vmem:[%s4479_s24 + $0x30] sm:$0xff]  ;;  %3816 = vmatpush3.bf16.msra.mxu0 %v3813_v16  ;;  %v4549_v21 = vld [vmem:[%s4543_s14] sm:$0xff] }
  0x16   : > { %3818 = vmatprep.subr.bf16.mxu0 %v3817_v19  ;;  %vm258_vm0 = vcmp.gt.f32.partialorder %v4549_v21, 0.0  ;;  %v4553_v26 = vld [vmem:[%s4543_s14 + $0x10] sm:$0xff]  ;;  %v4556_v28 = vld [vmem:[%s4543_s14 + $0x8] sm:$0xff]  ;;  %v4565_v36 = vld [vmem:[%s4543_s14 + $0x18] sm:$0xff] }
  0x17   : > { %vm259_vm3 = vcmp.gt.f32.partialorder %v4556_v28, 0.0  ;;  %vm260_vm4 = vcmp.gt.f32.partialorder %v4553_v26, 0.0  ;;  %v4569_v39 = vld [vmem:[%s4543_s14 + $0x20] sm:$0xff]  ;;  %vm261_vm7 = vcmp.gt.f32.partialorder %v4565_v36, 0.0  ;;  %v4582_v48 = vld [vmem:[%s4543_s14 + $0x28] sm:$0xff]  ;;  %v4587_v51 = vld [vmem:[%s4543_s14 + $0x30] sm:$0xff] }
  0x18   : > { %292 = vperm.xlu1 %4089, %v4490_v3   ;;  %282 = vperm.xlu0 %4088, %v4493_v4   ;;  %vm262_vm8 = vcmp.gt.f32.partialorder %v4569_v39, 0.0  ;;  %vm264_vm11 = vcmp.gt.f32.partialorder %v4587_v51, 0.0  ;;  %vm263_vm12 = vcmp.gt.f32.partialorder %v4582_v48, 0.0  ;;  %v4607_v0 = vld [vmem:[%s4543_s14 + $0x38] sm:$0xff] }
  0x19   : > { %3820 = vmatpush3.bf16.msra.mxu0 %v3817_v19  ;;  %vm265_vm15 = vcmp.gt.f32.partialorder %v4607_v0, 0.0 }
  0x1c   : > { %302 = vperm.xlu1 %4089, %v4498_v5   ;;  %297 = vperm.xlu0 %4088, %v4501_v6  }
  0x20   : > { %312 = vperm.xlu1 %4089, %v4506_v7   ;;  %307 = vperm.xlu0 %4088, %v4509_v8  }
  0x24   : > { %4090 = vset.pattern.permute.xlu1 %v4421_v9  ;;  %4091 = vset.pattern.permute.xlu0 %v4421_v9 }
  0x25   : > { %586 = vperm.xlu1 %4090, %v4485_v2   ;;  %590 = vperm.xlu0 %4091, %v4493_v4  }
  0x29   : > { %594 = vperm.xlu1 %4090, %v4482_v1   ;;  %4093 = vset.pattern.permute.xlu0 %v4422_v10 }
  0x2d   : > { %598 = vperm.xlu1 %4090, %v4490_v3  }
  0x31   : > { %602 = vperm.xlu1 %4090, %v4501_v6  }
  0x35   : > { %606 = vperm.xlu1 %4090, %v4498_v5  }
  0x39   : > { %610 = vperm.xlu1 %4090, %v4509_v8  }
  0x3d   : > { %614 = vperm.xlu1 %4090, %v4506_v7  }
  0x41   : > { %4092 = vset.pattern.permute.xlu1 %v4422_v10 }
  0x93   : > { %v288_v22 = vpop.permute.xlu1 %287  ;;  %v278_v23 = vpop.permute.xlu0 %277 }
  0x94   : > { %v321_v24 = vadd.f32 %v3134_v20, %v288_v22  ;;  %v319_v25 = vadd.f32 %v3134_v20, %v278_v23  ;;  %v3821_v23 = vpack.c.bf16 %v462_v18, %v461_v17  ;;  %v3141_v17 = vld [vmem:[%s6252_s3 + $0xa8] sm:$0xff] }
  0x96   : > { %vm327_vm1 = vcmp.gt.f32.partialorder %v319_v25, 0.0  ;;  %v335_v27 = vmul.f32 0.2, %v319_v25  ;;  %v337_v29 = vmul.f32 0.2, %v321_v24  ;;  %vm329_vm2 = vcmp.gt.f32.partialorder %v321_v24, 0.0  ;;  %3822 = vmatprep.subr.bf16.mxu0 %v3821_v23 }
  0x97   : > { %v293_v30 = vpop.permute.xlu1 %292  ;;  %v283_v31 = vpop.permute.xlu0 %282  ;;  %3824 = vmatpush3.bf16.msra.mxu0 %v3821_v23 }
  0x98   : > { %v322_v32 = vadd.f32 %v3134_v20, %v293_v30  ;;  %v320_v33 = vadd.f32 %v3134_v20, %v283_v31  ;;  %v343_v34 = vsel %vm327_vm1, %v319_v25, %v335_v27  ;;  %v345_v38 = vsel %vm329_vm2, %v321_v24, %v337_v29 }
  0x99   : > { %v4560_v35 = vsel %vm258_vm0, %v343_v34, -1e+30  ;;  %v4578_v47 = vsel %vm260_vm4, %v345_v38, -1e+30  ;;  %v464_v34 = vld [vmem:[%s6252_s3 + $0x48] sm:$0xff] }
  0x9a   : > { %359 = vmax.xlane.f32.xlu0 %v4560_v35  ;;  %vm328_vm5 = vcmp.gt.f32.partialorder %v320_v33, 0.0  ;;  %v336_v37 = vmul.f32 0.2, %v320_v33  ;;  %v338_v40 = vmul.f32 0.2, %v322_v32  ;;  %vm330_vm6 = vcmp.gt.f32.partialorder %v322_v32, 0.0 }
  0x9b   : > { %v303_v41 = vpop.permute.xlu1 %302  ;;  %v298_v42 = vpop.permute.xlu0 %297 }
  0x9c   : > { %v324_v43 = vadd.f32 %v3134_v20, %v303_v41  ;;  %v323_v44 = vadd.f32 %v3134_v20, %v298_v42  ;;  %v344_v45 = vsel %vm328_vm5, %v320_v33, %v336_v37  ;;  %v346_v50 = vsel %vm330_vm6, %v322_v32, %v338_v40  ;;  %v463_v33 = vld [vmem:[%s6252_s3 + $0x40] sm:$0xff]  ;;  %v3137_v41 = vld [vmem:[%s6252_s3 + $0x88] sm:$0xff] }
  0x9d   : > { %v4574_v46 = vsel %vm259_vm3, %v344_v45, -1e+30  ;;  %v4600_v60 = vsel %vm261_vm7, %v346_v50, -1e+30  ;;  %v3136_v37 = vld [vmem:[%s6252_s3 + $0x80] sm:$0xff]  ;;  %v3825_v40 = vpack.c.bf16 %v464_v34, %v463_v33  ;;  %v465_v50 = vld [vmem:[%s6252_s3 + $0x50] sm:$0xff] }
  0x9e   : > { %361 = vmax.xlane.f32.xlu1 %v4574_v46  ;;  %363 = vmax.xlane.f32.xlu0 %v4578_v47  ;;  %vm331_vm9 = vcmp.gt.f32.partialorder %v323_v44, 0.0  ;;  %v339_v49 = vmul.f32 0.2, %v323_v44  ;;  %v340_v52 = vmul.f32 0.2, %v324_v43  ;;  %vm332_vm10 = vcmp.gt.f32.partialorder %v324_v43, 0.0 }
  0x9f   : > { %v313_v53 = vpop.permute.xlu1 %312  ;;  %v308_v54 = vpop.permute.xlu0 %307  ;;  %3826 = vmatprep.subr.bf16.mxu0 %v3825_v40  ;;  %v3143_v34 = vld [vmem:[%s6252_s3 + $0xb8] sm:$0xff] }
  0xa0   : > { %v326_v55 = vadd.f32 %v3134_v20, %v313_v53  ;;  %v325_v56 = vadd.f32 %v3134_v20, %v308_v54  ;;  %v347_v57 = vsel %vm331_vm9, %v323_v44, %v339_v49  ;;  %v348_v62 = vsel %vm332_vm10, %v324_v43, %v340_v52  ;;  %v466_v52 = vld [vmem:[%s6252_s3 + $0x58] sm:$0xff]  ;;  %v3138_v53 = vld [vmem:[%s6252_s3 + $0x90] sm:$0xff]  ;;  %3828 = vmatpush3.bf16.msra.mxu0 %v3825_v40 }
  0xa1   : > { %v4596_v59 = vsel %vm262_vm8, %v347_v57, -1e+30  ;;  %v4616_v14 = vsel %vm263_vm12, %v348_v62, -1e+30  ;;  %v3841_v44 = vpack.c.bf16 %v3137_v41, %v3136_v37 }
  0xa2   : > { %367 = vmax.xlane.f32.xlu1 %v4596_v59  ;;  %365 = vmax.xlane.f32.xlu0 %v4600_v60  ;;  %vm333_vm13 = vcmp.gt.f32.partialorder %v325_v56, 0.0  ;;  %v341_v61 = vmul.f32 0.2, %v325_v56  ;;  %v342_v63 = vmul.f32 0.2, %v326_v55  ;;  %vm334_vm14 = vcmp.gt.f32.partialorder %v326_v55, 0.0 }
  0xa3   : > { %3842 = vmatprep.subr.bf16.mxu1 %v3841_v44 }
  0xa4   : > { %v587_v9 = vpop.permute.xlu1 %586  ;;  %v349_v10 = vsel %vm333_vm13, %v325_v56, %v341_v61  ;;  %v591_v11 = vpop.permute.xlu0 %590  ;;  %v350_v16 = vsel %vm334_vm14, %v326_v55, %v342_v63  ;;  %3844 = vmatpush3.bf16.msra.mxu1 %v3841_v44  ;;  %v3829_v55 = vpack.c.bf16 %v466_v52, %v465_v50  ;;  %v3139_v56 = vld [vmem:[%s6252_s3 + $0x98] sm:$0xff]  ;;  %v3145_v44 = vld [vmem:[%s6252_s3 + $0xc8] sm:$0xff] }
  0xa5   : > { %v621_v12 = vadd.f32 %v4592_v58, %v587_v9  ;;  %v4612_v13 = vsel %vm264_vm11, %v349_v10, -1e+30  ;;  %v622_v15 = vadd.f32 %v4592_v58, %v591_v11  ;;  %v4631_v25 = vsel %vm265_vm15, %v350_v16, -1e+30  ;;  %v467_v10 = vld [vmem:[%s6252_s3 + $0x60] sm:$0xff]  ;;  %v468_v11 = vld [vmem:[%s6252_s3 + $0x68] sm:$0xff] }
  0xa6   : > { %371 = vmax.xlane.f32.xlu1 %v4612_v13  ;;  %369 = vmax.xlane.f32.xlu0 %v4616_v14  ;;  %v3845_v62 = vpack.c.bf16 %v3139_v56, %v3138_v53  ;;  %v3833_v16 = vpack.c.bf16 %v468_v11, %v467_v10  ;;  %v3146_v56 = vld [vmem:[%s6252_s3 + $0xd0] sm:$0xff]  ;;  %v3149_v10 = vld [vmem:[%s6252_s3 + $0xe8] sm:$0xff] }
  0xa7   : > { %vm629_vm1 = vcmp.gt.f32.partialorder %v621_v12, 0.0  ;;  %v637_v19 = vmul.f32 0.2, %v621_v12  ;;  %vm630_vm2 = vcmp.gt.f32.partialorder %v622_v15, 0.0  ;;  %v638_v20 = vmul.f32 0.2, %v622_v15  ;;  %3830 = vmatprep.subr.bf16.mxu0 %v3829_v55 }
  0xa8   : > { %v595_v22 = vpop.permute.xlu1 %594  ;;  %3846 = vmatprep.subr.bf16.mxu1 %v3845_v62  ;;  %3832 = vmatpush3.bf16.msra.mxu0 %v3829_v55 }
  0xa9   : > { %v623_v24 = vadd.f32 %v4592_v58, %v595_v22  ;;  %v645_v27 = vsel %vm629_vm1, %v621_v12, %v637_v19  ;;  %v646_v29 = vsel %vm630_vm2, %v622_v15, %v638_v20  ;;  %v3140_v12 = vld [vmem:[%s6252_s3 + $0xa0] sm:$0xff]  ;;  %3848 = vmatpush3.bf16.msra.mxu1 %v3845_v62  ;;  %3834 = vmatprep.subr.bf16.mxu0 %v3833_v16 }
  0xaa   : > { %373 = vmax.xlane.f32.xlu0 %v4631_v25  ;;  %v4636_v30 = vsel %vm258_vm0, %v645_v27, -1e+30  ;;  %v4640_v31 = vsel %vm259_vm3, %v646_v29, -1e+30  ;;  %v3849_v20 = vpack.c.bf16 %v3141_v17, %v3140_v12  ;;  %v470_v27 = vld [vmem:[%s6252_s3 + $0x78] sm:$0xff]  ;;  %v3142_v29 = vld [vmem:[%s6252_s3 + $0xb0] sm:$0xff] }
  0xab   : > { %661 = vmax.xlane.f32.xlu1 %v4636_v30  ;;  %vm631_vm5 = vcmp.gt.f32.partialorder %v623_v24, 0.0  ;;  %v639_v32 = vmul.f32 0.2, %v623_v24  ;;  %v3853_v40 = vpack.c.bf16 %v3143_v34, %v3142_v29  ;;  %v3150_v12 = vld [vmem:[%s6252_s3 + $0xf0] sm:$0xff]  ;;  %v3153_v17 = vld [vmem:[%s6252_s3 + $0x100] sm:$0xff] }
  0xac   : > { %v599_v38 = vpop.permute.xlu1 %598  ;;  %3850 = vmatprep.subr.bf16.mxu1 %v3849_v20  ;;  %3836 = vmatpush3.bf16.msra.mxu0 %v3833_v16 }
  0xad   : > { %v624_v42 = vadd.f32 %v4592_v58, %v599_v38  ;;  %v647_v43 = vsel %vm631_vm5, %v623_v24, %v639_v32  ;;  %v469_v24 = vld [vmem:[%s6252_s3 + $0x70] sm:$0xff]  ;;  %3852 = vmatpush3.bf16.msra.mxu1 %v3849_v20 }
  0xae   : > { %663 = vmax.xlane.f32.xlu0 %v4640_v31  ;;  %v4659_v45 = vsel %vm260_vm4, %v647_v43, -1e+30  ;;  %v3837_v33 = vpack.c.bf16 %v470_v27, %v469_v24  ;;  %3854 = vmatprep.subr.bf16.mxu1 %v3853_v40  ;;  %v3144_v43 = vld [vmem:[%s6252_s3 + $0xc0] sm:$0xff] }
  0xaf   : > { %665 = vmax.xlane.f32.xlu1 %v4659_v45  ;;  %vm632_vm6 = vcmp.gt.f32.partialorder %v624_v42, 0.0  ;;  %v640_v49 = vmul.f32 0.2, %v624_v42  ;;  %v3857_v50 = vpack.c.bf16 %v3145_v44, %v3144_v43  ;;  %v3155_v44 = vld [vmem:[%s6252_s3 + $0x110] sm:$0xff] }
  0xb0   : > { %v603_v54 = vpop.permute.xlu1 %602  ;;  %3838 = vmatprep.subr.bf16.mxu0 %v3837_v33 }
  0xb1   : > { %v625_v57 = vadd.f32 %v4592_v58, %v603_v54  ;;  %v648_v61 = vsel %vm632_vm6, %v624_v42, %v640_v49  ;;  %3840 = vmatpush3.bf16.msra.mxu0 %v3837_v33  ;;  %3856 = vmatpush3.bf16.msra.mxu1 %v3853_v40 }
  0xb2   : > { %v4677_v63 = vsel %vm261_vm7, %v648_v61, -1e+30  ;;  %3858 = vmatprep.subr.bf16.mxu1 %v3857_v50 }
  0xb3   : > { %667 = vmax.xlane.f32.xlu0 %v4677_v63  ;;  %vm633_vm9 = vcmp.gt.f32.partialorder %v625_v57, 0.0  ;;  %v641_v9 = vmul.f32 0.2, %v625_v57 }
  0xb4   : > { %v607_v15 = vpop.permute.xlu1 %606 }
  0xb5   : > { %v626_v18 = vadd.f32 %v4592_v58, %v607_v15  ;;  %v649_v19 = vsel %vm633_vm9, %v625_v57, %v641_v9  ;;  %v3147_v57 = vld [vmem:[%s6252_s3 + $0xd8] sm:$0xff]  ;;  %3860 = vmatpush3.bf16.msra.mxu1 %v3857_v50  ;;  %v3148_v9 = vld [vmem:[%s6252_s3 + $0xe0] sm:$0xff] }
  0xb6   : > { %v4695_v22 = vsel %vm262_vm8, %v649_v19, -1e+30  ;;  %v3865_v11 = vpack.c.bf16 %v3149_v10, %v3148_v9  ;;  %v3151_v15 = vld [vmem:[%s6252_s3 + $0xf8] sm:$0xff] }
  0xb7   : > { %669 = vmax.xlane.f32.xlu1 %v4695_v22  ;;  %vm634_vm10 = vcmp.gt.f32.partialorder %v626_v18, 0.0  ;;  %v642_v23 = vmul.f32 0.2, %v626_v18  ;;  %v3869_v16 = vpack.c.bf16 %v3151_v15, %v3150_v12 }
  0xb8   : > { %v611_v32 = vpop.permute.xlu1 %610 }
  0xb9   : > { %v627_v37 = vadd.f32 %v4592_v58, %v611_v32  ;;  %v650_v38 = vsel %vm634_vm10, %v626_v18, %v642_v23 }
  0xba   : > { %v4713_v41 = vsel %vm263_vm12, %v650_v38, -1e+30 }
  0xbb   : > { %671 = vmax.xlane.f32.xlu0 %v4713_v41  ;;  %vm635_vm13 = vcmp.gt.f32.partialorder %v627_v37, 0.0  ;;  %v643_v42 = vmul.f32 0.2, %v627_v37 }
  0xbc   : > { %v615_v49 = vpop.permute.xlu1 %614 }
  0xbd   : > { %v628_v52 = vadd.f32 %v4592_v58, %v615_v49  ;;  %v651_v53 = vsel %vm635_vm13, %v627_v37, %v643_v42  ;;  %v3861_v58 = vpack.c.bf16 %v3147_v57, %v3146_v56 }
  0xbe   : > { %v4725_v54 = vsel %vm264_vm11, %v651_v53, -1e+30 }
  0xbf   : > { %673 = vmax.xlane.f32.xlu1 %v4725_v54  ;;  %vm636_vm14 = vcmp.gt.f32.partialorder %v628_v52, 0.0  ;;  %v644_v55 = vmul.f32 0.2, %v628_v52  ;;  %3862 = vmatprep.subr.bf16.mxu1 %v3861_v58 }
  0xc0   : > { %3864 = vmatpush3.bf16.msra.mxu1 %v3861_v58 }
  0xc1   : > { %v652_v61 = vsel %vm636_vm14, %v628_v52, %v644_v55  ;;  %3866 = vmatprep.subr.bf16.mxu1 %v3865_v11 }
  0xc2   : > { %v4736_v62 = vsel %vm265_vm15, %v652_v61, -1e+30 }
  0xc3   : > { %675 = vmax.xlane.f32.xlu0 %v4736_v62 }
  0xc4   : > { %3868 = vmatpush3.bf16.msra.mxu1 %v3865_v11 }
  0xc5   : > { %3870 = vmatprep.subr.bf16.mxu1 %v3869_v16 }
  0xc8   : > { %3872 = vmatpush3.bf16.msra.mxu1 %v3869_v16 }
  0xd0   : > { %889 = vperm.xlu1 %4092, %v4485_v2  }
  0xd4   : > { %897 = vperm.xlu1 %4092, %v4482_v1   ;;  %v3154_v1 = vld [vmem:[%s6252_s3 + $0x108] sm:$0xff] }
  0xd5   : > { %v3873_v2 = vpack.c.bf16 %v3154_v1, %v3153_v17 }
  0xd7   : > { %3874 = vmatprep.subr.bf16.mxu0 %v3873_v2 }
  0xd8   : > { %901 = vperm.xlu1 %4092, %v4490_v3  }
  0xd9   : > { %893 = vperm.xlu0 %4093, %v4493_v4  }
  0xdc   : > { %905 = vperm.xlu1 %4092, %v4501_v6  }
  0xe0   : > { %909 = vperm.xlu1 %4092, %v4498_v5  }
  0xe4   : > { %913 = vperm.xlu1 %4092, %v4509_v8  }
  0xe8   : > { %917 = vperm.xlu1 %4092, %v4506_v7  }
 0x127   : > { %v360_v3 = vpop.xlane.xlu0 %359 }
 0x128   : > { %v375_v4 = vsub.f32 %v4560_v35, %v360_v3 }
 0x12a   : > { %v383_v6 = vmul.f32 1.442695, %v375_v4 }
 0x12b   : > { %v362_v18 = vpop.xlane.xlu1 %361  ;;  %v364_v5 = vpop.xlane.xlu0 %363 }
 0x12c   : > { %4116 = vpow2.f32 %v383_v6  ;;  %v376_v8 = vsub.f32 %v4574_v46, %v362_v18  ;;  %v377_v7 = vsub.f32 %v4578_v47, %v364_v5 }
 0x12e   : > { %v385_v19 = vmul.f32 1.442695, %v376_v8  ;;  %v387_v20 = vmul.f32 1.442695, %v377_v7 }
 0x12f   : > { %v368_v23 = vpop.xlane.xlu1 %367  ;;  %v366_v24 = vpop.xlane.xlu0 %365 }
 0x130   : > { %4118 = vpow2.f32 %v385_v19  ;;  %v379_v27 = vsub.f32 %v4596_v59, %v368_v23  ;;  %v378_v29 = vsub.f32 %v4600_v60, %v366_v24 }
 0x131   : > { %4120 = vpow2.f32 %v387_v20 }
 0x132   : > { %v391_v32 = vmul.f32 1.442695, %v379_v27  ;;  %v389_v35 = vmul.f32 1.442695, %v378_v29 }
 0x133   : > { %v372_v33 = vpop.xlane.xlu1 %371  ;;  %v370_v34 = vpop.xlane.xlu0 %369 }
 0x134   : > { %4122 = vpow2.f32 %v391_v32  ;;  %v381_v37 = vsub.f32 %v4612_v13, %v372_v33  ;;  %v380_v46 = vsub.f32 %v4616_v14, %v370_v34  ;;  %v3156_v13 = vld [vmem:[%s6252_s3 + $0x118] sm:$0xff] }
 0x135   : > { %4124 = vpow2.f32 %v389_v35  ;;  %v3877_v56 = vpack.c.bf16 %v3156_v13, %v3155_v44 }
 0x136   : > { %v4772_v47 = vpop.eup %4116  ;;  %v395_v38 = vmul.f32 1.442695, %v381_v37  ;;  %v393_v40 = vmul.f32 1.442695, %v380_v46 }
 0x137   : > { %v374_v42 = vpop.xlane.xlu0 %373  ;;  %v447_v59 = vmul.f32 %v4772_v47, %v4549_v21 }
 0x138   : > { %4126 = vpow2.f32 %v395_v38  ;;  %v382_v60 = vsub.f32 %v4631_v25, %v374_v42  ;;  %v662_v43 = vpop.xlane.xlu1 %661 }
 0x139   : > { %4128 = vpow2.f32 %v393_v40  ;;  %v677_v14 = vsub.f32 %v4636_v30, %v662_v43  ;;  %3489 = vmatprep.mubr.f32.mxu0 %v447_v59 }
 0x13a   : > { %v4784_v49 = vpop.eup %4118  ;;  %v397_v50 = vmul.f32 1.442695, %v382_v60 }
 0x13b   : > { %v4786_v52 = vpop.eup %4120  ;;  %v685_v53 = vmul.f32 1.442695, %v677_v14  ;;  %v664_v25 = vpop.xlane.xlu0 %663  ;;  %v448_v55 = vmul.f32 %v4784_v49, %v4556_v28 }
 0x13c   : > { %4130 = vpow2.f32 %v397_v50  ;;  %v678_v57 = vsub.f32 %v4640_v31, %v664_v25  ;;  %v666_v58 = vpop.xlane.xlu1 %665  ;;  %v449_v61 = vmul.f32 %v4786_v52, %v4553_v26 }
 0x13d   : > { %4132 = vpow2.f32 %v685_v53  ;;  %v679_v30 = vsub.f32 %v4659_v45, %v666_v58  ;;  %3490 = vmatmul.mubr.f32.vlgmr.msra.gmra.mrb[0].mxu0 %v448_v55 }
 0x13e   : > { %v4794_v9 = vpop.eup %4122  ;;  %v687_v10 = vmul.f32 1.442695, %v678_v57  ;;  %3492 = vmatprep.mubr.f32.mxu0 %v449_v61  ;;  %3876 = vmatpush3.bf16.msra.mxu0 %v3873_v2 }
 0x13f   : > { %v4796_v11 = vpop.eup %4124  ;;  %v689_v12 = vmul.f32 1.442695, %v679_v30  ;;  %v451_v15 = vmul.f32 %v4794_v9, %v4569_v39  ;;  %3878 = vmatprep.subr.bf16.mxu0 %v3877_v56 }
 0x140   : > { %4134 = vpow2.f32 %v687_v10  ;;  %v668_v31 = vpop.xlane.xlu0 %667  ;;  %v450_v16 = vmul.f32 %v4796_v11, %v4565_v36 }
 0x141   : > { %4136 = vpow2.f32 %v689_v12  ;;  %v680_v45 = vsub.f32 %v4677_v63, %v668_v31 }
 0x142   : > { %v4803_v17 = vpop.eup %4126  ;;  %3493 = vmatmul.mubr.f32.gmra.mrb[2].mxu0 %v450_v16 }
 0x143   : > { %v4805_v1 = vpop.eup %4128  ;;  %v691_v2 = vmul.f32 1.442695, %v680_v45  ;;  %3495 = vmatprep.mubr.f32.mxu0 %v451_v15  ;;  %v453_v3 = vmul.f32 %v4803_v17, %v4587_v51  ;;  %3880 = vmatpush3.bf16.msra.mxu0 %v3877_v56 }
 0x144   : > { %v670_v4 = vpop.xlane.xlu1 %669  ;;  %v452_v6 = vmul.f32 %v4805_v1, %v4582_v48 }
 0x145   : > { %4138 = vpow2.f32 %v691_v2  ;;  %v681_v18 = vsub.f32 %v4695_v22, %v670_v4 }
 0x146   : > { %v4812_v5 = vpop.eup %4130  ;;  %3496 = vmatmul.mubr.f32.gmra.mrb[4].mxu0 %v452_v6 }
 0x147   : > { %v4814_v63 = vpop.eup %4132  ;;  %v693_v8 = vmul.f32 1.442695, %v681_v18  ;;  %3498 = vmatprep.mubr.f32.mxu0 %v453_v3  ;;  %v454_v7 = vmul.f32 %v4812_v5, %v4607_v0 }
 0x148   : > { %v672_v19 = vpop.xlane.xlu0 %671  ;;  %v749_v20 = vmul.f32 %v4814_v63, %v4549_v21 }
 0x149   : > { %4140 = vpow2.f32 %v693_v8  ;;  %v682_v23 = vsub.f32 %v4713_v41, %v672_v19  ;;  %v4833_v41 = vld [vmem:[%s6250_s1 + $0x2] ss:$0 sm:$0xff] }
 0x14a   : > { %v4821_v24 = vpop.eup %4134  ;;  %3499 = vmatmul.mubr.f32.gmra.mrb[6].mxu0 %v454_v7  ;;  %3533 = vmatprep.mubr.f32.mxu1 %v749_v20 }
 0x14b   : > { %v4823_v22 = vpop.eup %4136  ;;  %v695_v27 = vmul.f32 1.442695, %v682_v23  ;;  %v750_v29 = vmul.f32 %v4821_v24, %v4556_v28 }
 0x14c   : > { %v674_v32 = vpop.xlane.xlu1 %673  ;;  %v751_v35 = vmul.f32 %v4823_v22, %v4553_v26 }
 0x14d   : > { %4142 = vpow2.f32 %v695_v27  ;;  %v683_v33 = vsub.f32 %v4725_v54, %v674_v32  ;;  %3534 = vmatmul.mubr.f32.vlgmr.msra.gmra.mrb[0].mxu1 %v750_v29 }
 0x14e   : > { %3536 = vmatprep.mubr.f32.mxu1 %v751_v35  ;;  %v3157_v35 = vld [vmem:[%s6252_s3 + $0x120] sm:$0xff] }
 0x14f   : > { %v4835_v34 = vpop.eup %4138  ;;  %v697_v37 = vmul.f32 1.442695, %v683_v33  ;;  %v3158_v33 = vld [vmem:[%s6252_s3 + $0x128] sm:$0xff] }
 0x150   : > { %v890_v46 = vpop.permute.xlu1 %889  ;;  %v676_v38 = vpop.xlane.xlu0 %675  ;;  %v752_v40 = vmul.f32 %v4835_v34, %v4565_v36 }
 0x151   : > { %4144 = vpow2.f32 %v697_v37  ;;  %v924_v42 = vadd.f32 %v4833_v41, %v890_v46  ;;  %v684_v54 = vsub.f32 %v4736_v62, %v676_v38  ;;  %v3881_v38 = vpack.c.bf16 %v3158_v33, %v3157_v35 }
 0x152   : > { %3537 = vmatmul.mubr.f32.gmra.mrb[2].mxu1 %v752_v40 }
 0x153   : > { %v4841_v59 = vpop.eup %4140  ;;  %v699_v60 = vmul.f32 1.442695, %v684_v54  ;;  %vm932_vm1 = vcmp.gt.f32.partialorder %v924_v42, 0.0  ;;  %v940_v43 = vmul.f32 0.2, %v924_v42  ;;  %3882 = vmatprep.subr.bf16.mxu0 %v3881_v38 }
 0x154   : > { %v898_v44 = vpop.permute.xlu1 %897  ;;  %v753_v13 = vmul.f32 %v4841_v59, %v4569_v39  ;;  %3884 = vmatpush3.bf16.msra.mxu0 %v3881_v38 }
 0x155   : > { %4146 = vpow2.f32 %v699_v60  ;;  %v948_v14 = vsel %vm932_vm1, %v924_v42, %v940_v43  ;;  %v926_v50 = vadd.f32 %v4833_v41, %v898_v44  ;;  %v3159_v43 = vld [vmem:[%s6252_s3 + $0x130] sm:$0xff]  ;;  %v3160_v44 = vld [vmem:[%s6252_s3 + $0x138] sm:$0xff] }
 0x156   : > { %3539 = vmatprep.mubr.f32.mxu1 %v753_v13  ;;  %v4848_v53 = vsel %vm258_vm0, %v948_v14, -1e+30 }
 0x157   : > { %v4850_v62 = vpop.eup %4142  ;;  %964 = vmax.xlane.f32.xlu1 %v4848_v53  ;;  %v942_v61 = vmul.f32 0.2, %v926_v50  ;;  %vm934_vm6 = vcmp.gt.f32.partialorder %v926_v50, 0.0 }
 0x158   : > { %v902_v25 = vpop.permute.xlu1 %901  ;;  %v894_v55 = vpop.permute.xlu0 %893  ;;  %v754_v56 = vmul.f32 %v4850_v62, %v4582_v48 }
 0x159   : > { %v927_v57 = vadd.f32 %v4833_v41, %v902_v25  ;;  %v925_v58 = vadd.f32 %v4833_v41, %v894_v55  ;;  %v950_v18 = vsel %vm934_vm6, %v926_v50, %v942_v61  ;;  %v3885_v50 = vpack.c.bf16 %v3160_v44, %v3159_v43 }
 0x15a   : > { %3540 = vmatmul.mubr.f32.gmra.mrb[4].mxu1 %v754_v56  ;;  %v4879_v23 = vsel %vm260_vm4, %v950_v18, -1e+30  ;;  %v3161_v56 = vld [vmem:[%s6252_s3 + $0x140] sm:$0xff] }
 0x15b   : > { %v4857_v30 = vpop.eup %4144  ;;  %vm935_vm2 = vcmp.gt.f32.partialorder %v927_v57, 0.0  ;;  %v943_v10 = vmul.f32 0.2, %v927_v57  ;;  %vm933_vm5 = vcmp.gt.f32.partialorder %v925_v58, 0.0  ;;  %v941_v12 = vmul.f32 0.2, %v925_v58  ;;  %3886 = vmatprep.subr.bf16.mxu0 %v3885_v50 }
 0x15c   : > { %v906_v15 = vpop.permute.xlu1 %905  ;;  %v755_v31 = vmul.f32 %v4857_v30, %v4587_v51  ;;  %3888 = vmatpush3.bf16.msra.mxu0 %v3885_v50 }
 0x15d   : > { %v928_v16 = vadd.f32 %v4833_v41, %v906_v15  ;;  %v951_v45 = vsel %vm935_vm2, %v927_v57, %v943_v10  ;;  %v949_v2 = vsel %vm933_vm5, %v925_v58, %v941_v12  ;;  %v3163_v10 = vld [vmem:[%s6252_s3 + $0x150] sm:$0xff]  ;;  %v3164_v12 = vld [vmem:[%s6252_s3 + $0x158] sm:$0xff] }
 0x15e   : > { %3542 = vmatprep.mubr.f32.mxu1 %v755_v31  ;;  %v4864_v3 = vsel %vm261_vm7, %v951_v45, -1e+30  ;;  %v4868_v4 = vsel %vm259_vm3, %v949_v2, -1e+30  ;;  %v3893_v15 = vpack.c.bf16 %v3164_v12, %v3163_v10  ;;  %v3166_v31 = vld [vmem:[%s6252_s3 + $0x168] sm:$0xff] }
 0x15f   : > { %v4870_v6 = vpop.eup %4146  ;;  %970 = vmax.xlane.f32.xlu1 %v4864_v3  ;;  %966 = vmax.xlane.f32.xlu0 %v4868_v4  ;;  %v944_v8 = vmul.f32 0.2, %v928_v16  ;;  %vm936_vm9 = vcmp.gt.f32.partialorder %v928_v16, 0.0 }
 0x160   : > { %v910_v7 = vpop.permute.xlu1 %909  ;;  %v756_v19 = vmul.f32 %v4870_v6, %v4607_v0 }
 0x161   : > { %v929_v20 = vadd.f32 %v4833_v41, %v910_v7  ;;  %v952_v29 = vsel %vm936_vm9, %v928_v16, %v944_v8 }
 0x162   : > { %3543 = vmatmul.mubr.f32.gmra.mrb[6].mxu1 %v756_v19  ;;  %v4895_v42 = vsel %vm262_vm8, %v952_v29, -1e+30 }
 0x163   : > { %968 = vmax.xlane.f32.xlu0 %v4879_v23  ;;  %vm937_vm10 = vcmp.gt.f32.partialorder %v929_v20, 0.0  ;;  %v945_v27 = vmul.f32 0.2, %v929_v20 }
 0x164   : > { %v914_v32 = vpop.permute.xlu1 %913 }
 0x165   : > { %v930_v37 = vadd.f32 %v4833_v41, %v914_v32  ;;  %v953_v46 = vsel %vm937_vm10, %v929_v20, %v945_v27 }
 0x166   : > { %v4891_v40 = vsel %vm263_vm12, %v953_v46, -1e+30 }
 0x167   : > { %974 = vmax.xlane.f32.xlu1 %v4891_v40  ;;  %972 = vmax.xlane.f32.xlu0 %v4895_v42  ;;  %vm938_vm13 = vcmp.gt.f32.partialorder %v930_v37, 0.0  ;;  %v946_v54 = vmul.f32 0.2, %v930_v37 }
 0x168   : > { %v918_v60 = vpop.permute.xlu1 %917 }
 0x169   : > { %v931_v13 = vadd.f32 %v4833_v41, %v918_v60  ;;  %v954_v14 = vsel %vm938_vm13, %v930_v37, %v946_v54  ;;  %v3162_v41 = vld [vmem:[%s6252_s3 + $0x148] sm:$0xff] }
 0x16a   : > { %v4908_v25 = vsel %vm264_vm11, %v954_v14, -1e+30  ;;  %v3889_v58 = vpack.c.bf16 %v3162_v41, %v3161_v56 }
 0x16b   : > { %976 = vmax.xlane.f32.xlu0 %v4908_v25  ;;  %vm939_vm14 = vcmp.gt.f32.partialorder %v931_v13, 0.0  ;;  %v947_v55 = vmul.f32 0.2, %v931_v13 }
 0x16c   : > { %3890 = vmatprep.subr.bf16.mxu0 %v3889_v58 }
 0x16d   : > { %v955_v57 = vsel %vm939_vm14, %v931_v13, %v947_v55  ;;  %3892 = vmatpush3.bf16.msra.mxu0 %v3889_v58  ;;  %v4981_v58 = vld [vmem:[%s4479_s24 + $0x8] sm:$0xff] }
 0x16e   : > { %v4919_v61 = vsel %vm265_vm15, %v955_v57, -1e+30  ;;  %3894 = vmatprep.subr.bf16.mxu0 %v3893_v15 }
 0x16f   : > { %978 = vmax.xlane.f32.xlu1 %v4919_v61  ;;  %401 = vadd.xlane.f32.xlu0 %v4784_v49  ;;  %v3165_v49 = vld [vmem:[%s6252_s3 + $0x160] sm:$0xff] }
 0x170   : > { %v3897_v16 = vpack.c.bf16 %v3166_v31, %v3165_v49  ;;  %v4993_v49 = vld [vmem:[%s4479_s24] sm:$0xff] }
 0x171   : > { %3896 = vmatpush3.bf16.msra.mxu0 %v3893_v15 }
 0x172   : > { %3898 = vmatprep.subr.bf16.mxu0 %v3897_v16 }
 0x173   : > { %399 = vadd.xlane.f32.xlu1 %v4772_v47  ;;  %405 = vadd.xlane.f32.xlu0 %v4796_v11  ;;  %v3167_v47 = vld [vmem:[%s6252_s3 + $0x170] sm:$0xff]  ;;  %v3168_v11 = vld [vmem:[%s6252_s3 + $0x178] sm:$0xff] }
 0x174   : > { %v3901_v45 = vpack.c.bf16 %v3168_v11, %v3167_v47 }
 0x175   : > { %3900 = vmatpush3.bf16.msra.mxu0 %v3897_v16 }
 0x176   : > { %3902 = vmatprep.subr.bf16.mxu0 %v3901_v45 }
 0x177   : > { %403 = vadd.xlane.f32.xlu1 %v4786_v52  ;;  %409 = vadd.xlane.f32.xlu0 %v4805_v1  ;;  %v4423_v52 = vmov 3  }
 0x178   : > { %4095 = vset.pattern.permute.xlu1 %v4423_v52  ;;  %4094 = vset.pattern.permute.xlu0 %v4423_v52 }
 0x179   : > { %3904 = vmatpush3.bf16.msra.mxu0 %v3901_v45 }
 0x17b   : > { %407 = vadd.xlane.f32.xlu1 %v4794_v9  ;;  %413 = vadd.xlane.f32.xlu0 %v4812_v5 }
 0x17f   : > { %411 = vadd.xlane.f32.xlu1 %v4803_v17  ;;  %703 = vadd.xlane.f32.xlu0 %v4821_v24 }
 0x183   : > { %701 = vadd.xlane.f32.xlu1 %v4814_v63  ;;  %707 = vadd.xlane.f32.xlu0 %v4835_v34 }
 0x187   : > { %705 = vadd.xlane.f32.xlu1 %v4823_v22  ;;  %711 = vadd.xlane.f32.xlu0 %v4850_v62 }
 0x18b   : > { %709 = vadd.xlane.f32.xlu1 %v4841_v59  ;;  %715 = vadd.xlane.f32.xlu0 %v4870_v6 }
 0x18f   : > { %713 = vadd.xlane.f32.xlu1 %v4857_v30 }
 0x1e4   : > { %v965_v9 = vpop.xlane.xlu1 %964 }
 0x1e5   : > { %v980_v17 = vsub.f32 %v4848_v53, %v965_v9 }
 0x1e7   : > { %v988_v1 = vmul.f32 1.442695, %v980_v17 }
 0x1e9   : > { %4148 = vpow2.f32 %v988_v1  ;;  %v5013_v1 = vld [vmem:[%s4479_s24 + $0x10] sm:$0xff] }
 0x1ec   : > { %v971_v5 = vpop.xlane.xlu1 %970  ;;  %v967_v63 = vpop.xlane.xlu0 %966 }
 0x1ed   : > { %v983_v24 = vsub.f32 %v4864_v3, %v971_v5  ;;  %v981_v22 = vsub.f32 %v4868_v4, %v967_v63  ;;  %v5017_v5 = vld [vmem:[%s4479_s24 + $0x18] sm:$0xff]  ;;  %v5021_v63 = vld [vmem:[%s4479_s24 + $0x20] sm:$0xff] }
 0x1ef   : > { %v990_v34 = vmul.f32 1.442695, %v981_v22  ;;  %v994_v59 = vmul.f32 1.442695, %v983_v24  ;;  %v5025_v24 = vld [vmem:[%s4479_s24 + $0x28] sm:$0xff]  ;;  %v5029_v22 = vld [vmem:[%s4479_s24 + $0x30] sm:$0xff] }
 0x1f0   : > { %v969_v62 = vpop.xlane.xlu0 %968 }
 0x1f1   : > { %v982_v2 = vsub.f32 %v4879_v23, %v969_v62  ;;  %4150 = vpow2.f32 %v990_v34  ;;  %v5037_v62 = vld [vmem:[%s4479_s24 + $0x38] sm:$0xff] }
 0x1f2   : > { %4152 = vpow2.f32 %v994_v59 }
 0x1f3   : > { %v4149_v30 = vpop.eup %4148  ;;  %v992_v6 = vmul.f32 1.442695, %v982_v2 }
 0x1f4   : > { %v975_v18 = vpop.xlane.xlu1 %974  ;;  %1004 = vadd.xlane.f32.xlu0 %v4149_v30  ;;  %v973_v53 = vpop.xlane.xlu0 %972  ;;  %v1052_v8 = vmul.f32 %v4149_v30, %v4549_v21 }
 0x1f5   : > { %4154 = vpow2.f32 %v992_v6  ;;  %v985_v7 = vsub.f32 %v4891_v40, %v975_v18  ;;  %v984_v3 = vsub.f32 %v4895_v42, %v973_v53  ;;  %v3170_v6 = vld [vmem:[%s6252_s3 + $0x180] sm:$0xff]  ;;  %v3171_v18 = vld [vmem:[%s6252_s3 + $0x188] sm:$0xff]  ;;  %v3172_v53 = vld [vmem:[%s6252_s3 + $0x190] sm:$0xff] }
 0x1f6   : > { %3577 = vmatprep.mubr.f32.mxu0 %v1052_v8  ;;  %v3905_v8 = vpack.c.bf16 %v3171_v18, %v3170_v6 }
 0x1f7   : > { %v998_v4 = vmul.f32 1.442695, %v985_v7  ;;  %v996_v19 = vmul.f32 1.442695, %v984_v3  ;;  %v3173_v7 = vld [vmem:[%s6252_s3 + $0x198] sm:$0xff] }
 0x1f8   : > { %v977_v20 = vpop.xlane.xlu0 %976  ;;  %3906 = vmatprep.subr.bf16.mxu1 %v3905_v8 }
 0x1f9   : > { %4156 = vpow2.f32 %v998_v4  ;;  %v986_v23 = vsub.f32 %v4908_v25, %v977_v20  ;;  %3908 = vmatpush3.bf16.msra.mxu1 %v3905_v8 }
 0x1fa   : > { %4158 = vpow2.f32 %v996_v19  ;;  %v3909_v19 = vpack.c.bf16 %v3173_v7, %v3172_v53 }
 0x1fb   : > { %v1000_v27 = vmul.f32 1.442695, %v986_v23  ;;  %v4151_v29 = vpop.eup %4150 }
 0x1fc   : > { %v979_v32 = vpop.xlane.xlu1 %978  ;;  %1006 = vadd.xlane.f32.xlu1 %v4151_v29  ;;  %v1053_v33 = vmul.f32 %v4151_v29, %v4556_v28  ;;  %v4153_v37 = vpop.eup %4152  ;;  %3910 = vmatprep.subr.bf16.mxu1 %v3909_v19 }
 0x1fd   : > { %4160 = vpow2.f32 %v1000_v27  ;;  %v987_v35 = vsub.f32 %v4919_v61, %v979_v32  ;;  %v1055_v42 = vmul.f32 %v4153_v37, %v4565_v36  ;;  %v5032_v34 = vpop.xlane.xlu0 %401  ;;  %3912 = vmatpush3.bf16.msra.mxu1 %v3909_v19 }
 0x1fe   : > { %3578 = vmatmul.mubr.f32.vlgmr.msra.gmra.mrb[8].mxu0 %v1053_v33  ;;  %6298 = vst [vmem:[#allocation17_spill] sm:$0xff] %v5032_v34 }
 0x1ff   : > { %v4155_v46 = vpop.eup %4154  ;;  %v1002_v38 = vmul.f32 1.442695, %v987_v35 }
 0x200   : > { %1008 = vadd.xlane.f32.xlu0 %v4155_v46  ;;  %v1054_v40 = vmul.f32 %v4155_v46, %v4553_v26  ;;  %1010 = vadd.xlane.f32.xlu1 %v4153_v37  ;;  %v5034_v59 = vpop.xlane.xlu1 %399 }
 0x201   : > { %4162 = vpow2.f32 %v1002_v38  ;;  %6299 = vst [vmem:[#allocation18_spill] sm:$0xff] %v5034_v59  ;;  %v5040_v2 = vpop.xlane.xlu0 %405 }
 0x202   : > { %3580 = vmatprep.mubr.f32.mxu0 %v1054_v40  ;;  %6300 = vst [vmem:[#allocation19_spill] sm:$0xff] %v5040_v2 }
 0x203   : > { %v4157_v54 = vpop.eup %4156  ;;  %3581 = vmatmul.mubr.f32.gmra.mrb[10].mxu0 %v1055_v42 }
 0x204   : > { %v4159_v60 = vpop.eup %4158  ;;  %v1057_v43 = vmul.f32 %v4157_v54, %v4582_v48  ;;  %1014 = vadd.xlane.f32.xlu1 %v4157_v54  ;;  %v5042_v30 = vpop.xlane.xlu1 %403 }
 0x205   : > { %1012 = vadd.xlane.f32.xlu0 %v4159_v60  ;;  %v1056_v44 = vmul.f32 %v4159_v60, %v4569_v39  ;;  %6301 = vst [vmem:[#allocation20_spill] sm:$0xff] %v5042_v30  ;;  %v5056_v3 = vpop.xlane.xlu0 %409 }
 0x206   : > { %6302 = vst [vmem:[#allocation21_spill] sm:$0xff] %v5056_v3 }
 0x207   : > { %v4161_v13 = vpop.eup %4160  ;;  %3583 = vmatprep.mubr.f32.mxu0 %v1056_v44 }
 0x208   : > { %3584 = vmatmul.mubr.f32.gmra.mrb[12].mxu0 %v1057_v43  ;;  %v1058_v14 = vmul.f32 %v4161_v13, %v4587_v51  ;;  %v5058_v4 = vpop.xlane.xlu1 %407 }
 0x209   : > { %1016 = vadd.xlane.f32.xlu0 %v4161_v13  ;;  %6303 = vst [vmem:[#allocation22_spill] sm:$0xff] %v5058_v4  ;;  %v5060_v20 = vpop.xlane.xlu0 %413  ;;  %v5095_v13 = vld [vmem:[%s6250_s1 + $0x3] ss:$0 sm:$0xff] }
 0x20a   : > { %3586 = vmatprep.mubr.f32.mxu0 %v1058_v14  ;;  %6304 = vst [vmem:[#allocation23_spill] sm:$0xff] %v5060_v20 }
 0x20b   : > { %v4163_v50 = vpop.eup %4162 }
 0x20c   : > { %v1059_v25 = vmul.f32 %v4163_v50, %v4607_v0  ;;  %v5062_v23 = vpop.xlane.xlu1 %411 }
 0x20d   : > { %6305 = vst [vmem:[#allocation24_spill] sm:$0xff] %v5062_v23  ;;  %v5064_v27 = vpop.xlane.xlu0 %703 }
 0x20e   : > { %3587 = vmatmul.mubr.f32.gmra.mrb[14].mxu0 %v1059_v25 }
 0x210   : > { %v4972_v55 = vpop.f32.mrb[0].mxu0  ;;  %v5066_v29 = vpop.xlane.xlu1 %701 }
 0x211   : > { %6283 = vst [vmem:[#allocation2_spill] sm:$0xff] %v4972_v55  ;;  %v4974_v56 = vpop.f32.mrb[1].mxu0  ;;  %v5068_v32 = vpop.xlane.xlu0 %707 }
 0x212   : > { %6284 = vst [vmem:[#allocation3_spill] sm:$0xff] %v4974_v56 }
 0x214   : > { %v5070_v35 = vpop.xlane.xlu1 %705 }
 0x215   : > { %v4976_v41 = vpop.f32.mrb[2].mxu0  ;;  %1196 = vperm.xlu1 %4095, %v4981_v58   ;;  %v5072_v33 = vpop.xlane.xlu0 %711 }
 0x216   : > { %6285 = vst [vmem:[#allocation4_spill] sm:$0xff] %v4976_v41  ;;  %v4978_v57 = vpop.f32.mrb[3].mxu0 }
 0x217   : > { %6286 = vst [vmem:[#allocation5_spill] sm:$0xff] %v4978_v57 }
 0x218   : > { %v5074_v37 = vpop.xlane.xlu1 %709 }
 0x219   : > { %v4984_v61 = vpop.f32.mrb[4].mxu0  ;;  %v5076_v46 = vpop.xlane.xlu0 %715 }
 0x21a   : > { %6287 = vst [vmem:[#allocation6_spill] sm:$0xff] %v4984_v61  ;;  %v4986_v10 = vpop.f32.mrb[5].mxu0 }
 0x21b   : > { %6288 = vst [vmem:[#allocation7_spill] sm:$0xff] %v4986_v10 }
 0x21c   : > { %v5078_v38 = vpop.xlane.xlu1 %713 }
 0x21d   : > { %v4988_v12 = vpop.f32.mrb[6].mxu0 }
 0x21e   : > { %6289 = vst [vmem:[#allocation8_spill] sm:$0xff] %v4988_v12  ;;  %v4990_v15 = vpop.f32.mrb[7].mxu0 }
 0x21f   : > { %6290 = vst [vmem:[#allocation9_spill] sm:$0xff] %v4990_v15  ;;  %1192 = vperm.xlu0 %4094, %v4993_v49   ;;  %v3185_v15 = vld [vmem:[%s6252_s3 + $0x1f8] sm:$0xff] }
 0x220   : > { %v4996_v31 = vpop.f32.mrb[0].mxu1 }
 0x221   : > { %6291 = vst [vmem:[#allocation10_spill] sm:$0xff] %v4996_v31  ;;  %v4998_v16 = vpop.f32.mrb[1].mxu1 }
 0x225   : > { %v5000_v47 = vpop.f32.mrb[2].mxu1 }
 0x226   : > { %6292 = vst [vmem:[#allocation11_spill] sm:$0xff] %v5000_v47  ;;  %v5002_v11 = vpop.f32.mrb[3].mxu1 }
 0x227   : > { %6293 = vst [vmem:[#allocation12_spill] sm:$0xff] %v5002_v11 }
 0x22d   : > { %v5004_v45 = vpop.f32.mrb[4].mxu1 }
 0x22e   : > { %6294 = vst [vmem:[#allocation13_spill] sm:$0xff] %v5004_v45  ;;  %v5006_v52 = vpop.f32.mrb[5].mxu1 }
 0x22f   : > { %6295 = vst [vmem:[#allocation14_spill] sm:$0xff] %v5006_v52 }
 0x235   : > { %v5008_v9 = vpop.f32.mrb[6].mxu1 }
 0x236   : > { %6296 = vst [vmem:[#allocation15_spill] sm:$0xff] %v5008_v9  ;;  %v5010_v17 = vpop.f32.mrb[7].mxu1  ;;  %v3216_v9 = vld [vmem:[%s6252_s3 + $0x2e0] sm:$0xff] }
 0x237   : > { %6297 = vst [vmem:[#allocation16_spill] sm:$0xff] %v5010_v17 }
 0x239   : > { %1018 = vadd.xlane.f32.xlu1 %v4163_v50 }
 0x24a   : > { %1200 = vperm.xlu1 %4095, %v5013_v1  }
 0x24e   : > { %1204 = vperm.xlu1 %4095, %v5017_v5  }
 0x252   : > { %1208 = vperm.xlu1 %4095, %v5021_v63  }
 0x256   : > { %1212 = vperm.xlu1 %4095, %v5025_v24  }
 0x25a   : > { %1216 = vperm.xlu1 %4095, %v5029_v22  }
 0x25e   : > { %1220 = vperm.xlu1 %4095, %v5037_v62  }
 0x281   : > { %v5080_v40 = vpop.xlane.xlu0 %1004 }
 0x289   : > { %v5082_v42 = vpop.xlane.xlu1 %1006 }
 0x28d   : > { %v5084_v54 = vpop.xlane.xlu1 %1010  ;;  %v5086_v60 = vpop.xlane.xlu0 %1008 }
 0x28e   : > { %6306 = vst [vmem:[#allocation25_spill] sm:$0xff] %v5086_v60 }
 0x291   : > { %v5088_v43 = vpop.xlane.xlu1 %1014 }
 0x292   : > { %6307 = vst [vmem:[#allocation26_spill] sm:$0xff] %v5088_v43  ;;  %v5090_v44 = vpop.xlane.xlu0 %1012 }
 0x293   : > { %6308 = vst [vmem:[#allocation27_spill] sm:$0xff] %v5090_v44 }
 0x295   : > { %v1197_v14 = vpop.permute.xlu1 %1196 }
 0x296   : > { %v1228_v50 = vadd.f32 %v5095_v13, %v1197_v14  ;;  %v5098_v6 = vpop.xlane.xlu0 %1016 }
 0x297   : > { %6309 = vst [vmem:[#allocation28_spill] sm:$0xff] %v5098_v6 }
 0x298   : > { %vm1236_vm1 = vcmp.gt.f32.partialorder %v1228_v50, 0.0  ;;  %v1244_v25 = vmul.f32 0.2, %v1228_v50 }
 0x29a   : > { %v1252_v18 = vsel %vm1236_vm1, %v1228_v50, %v1244_v25  ;;  %v3174_v50 = vld [vmem:[%s6252_s3 + $0x1a0] sm:$0xff]  ;;  %v3175_v25 = vld [vmem:[%s6252_s3 + $0x1a8] sm:$0xff] }
 0x29b   : > { %v5102_v53 = vsel %vm259_vm3, %v1252_v18, -1e+30  ;;  %v3913_v18 = vpack.c.bf16 %v3175_v25, %v3174_v50  ;;  %v3179_v50 = vld [vmem:[%s6252_s3 + $0x1c8] sm:$0xff] }
 0x29c   : > { %1269 = vmax.xlane.f32.xlu0 %v5102_v53 }
 0x29d   : > { %3914 = vmatprep.subr.bf16.mxu1 %v3913_v18 }
 0x29e   : > { %v1193_v8 = vpop.permute.xlu0 %1192  ;;  %3916 = vmatpush3.bf16.msra.mxu1 %v3913_v18  ;;  %v3180_v18 = vld [vmem:[%s6252_s3 + $0x1d0] sm:$0xff] }
 0x29f   : > { %v1227_v7 = vadd.f32 %v5095_v13, %v1193_v8  ;;  %v3176_v8 = vld [vmem:[%s6252_s3 + $0x1b0] sm:$0xff] }
 0x2a1   : > { %vm1235_vm2 = vcmp.gt.f32.partialorder %v1227_v7, 0.0  ;;  %v1243_v19 = vmul.f32 0.2, %v1227_v7 }
 0x2a3   : > { %v1251_v12 = vsel %vm1235_vm2, %v1227_v7, %v1243_v19  ;;  %v3178_v19 = vld [vmem:[%s6252_s3 + $0x1c0] sm:$0xff] }
 0x2a4   : > { %v5108_v14 = vsel %vm258_vm0, %v1251_v12, -1e+30  ;;  %v3177_v12 = vld [vmem:[%s6252_s3 + $0x1b8] sm:$0xff]  ;;  %v3921_v25 = vpack.c.bf16 %v3179_v50, %v3178_v19  ;;  %v3183_v19 = vld [vmem:[%s6252_s3 + $0x1e8] sm:$0xff]  ;;  %v3184_v50 = vld [vmem:[%s6252_s3 + $0x1f0] sm:$0xff] }
 0x2a5   : > { %1267 = vmax.xlane.f32.xlu1 %v5108_v14  ;;  %v3917_v7 = vpack.c.bf16 %v3177_v12, %v3176_v8  ;;  %v3181_v8 = vld [vmem:[%s6252_s3 + $0x1d8] sm:$0xff] }
 0x2a6   : > { %v3925_v12 = vpack.c.bf16 %v3181_v8, %v3180_v18  ;;  %v3933_v18 = vpack.c.bf16 %v3185_v15, %v3184_v50 }
 0x2a7   : > { %3918 = vmatprep.subr.bf16.mxu1 %v3917_v7 }
 0x2a8   : > { %3920 = vmatpush3.bf16.msra.mxu1 %v3917_v7  ;;  %v3182_v7 = vld [vmem:[%s6252_s3 + $0x1e0] sm:$0xff] }
 0x2a9   : > { %3922 = vmatprep.subr.bf16.mxu1 %v3921_v25 }
 0x2ac   : > { %3924 = vmatpush3.bf16.msra.mxu1 %v3921_v25  ;;  %v3929_v25 = vpack.c.bf16 %v3183_v19, %v3182_v7 }
 0x2ad   : > { %3926 = vmatprep.subr.bf16.mxu1 %v3925_v12 }
 0x2b0   : > { %3928 = vmatpush3.bf16.msra.mxu1 %v3925_v12 }
 0x2b1   : > { %3930 = vmatprep.subr.bf16.mxu1 %v3929_v25 }
 0x2b4   : > { %3932 = vmatpush3.bf16.msra.mxu1 %v3929_v25 }
 0x2b5   : > { %3934 = vmatprep.subr.bf16.mxu1 %v3933_v18 }
 0x2b8   : > { %3936 = vmatpush3.bf16.msra.mxu1 %v3933_v18 }
 0x2c6   : > { %v5147_v8 = vpop.xlane.xlu1 %1018 }
 0x2c7   : > { %6310 = vst [vmem:[#allocation29_spill] sm:$0xff] %v5147_v8 }
 0x2ca   : > { %v1201_v61 = vpop.permute.xlu1 %1200 }
 0x2cb   : > { %v1229_v10 = vadd.f32 %v5095_v13, %v1201_v61 }
 0x2cd   : > { %vm1237_vm5 = vcmp.gt.f32.partialorder %v1229_v10, 0.0  ;;  %v1245_v41 = vmul.f32 0.2, %v1229_v10 }
 0x2ce   : > { %v1205_v57 = vpop.permute.xlu1 %1204 }
 0x2cf   : > { %v1230_v12 = vadd.f32 %v5095_v13, %v1205_v57  ;;  %v1253_v7 = vsel %vm1237_vm5, %v1229_v10, %v1245_v41 }
 0x2d0   : > { %v5153_v19 = vsel %vm260_vm4, %v1253_v7, -1e+30 }
 0x2d1   : > { %v1246_v15 = vmul.f32 0.2, %v1230_v12  ;;  %v5155_v50 = vpop.f32.mrb[8].mxu0  ;;  %1271 = vmax.xlane.f32.xlu0 %v5153_v19  ;;  %vm1238_vm6 = vcmp.gt.f32.partialorder %v1230_v12, 0.0 }
 0x2d2   : > { %6311 = vst [vmem:[#allocation30_spill] sm:$0xff] %v5155_v50  ;;  %v1209_v25 = vpop.permute.xlu1 %1208  ;;  %v5158_v18 = vpop.f32.mrb[9].mxu0 }
 0x2d3   : > { %6312 = vst [vmem:[#allocation31_spill] sm:$0xff] %v5158_v18  ;;  %v1231_v61 = vadd.f32 %v5095_v13, %v1209_v25  ;;  %v1254_v55 = vsel %vm1238_vm6, %v1230_v12, %v1246_v15  ;;  %v5200_v18 = vld [vmem:[%s4543_s14 + $0x10] sm:$0xff] }
 0x2d4   : > { %v1262_v57 = vsel %vm261_vm7, %v1254_v55, -1e+30 }
 0x2d5   : > { %1273 = vmax.xlane.f32.xlu1 %v1262_v57  ;;  %vm1239_vm9 = vcmp.gt.f32.partialorder %v1231_v61, 0.0  ;;  %v1247_v10 = vmul.f32 0.2, %v1231_v61 }
 0x2d6   : > { %v5163_v41 = vpop.f32.mrb[10].mxu0  ;;  %v1213_v7 = vpop.permute.xlu1 %1212 }
 0x2d7   : > { %6313 = vst [vmem:[#allocation32_spill] sm:$0xff] %v5163_v41  ;;  %v5165_v56 = vpop.f32.mrb[11].mxu0  ;;  %v1232_v20 = vadd.f32 %v5095_v13, %v1213_v7  ;;  %v1255_v23 = vsel %vm1239_vm9, %v1231_v61, %v1247_v10 }
 0x2d8   : > { %6314 = vst [vmem:[#allocation33_spill] sm:$0xff] %v5165_v56  ;;  %v1263_v3 = vsel %vm262_vm8, %v1255_v23, -1e+30 }
 0x2d9   : > { %v1248_v4 = vmul.f32 0.2, %v1232_v20  ;;  %1275 = vmax.xlane.f32.xlu0 %v1263_v3  ;;  %vm1240_vm10 = vcmp.gt.f32.partialorder %v1232_v20, 0.0 }
 0x2da   : > { %v1217_v12 = vpop.permute.xlu1 %1216 }
 0x2db   : > { %v5170_v15 = vpop.f32.mrb[12].mxu0  ;;  %v1233_v55 = vadd.f32 %v5095_v13, %v1217_v12  ;;  %v1256_v2 = vsel %vm1240_vm10, %v1232_v20, %v1248_v4  ;;  %v6263_v20 = vmov 4  }
 0x2dc   : > { %6315 = vst [vmem:[#allocation34_spill] sm:$0xff] %v5170_v15  ;;  %v5173_v25 = vpop.f32.mrb[13].mxu0  ;;  %v1264_v34 = vsel %vm263_vm12, %v1256_v2, -1e+30  ;;  %4096 = vset.pattern.permute.xlu1 %v6263_v20 }
 0x2dd   : > { %6316 = vst [vmem:[#allocation35_spill] sm:$0xff] %v5173_v25  ;;  %1277 = vmax.xlane.f32.xlu1 %v1264_v34  ;;  %vm1241_vm13 = vcmp.gt.f32.partialorder %v1233_v55, 0.0  ;;  %v1249_v61 = vmul.f32 0.2, %v1233_v55  ;;  %v5195_v25 = vld [vmem:[%s4543_s14 + $0x8] sm:$0xff] }
 0x2de   : > { %v1221_v10 = vpop.permute.xlu1 %1220 }
 0x2df   : > { %v1234_v23 = vadd.f32 %v5095_v13, %v1221_v10  ;;  %v1257_v7 = vsel %vm1241_vm13, %v1233_v55, %v1249_v61  ;;  %v6265_v13 = vmov 5  }
 0x2e0   : > { %v1265_v30 = vsel %vm264_vm11, %v1257_v7, -1e+30  ;;  %4101 = vset.pattern.permute.xlu0 %v6265_v13 }
 0x2e1   : > { %v5180_v59 = vpop.f32.mrb[14].mxu0  ;;  %v1250_v15 = vmul.f32 0.2, %v1234_v23  ;;  %1279 = vmax.xlane.f32.xlu0 %v1265_v30  ;;  %vm1242_vm14 = vcmp.gt.f32.partialorder %v1234_v23, 0.0 }
 0x2e2   : > { %6317 = vst [vmem:[#allocation36_spill] sm:$0xff] %v5180_v59  ;;  %v5182_v12 = vpop.f32.mrb[15].mxu0  ;;  %v5191_v59 = vld [vmem:[%s4543_s14] sm:$0xff] }
 0x2e3   : > { %6318 = vst [vmem:[#allocation37_spill] sm:$0xff] %v5182_v12  ;;  %v1258_v4 = vsel %vm1242_vm14, %v1234_v23, %v1250_v15 }
 0x2e4   : > { %v1266_v2 = vsel %vm265_vm15, %v1258_v4, -1e+30 }
 0x2e5   : > { %1281 = vmax.xlane.f32.xlu1 %v1266_v2 }
 0x329   : > { %v1270_v55 = vpop.xlane.xlu0 %1269 }
 0x32a   : > { %v1284_v61 = vsub.f32 %v5102_v53, %v1270_v55 }
 0x32c   : > { %v1293_v10 = vmul.f32 1.442695, %v1284_v61 }
 0x32e   : > { %4164 = vpow2.f32 %v1293_v10 }
 0x332   : > { %v1268_v7 = vpop.xlane.xlu1 %1267 }
 0x333   : > { %v1283_v15 = vsub.f32 %v5108_v14, %v1268_v7 }
 0x335   : > { %v1291_v23 = vmul.f32 1.442695, %v1283_v15 }
 0x337   : > { %4166 = vpow2.f32 %v1291_v23 }
 0x338   : > { %v4165_v4 = vpop.eup %4164 }
 0x339   : > { %1309 = vadd.xlane.f32.xlu1 %v4165_v4  ;;  %v1356_v13 = vmul.f32 %v5195_v25, %v4165_v4 }
 0x341   : > { %v4167_v12 = vpop.eup %4166 }
 0x342   : > { %1307 = vadd.xlane.f32.xlu0 %v4167_v12  ;;  %v1355_v20 = vmul.f32 %v5191_v59, %v4167_v12 }
 0x344   : > { %3621 = vmatprep.mubr.f32.mxu1 %v1355_v20 }
 0x345   : > { %3622 = vmatmul.mubr.f32.vlgmr.msra.gmra.mrb[8].mxu1 %v1356_v13 }
 0x35e   : > { %v1272_v53 = vpop.xlane.xlu0 %1271 }
 0x35f   : > { %v1285_v55 = vsub.f32 %v5153_v19, %v1272_v53 }
 0x361   : > { %v1295_v14 = vmul.f32 1.442695, %v1285_v55 }
 0x362   : > { %v1274_v61 = vpop.xlane.xlu1 %1273 }
 0x363   : > { %4168 = vpow2.f32 %v1295_v14  ;;  %v1286_v10 = vsub.f32 %v1262_v57, %v1274_v61  ;;  %v5204_v14 = vld [vmem:[%s4543_s14 + $0x18] sm:$0xff] }
 0x365   : > { %v1297_v7 = vmul.f32 1.442695, %v1286_v10  ;;  %v4400_v10 = vld [vmem:[%s4543_s14 + $0x20] sm:$0xff] }
 0x366   : > { %v1276_v15 = vpop.xlane.xlu0 %1275 }
 0x367   : > { %4170 = vpow2.f32 %v1297_v7  ;;  %v1287_v23 = vsub.f32 %v1263_v3, %v1276_v15  ;;  %v4401_v15 = vld [vmem:[%s4543_s14 + $0x28] sm:$0xff] }
 0x369   : > { %v1299_v56 = vmul.f32 1.442695, %v1287_v23 }
 0x36a   : > { %v1278_v12 = vpop.xlane.xlu1 %1277 }
 0x36b   : > { %4172 = vpow2.f32 %v1299_v56  ;;  %v1288_v41 = vsub.f32 %v1264_v34, %v1278_v12 }
 0x36d   : > { %v4169_v4 = vpop.eup %4168  ;;  %v1301_v20 = vmul.f32 1.442695, %v1288_v41 }
 0x36e   : > { %1311 = vadd.xlane.f32.xlu0 %v4169_v4  ;;  %v1280_v13 = vpop.xlane.xlu0 %1279  ;;  %v1357_v19 = vmul.f32 %v5200_v18, %v4169_v4  ;;  %v4402_v4 = vld [vmem:[%s4543_s14 + $0x30] sm:$0xff] }
 0x36f   : > { %4174 = vpow2.f32 %v1301_v20  ;;  %v1289_v57 = vsub.f32 %v1265_v30, %v1280_v13  ;;  %v4403_v13 = vld [vmem:[%s4543_s14 + $0x38] sm:$0xff] }
 0x370   : > { %3624 = vmatprep.mubr.f32.mxu1 %v1357_v19 }
 0x371   : > { %v4171_v53 = vpop.eup %4170  ;;  %v1303_v55 = vmul.f32 1.442695, %v1289_v57  ;;  %v6319_v57 = vmov 5  }
 0x372   : > { %v1282_v3 = vpop.xlane.xlu1 %1281  ;;  %1313 = vadd.xlane.f32.xlu1 %v4171_v53  ;;  %v1358_v56 = vmul.f32 %v5204_v14, %v4171_v53  ;;  %v6320_v53 = vmov 4  }
 0x373   : > { %4176 = vpow2.f32 %v1303_v55  ;;  %v1290_v34 = vsub.f32 %v1266_v2, %v1282_v3  ;;  %v4426_v55 = vmov 6   ;;  %v4427_v3 = vmov 7  }
 0x374   : > { %3625 = vmatmul.mubr.f32.gmra.mrb[10].mxu1 %v1358_v56 }
 0x375   : > { %v4173_v41 = vpop.eup %4172  ;;  %v1305_v61 = vmul.f32 1.442695, %v1290_v34  ;;  %v3191_v34 = vld [vmem:[%s6252_s3 + $0x220] sm:$0xff] }
 0x376   : > { %1315 = vadd.xlane.f32.xlu0 %v4173_v41  ;;  %v1359_v30 = vmul.f32 %v4400_v10, %v4173_v41  ;;  %v3192_v41 = vld [vmem:[%s6252_s3 + $0x228] sm:$0xff] }
 0x377   : > { %4178 = vpow2.f32 %v1305_v61  ;;  %v3945_v61 = vpack.c.bf16 %v3192_v41, %v3191_v34 }
 0x378   : > { %3627 = vmatprep.mubr.f32.mxu1 %v1359_v30 }
 0x379   : > { %v4175_v7 = vpop.eup %4174 }
 0x37a   : > { %1317 = vadd.xlane.f32.xlu1 %v4175_v7  ;;  %v1360_v23 = vmul.f32 %v4401_v15, %v4175_v7 }
 0x37c   : > { %3628 = vmatmul.mubr.f32.gmra.mrb[12].mxu1 %v1360_v23 }
 0x37d   : > { %v4177_v12 = vpop.eup %4176 }
 0x37e   : > { %1319 = vadd.xlane.f32.xlu0 %v4177_v12  ;;  %v1361_v20 = vmul.f32 %v4402_v4, %v4177_v12 }
 0x380   : > { %3630 = vmatprep.mubr.f32.mxu1 %v1361_v20 }
 0x381   : > { %v4179_v2 = vpop.eup %4178 }
 0x382   : > { %1321 = vadd.xlane.f32.xlu1 %v4179_v2  ;;  %v1362_v19 = vmul.f32 %v4403_v13, %v4179_v2  ;;  %v5294_v2 = vld [vmem:[%s6250_s1 + $0x4] ss:$0 sm:$0xff] }
 0x384   : > { %3631 = vmatmul.mubr.f32.gmra.mrb[14].mxu1 %v1362_v19 }
 0x393   : > { %1499 = vperm.xlu1 %4096, %v4981_v58  }
 0x394   : > { %1814 = vperm.xlu0 %4101, %v5021_v63  }
 0x397   : > { %4097 = vset.pattern.permute.xlu1 %v6319_v57 }
 0x398   : > { %1798 = vperm.xlu1 %4097, %v4993_v49   ;;  %4102 = vset.pattern.permute.xlu0 %v6320_v53 }
 0x399   : > { %1495 = vperm.xlu0 %4102, %v4993_v49  }
 0x39c   : > { %1802 = vperm.xlu1 %4097, %v4981_v58  }
 0x39d   : > { %1511 = vperm.xlu0 %4102, %v5021_v63  }
 0x3a0   : > { %4098 = vset.pattern.permute.xlu1 %v6320_v53 }
 0x3a1   : > { %1503 = vperm.xlu1 %4098, %v5013_v1   ;;  %1523 = vperm.xlu0 %4102, %v5037_v62  }
 0x3a5   : > { %1507 = vperm.xlu1 %4098, %v5017_v5   ;;  %4106 = vset.pattern.permute.xlu0 %v4426_v55 }
 0x3a6   : > { %2101 = vperm.xlu0 %4106, %v4993_v49  }
 0x3a9   : > { %4099 = vset.pattern.permute.xlu1 %v6319_v57 }
 0x3aa   : > { %1806 = vperm.xlu1 %4099, %v5013_v1   ;;  %2117 = vperm.xlu0 %4106, %v5021_v63  }
 0x3ae   : > { %1810 = vperm.xlu1 %4099, %v5017_v5   ;;  %4111 = vset.pattern.permute.xlu0 %v4427_v3 }
 0x3af   : > { %2408 = vperm.xlu0 %4111, %v4981_v58  }
 0x3b2   : > { %4100 = vset.pattern.permute.xlu1 %v6320_v53 }
 0x3b3   : > { %1515 = vperm.xlu1 %4100, %v5025_v24   ;;  %2412 = vperm.xlu0 %4111, %v5013_v1  }
 0x3b7   : > { %4103 = vset.pattern.permute.xlu1 %v6319_v57  ;;  %2424 = vperm.xlu0 %4111, %v5025_v24  }
 0x3b8   : > { %1818 = vperm.xlu1 %4103, %v5025_v24  }
 0x3bb   : > { %2428 = vperm.xlu0 %4111, %v5029_v22  }
 0x3bc   : > { %4104 = vset.pattern.permute.xlu1 %v6320_v53  ;;  %v5300_v53 = vld [vmem:[%s6250_s1 + $0x5] ss:$0 sm:$0xff] }
 0x3bd   : > { %1519 = vperm.xlu1 %4104, %v5029_v22  }
 0x3c1   : > { %4105 = vset.pattern.permute.xlu1 %v6319_v57 }
 0x3c2   : > { %1822 = vperm.xlu1 %4105, %v5029_v22  }
 0x3c6   : > { %1826 = vperm.xlu1 %4105, %v5037_v62   ;;  %v5275_v10 = vpop.xlane.xlu1 %1309 }
 0x3c7   : > { %6321 = vst [vmem:[#allocation38_spill] sm:$0xff] %v5275_v10 }
 0x3ca   : > { %4107 = vset.pattern.permute.xlu1 %v4426_v55 }
 0x3cb   : > { %2105 = vperm.xlu1 %4107, %v4981_v58   ;;  %v3187_v58 = vld [vmem:[%s6252_s3 + $0x200] sm:$0xff] }
 0x3cf   : > { %4108 = vset.pattern.permute.xlu1 %v4427_v3  ;;  %v5277_v30 = vpop.xlane.xlu0 %1307 }
 0x3d0   : > { %2404 = vperm.xlu1 %4108, %v4993_v49   ;;  %v3188_v49 = vld [vmem:[%s6252_s3 + $0x208] sm:$0xff]  ;;  %6322 = vst [vmem:[#allocation39_spill] sm:$0xff] %v5277_v30 }
 0x3d4   : > { %4109 = vset.pattern.permute.xlu1 %v4426_v55 }
 0x3d5   : > { %2109 = vperm.xlu1 %4109, %v5013_v1   ;;  %v3189_v1 = vld [vmem:[%s6252_s3 + $0x210] sm:$0xff] }
 0x3d9   : > { %2113 = vperm.xlu1 %4109, %v5017_v5  }
 0x3dd   : > { %4110 = vset.pattern.permute.xlu1 %v4427_v3 }
 0x3de   : > { %2416 = vperm.xlu1 %4110, %v5017_v5   ;;  %v3937_v5 = vpack.c.bf16 %v3188_v49, %v3187_v58 }
 0x3e0   : > { %3938 = vmatprep.subr.bf16.mxu0 %v3937_v5 }
 0x3e1   : > { %3940 = vmatpush3.bf16.msra.mxu0 %v3937_v5 }
 0x3e2   : > { %4112 = vset.pattern.permute.xlu1 %v4426_v55 }
 0x3e3   : > { %2121 = vperm.xlu1 %4112, %v5025_v24   ;;  %v3204_v24 = vld [vmem:[%s6252_s3 + $0x280] sm:$0xff] }
 0x3e7   : > { %4113 = vset.pattern.permute.xlu1 %v4427_v3 }
 0x3e8   : > { %2420 = vperm.xlu1 %4113, %v5021_v63   ;;  %v3190_v63 = vld [vmem:[%s6252_s3 + $0x218] sm:$0xff] }
 0x3ec   : > { %4114 = vset.pattern.permute.xlu1 %v4426_v55 }
 0x3ed   : > { %2125 = vperm.xlu1 %4114, %v5029_v22   ;;  %v3205_v22 = vld [vmem:[%s6252_s3 + $0x288] sm:$0xff] }
 0x3ee   : > { %v3969_v56 = vpack.c.bf16 %v3205_v22, %v3204_v24 }
 0x3f0   : > { %3970 = vmatprep.subr.bf16.mxu1 %v3969_v56 }
 0x3f1   : > { %2129 = vperm.xlu1 %4114, %v5037_v62   ;;  %3972 = vmatpush3.bf16.msra.mxu1 %v3969_v56 }
 0x3f5   : > { %4115 = vset.pattern.permute.xlu1 %v4427_v3 }
 0x3f6   : > { %2432 = vperm.xlu1 %4115, %v5037_v62   ;;  %v3941_v62 = vpack.c.bf16 %v3190_v63, %v3189_v1 }
 0x3f8   : > { %3942 = vmatprep.subr.bf16.mxu0 %v3941_v62 }
 0x3f9   : > { %3944 = vmatpush3.bf16.msra.mxu0 %v3941_v62 }
 0x3fa   : > { %3946 = vmatprep.subr.bf16.mxu0 %v3945_v61 }
 0x3fb   : > { %v5279_v7 = vpop.xlane.xlu0 %1311 }
 0x3fc   : > { %6323 = vst [vmem:[#allocation40_spill] sm:$0xff] %v5279_v7 }
 0x3fd   : > { %3948 = vmatpush3.bf16.msra.mxu0 %v3945_v61 }
 0x3ff   : > { %v5281_v15 = vpop.xlane.xlu1 %1313 }
 0x400   : > { %6324 = vst [vmem:[#allocation41_spill] sm:$0xff] %v5281_v15 }
 0x403   : > { %v5283_v23 = vpop.xlane.xlu0 %1315 }
 0x404   : > { %6325 = vst [vmem:[#allocation42_spill] sm:$0xff] %v5283_v23 }
 0x407   : > { %v5285_v12 = vpop.xlane.xlu1 %1317 }
 0x408   : > { %6326 = vst [vmem:[#allocation43_spill] sm:$0xff] %v5285_v12  ;;  %v3196_v12 = vld [vmem:[%s6252_s3 + $0x248] sm:$0xff] }
 0x40b   : > { %v5287_v4 = vpop.xlane.xlu0 %1319 }
 0x40c   : > { %6327 = vst [vmem:[#allocation44_spill] sm:$0xff] %v5287_v4 }
 0x40f   : > { %v5289_v20 = vpop.xlane.xlu1 %1321 }
 0x410   : > { %6328 = vst [vmem:[#allocation45_spill] sm:$0xff] %v5289_v20 }
 0x413   : > { %v1500_v13 = vpop.permute.xlu1 %1499  ;;  %v1815_v19 = vpop.permute.xlu0 %1814 }
 0x414   : > { %v1531_v57 = vadd.f32 %v5294_v2, %v1500_v13  ;;  %v1837_v23 = vadd.f32 %v5300_v53, %v1815_v19  ;;  %v3195_v19 = vld [vmem:[%s6252_s3 + $0x240] sm:$0xff] }
 0x415   : > { %v3953_v17 = vpack.c.bf16 %v3196_v12, %v3195_v19 }
 0x416   : > { %v1547_v55 = vmul.f32 0.2, %v1531_v57  ;;  %vm1539_vm1 = vcmp.gt.f32.partialorder %v1531_v57, 0.0  ;;  %v1853_v50 = vmul.f32 0.2, %v1837_v23 }
 0x417   : > { %v1799_v3 = vpop.permute.xlu1 %1798 }
 0x418   : > { %v5302_v58 = vpop.f32.mrb[8].mxu1  ;;  %v1833_v49 = vadd.f32 %v5300_v53, %v1799_v3  ;;  %v1496_v5 = vpop.permute.xlu0 %1495  ;;  %v1555_v63 = vsel %vm1539_vm1, %v1531_v57, %v1547_v55 }
 0x419   : > { %6329 = vst [vmem:[#allocation46_spill] sm:$0xff] %v5302_v58  ;;  %v5305_v1 = vpop.f32.mrb[9].mxu1  ;;  %v1530_v24 = vadd.f32 %v5294_v2, %v1496_v5  ;;  %v5310_v22 = vsel %vm259_vm3, %v1555_v63, -1e+30 }
 0x41a   : > { %6330 = vst [vmem:[#allocation47_spill] sm:$0xff] %v5305_v1  ;;  %1572 = vmax.xlane.f32.xlu1 %v5310_v22  ;;  %v1849_v62 = vmul.f32 0.2, %v1833_v49  ;;  %vm1841_vm5 = vcmp.gt.f32.partialorder %v1833_v49, 0.0 }
 0x41b   : > { %v1546_v56 = vmul.f32 0.2, %v1530_v24  ;;  %v1803_v34 = vpop.permute.xlu1 %1802  ;;  %vm1538_vm2 = vcmp.gt.f32.partialorder %v1530_v24, 0.0 }
 0x41c   : > { %v1834_v41 = vadd.f32 %v5300_v53, %v1803_v34  ;;  %v1857_v55 = vsel %vm1841_vm5, %v1833_v49, %v1849_v62 }
 0x41d   : > { %v1554_v61 = vsel %vm1538_vm2, %v1530_v24, %v1546_v56  ;;  %v5322_v63 = vsel %vm258_vm0, %v1857_v55, -1e+30  ;;  %v1512_v56 = vpop.permute.xlu0 %1511  ;;  %vm1845_vm2 = vcmp.gt.f32.partialorder %v1837_v23, 0.0 }
 0x41e   : > { %v5316_v13 = vsel %vm258_vm0, %v1554_v61, -1e+30  ;;  %v1850_v57 = vmul.f32 0.2, %v1834_v41  ;;  %vm1842_vm6 = vcmp.gt.f32.partialorder %v1834_v41, 0.0  ;;  %v1534_v55 = vadd.f32 %v5294_v2, %v1512_v56  ;;  %v3194_v56 = vld [vmem:[%s6252_s3 + $0x238] sm:$0xff] }
 0x41f   : > { %1570 = vmax.xlane.f32.xlu0 %v5316_v13 }
 0x420   : > { %v1504_v3 = vpop.permute.xlu1 %1503  ;;  %v1858_v24 = vsel %vm1842_vm6, %v1834_v41, %v1850_v57  ;;  %v1550_v20 = vmul.f32 0.2, %v1534_v55  ;;  %vm1542_vm13 = vcmp.gt.f32.partialorder %v1534_v55, 0.0 }
 0x421   : > { %v1532_v5 = vadd.f32 %v5294_v2, %v1504_v3  ;;  %v5332_v62 = vsel %vm259_vm3, %v1858_v24, -1e+30  ;;  %v3193_v24 = vld [vmem:[%s6252_s3 + $0x230] sm:$0xff] }
 0x423   : > { %v1548_v1 = vmul.f32 0.2, %v1532_v5  ;;  %1873 = vmax.xlane.f32.xlu0 %v5322_v63  ;;  %vm1540_vm9 = vcmp.gt.f32.partialorder %v1532_v5, 0.0 }
 0x424   : > { %v1508_v34 = vpop.permute.xlu1 %1507 }
 0x425   : > { %v1533_v61 = vadd.f32 %v5294_v2, %v1508_v34  ;;  %v1556_v58 = vsel %vm1540_vm9, %v1532_v5, %v1548_v1  ;;  %v3206_v1 = vld [vmem:[%s6252_s3 + $0x290] sm:$0xff] }
 0x426   : > { %v5328_v49 = vsel %vm260_vm4, %v1556_v58, -1e+30  ;;  %v3207_v58 = vld [vmem:[%s6252_s3 + $0x298] sm:$0xff] }
 0x427   : > { %v1549_v3 = vmul.f32 0.2, %v1533_v61  ;;  %1574 = vmax.xlane.f32.xlu1 %v5328_v49  ;;  %1875 = vmax.xlane.f32.xlu0 %v5332_v62  ;;  %vm1541_vm10 = vcmp.gt.f32.partialorder %v1533_v61, 0.0  ;;  %v3973_v5 = vpack.c.bf16 %v3207_v58, %v3206_v1  ;;  %v3208_v58 = vld [vmem:[%s6252_s3 + $0x2a0] sm:$0xff] }
 0x429   : > { %v1807_v41 = vpop.permute.xlu1 %1806  ;;  %v1557_v57 = vsel %vm1541_vm10, %v1533_v61, %v1549_v3  ;;  %3974 = vmatprep.subr.bf16.mxu1 %v3973_v5  ;;  %v3949_v61 = vpack.c.bf16 %v3194_v56, %v3193_v24  ;;  %v1558_v56 = vsel %vm1542_vm13, %v1534_v55, %v1550_v20  ;;  %v3210_v20 = vld [vmem:[%s6252_s3 + $0x2b0] sm:$0xff]  ;;  %v3211_v55 = vld [vmem:[%s6252_s3 + $0x2b8] sm:$0xff] }
 0x42a   : > { %v1835_v34 = vadd.f32 %v5300_v53, %v1807_v41  ;;  %v5352_v4 = vsel %vm261_vm7, %v1557_v57, -1e+30  ;;  %3976 = vmatpush3.bf16.msra.mxu1 %v3973_v5  ;;  %v3209_v41 = vld [vmem:[%s6252_s3 + $0x2a8] sm:$0xff]  ;;  %v3981_v12 = vpack.c.bf16 %v3211_v55, %v3210_v20 }
 0x42b   : > { %1576 = vmax.xlane.f32.xlu0 %v5352_v4  ;;  %3950 = vmatprep.subr.bf16.mxu0 %v3949_v61  ;;  %v3977_v5 = vpack.c.bf16 %v3209_v41, %v3208_v58 }
 0x42c   : > { %v1851_v3 = vmul.f32 0.2, %v1835_v34  ;;  %vm1843_vm14 = vcmp.gt.f32.partialorder %v1835_v34, 0.0  ;;  %3952 = vmatpush3.bf16.msra.mxu0 %v3949_v61  ;;  %v3197_v61 = vld [vmem:[%s6252_s3 + $0x250] sm:$0xff] }
 0x42d   : > { %v1811_v1 = vpop.permute.xlu1 %1810  ;;  %3978 = vmatprep.subr.bf16.mxu1 %v3977_v5  ;;  %3954 = vmatprep.subr.bf16.mxu0 %v3953_v17 }
 0x42e   : > { %v1836_v57 = vadd.f32 %v5300_v53, %v1811_v1  ;;  %v1859_v24 = vsel %vm1843_vm14, %v1835_v34, %v1851_v3  ;;  %v5382_v34 = vsel %vm262_vm8, %v1558_v56, -1e+30  ;;  %3980 = vmatpush3.bf16.msra.mxu1 %v3977_v5  ;;  %v3198_v3 = vld [vmem:[%s6252_s3 + $0x258] sm:$0xff]  ;;  %v1861_v5 = vsel %vm1845_vm2, %v1837_v23, %v1853_v50  ;;  %v3199_v50 = vld [vmem:[%s6252_s3 + $0x260] sm:$0xff]  ;;  %v3200_v23 = vld [vmem:[%s6252_s3 + $0x268] sm:$0xff] }
 0x42f   : > { %v5371_v7 = vsel %vm260_vm4, %v1859_v24, -1e+30  ;;  %v3957_v41 = vpack.c.bf16 %v3198_v3, %v3197_v61  ;;  %v1524_v24 = vpop.permute.xlu0 %1523  ;;  %3982 = vmatprep.subr.bf16.mxu1 %v3981_v12  ;;  %v5413_v3 = vsel %vm262_vm8, %v1861_v5, -1e+30  ;;  %v3215_v5 = vld [vmem:[%s6252_s3 + $0x2d8] sm:$0xff] }
 0x430   : > { %v1852_v15 = vmul.f32 0.2, %v1836_v57  ;;  %1877 = vmax.xlane.f32.xlu1 %v5371_v7  ;;  %vm1844_vm1 = vcmp.gt.f32.partialorder %v1836_v57, 0.0  ;;  %3956 = vmatpush3.bf16.msra.mxu0 %v3953_v17  ;;  %v3213_v17 = vld [vmem:[%s6252_s3 + $0x2c8] sm:$0xff]  ;;  %v1537_v20 = vadd.f32 %v5294_v2, %v1524_v24 }
 0x431   : > { %3958 = vmatprep.subr.bf16.mxu0 %v3957_v41 }
 0x432   : > { %v1516_v1 = vpop.permute.xlu1 %1515  ;;  %v1860_v58 = vsel %vm1844_vm1, %v1836_v57, %v1852_v15  ;;  %v3212_v15 = vld [vmem:[%s6252_s3 + $0x2c0] sm:$0xff]  ;;  %3984 = vmatpush3.bf16.msra.mxu1 %v3981_v12  ;;  %vm1545_vm9 = vcmp.gt.f32.partialorder %v1537_v20, 0.0 }
 0x433   : > { %v1535_v19 = vadd.f32 %v5294_v2, %v1516_v1  ;;  %v5393_v56 = vsel %vm261_vm7, %v1860_v58, -1e+30  ;;  %v3985_v55 = vpack.c.bf16 %v3213_v17, %v3212_v15  ;;  %v3961_v58 = vpack.c.bf16 %v3200_v23, %v3199_v50  ;;  %v2102_v24 = vpop.permute.xlu0 %2101  ;;  %v3214_v15 = vld [vmem:[%s6252_s3 + $0x2d0] sm:$0xff] }
 0x434   : > { %1879 = vmax.xlane.f32.xlu0 %v5393_v56  ;;  %1578 = vmax.xlane.f32.xlu1 %v5382_v34  ;;  %v3201_v17 = vld [vmem:[%s6252_s3 + $0x270] sm:$0xff]  ;;  %v1553_v50 = vmul.f32 0.2, %v1537_v20 }
 0x435   : > { %v1551_v57 = vmul.f32 0.2, %v1535_v19  ;;  %vm1543_vm5 = vcmp.gt.f32.partialorder %v1535_v19, 0.0  ;;  %3960 = vmatpush3.bf16.msra.mxu0 %v3957_v41  ;;  %3986 = vmatprep.subr.bf16.mxu1 %v3985_v55 }
 0x436   : > { %3962 = vmatprep.subr.bf16.mxu0 %v3961_v58  ;;  %3988 = vmatpush3.bf16.msra.mxu1 %v3985_v55  ;;  %v3217_v55 = vld [vmem:[%s6252_s3 + $0x2e8] sm:$0xff] }
 0x437   : > { %v1819_v61 = vpop.permute.xlu1 %1818  ;;  %v1559_v1 = vsel %vm1543_vm5, %v1535_v19, %v1551_v57  ;;  %v3989_v19 = vpack.c.bf16 %v3215_v5, %v3214_v15  ;;  %v3202_v57 = vld [vmem:[%s6252_s3 + $0x278] sm:$0xff]  ;;  %v3993_v30 = vpack.c.bf16 %v3217_v55, %v3216_v9 }
 0x438   : > { %v1838_v12 = vadd.f32 %v5300_v53, %v1819_v61  ;;  %1881 = vmax.xlane.f32.xlu1 %v5413_v3  ;;  %v5419_v41 = vsel %vm263_vm12, %v1559_v1, -1e+30  ;;  %v3965_v61 = vpack.c.bf16 %v3202_v57, %v3201_v17  ;;  %v5437_v1 = vld [vmem:[%s6250_s1 + $0x6] ss:$0 sm:$0xff]  ;;  %v1561_v57 = vsel %vm1545_vm9, %v1537_v20, %v1553_v50 }
 0x439   : > { %1580 = vmax.xlane.f32.xlu0 %v5419_v41  ;;  %3964 = vmatpush3.bf16.msra.mxu0 %v3961_v58  ;;  %v5462_v20 = vsel %vm265_vm15, %v1561_v57, -1e+30 }
 0x43a   : > { %v1854_v23 = vmul.f32 0.2, %v1838_v12  ;;  %vm1846_vm6 = vcmp.gt.f32.partialorder %v1838_v12, 0.0  ;;  %3990 = vmatprep.subr.bf16.mxu1 %v3989_v19  ;;  %3966 = vmatprep.subr.bf16.mxu0 %v3965_v61 }
 0x43b   : > { %3992 = vmatpush3.bf16.msra.mxu1 %v3989_v19 }
 0x43c   : > { %v1520_v15 = vpop.permute.xlu1 %1519  ;;  %v1862_v5 = vsel %vm1846_vm6, %v1838_v12, %v1854_v23  ;;  %v2136_v12 = vadd.f32 %v5437_v1, %v2102_v24  ;;  %v5452_v23 = vpop.permute.xlu0 %2117  ;;  %3994 = vmatprep.subr.bf16.mxu1 %v3993_v30 }
 0x43d   : > { %v1536_v58 = vadd.f32 %v5294_v2, %v1520_v15  ;;  %v5448_v17 = vsel %vm263_vm12, %v1862_v5, -1e+30  ;;  %3968 = vmatpush3.bf16.msra.mxu0 %v3965_v61  ;;  %v3218_v2 = vld [vmem:[%s6252_s3 + $0x2f0] sm:$0xff]  ;;  %v3219_v15 = vld [vmem:[%s6252_s3 + $0x2f8] sm:$0xff] }
 0x43e   : > { %1883 = vmax.xlane.f32.xlu0 %v5448_v17  ;;  %v3997_v19 = vpack.c.bf16 %v3219_v15, %v3218_v2  ;;  %v2152_v61 = vmul.f32 0.2, %v2136_v12  ;;  %vm2144_vm13 = vcmp.gt.f32.partialorder %v2136_v12, 0.0 }
 0x43f   : > { %v1552_v52 = vmul.f32 0.2, %v1536_v58  ;;  %vm1544_vm10 = vcmp.gt.f32.partialorder %v1536_v58, 0.0  ;;  %3996 = vmatpush3.bf16.msra.mxu1 %v3993_v30 }
 0x440   : > { %3998 = vmatprep.subr.bf16.mxu1 %v3997_v19 }
 0x441   : > { %v1823_v5 = vpop.permute.xlu1 %1822  ;;  %v1560_v24 = vsel %vm1544_vm10, %v1536_v58, %v1552_v52  ;;  %v5474_v52 = vld [vmem:[%s6250_s1 + $0x7] ss:$0 sm:$0xff]  ;;  %v2409_v58 = vpop.permute.xlu0 %2408 }
 0x442   : > { %v1839_v9 = vadd.f32 %v5300_v53, %v1823_v5  ;;  %1584 = vmax.xlane.f32.xlu0 %v5462_v20  ;;  %v5468_v50 = vsel %vm264_vm11, %v1560_v24, -1e+30  ;;  %v2160_v5 = vsel %vm2144_vm13, %v2136_v12, %v2152_v61  ;;  %v2440_v10 = vadd.f32 %v5474_v52, %v2409_v58 }
 0x443   : > { %1582 = vmax.xlane.f32.xlu1 %v5468_v50  ;;  %4000 = vmatpush3.bf16.msra.mxu1 %v3997_v19 }
 0x444   : > { %v1855_v55 = vmul.f32 0.2, %v1839_v9  ;;  %vm1847_vm14 = vcmp.gt.f32.partialorder %v1839_v9, 0.0  ;;  %vm2448_vm2 = vcmp.gt.f32.partialorder %v2440_v10, 0.0 }
 0x445   : > { %v1827_v57 = vpop.permute.xlu1 %1826  ;;  %v2413_v8 = vpop.permute.xlu0 %2412 }
 0x446   : > { %v1840_v2 = vadd.f32 %v5300_v53, %v1827_v57  ;;  %v1863_v15 = vsel %vm1847_vm14, %v1839_v9, %v1855_v55  ;;  %v5489_v53 = vsel %vm258_vm0, %v2160_v5, -1e+30  ;;  %v2456_v55 = vmul.f32 0.2, %v2440_v10  ;;  %v3221_v57 = vld [vmem:[%s6252_s3 + $0x300] sm:$0xff] }
 0x447   : > { %v5477_v24 = vpop.f32.mrb[10].mxu1  ;;  %v5481_v30 = vsel %vm264_vm11, %v1863_v15, -1e+30  ;;  %v2441_v47 = vadd.f32 %v5474_v52, %v2413_v8 }
 0x448   : > { %6331 = vst [vmem:[#allocation48_spill] sm:$0xff] %v5477_v24  ;;  %v1856_v45 = vmul.f32 0.2, %v1840_v2  ;;  %v5484_v6 = vpop.f32.mrb[11].mxu1  ;;  %1885 = vmax.xlane.f32.xlu1 %v5481_v30  ;;  %vm1848_vm1 = vcmp.gt.f32.partialorder %v1840_v2, 0.0 }
 0x449   : > { %6332 = vst [vmem:[#allocation49_spill] sm:$0xff] %v5484_v6 }
 0x44a   : > { %v2106_v12 = vpop.permute.xlu1 %2105  ;;  %v1864_v19 = vsel %vm1848_vm1, %v1840_v2, %v1856_v45  ;;  %v3222_v45 = vld [vmem:[%s6252_s3 + $0x308] sm:$0xff] }
 0x44b   : > { %v2137_v9 = vadd.f32 %v5437_v1, %v2106_v12  ;;  %v5494_v61 = vsel %vm265_vm15, %v1864_v19, -1e+30  ;;  %v2464_v12 = vsel %vm2448_vm2, %v2440_v10, %v2456_v55  ;;  %v5506_v19 = vpack.c.bf16 %v3222_v45, %v3221_v57  ;;  %v3239_v57 = vld [vmem:[%s6252_s3 + $0x388] sm:$0xff] }
 0x44c   : > { %1887 = vmax.xlane.f32.xlu0 %v5494_v61  ;;  %2176 = vmax.xlane.f32.xlu1 %v5489_v53  ;;  %v5520_v10 = vsel %vm259_vm3, %v2464_v12, -1e+30  ;;  %v2457_v45 = vmul.f32 0.2, %v2441_v47 }
 0x44d   : > { %v2153_v58 = vmul.f32 0.2, %v2137_v9  ;;  %vm2145_vm5 = vcmp.gt.f32.partialorder %v2137_v9, 0.0  ;;  %4002 = vmatprep.subr.bf16.mxu0 %v5506_v19 }
 0x44f   : > { %v2405_v2 = vpop.permute.xlu1 %2404  ;;  %v5504_v15 = vpop.f32.mrb[12].mxu1  ;;  %v2161_v5 = vsel %vm2145_vm5, %v2137_v9, %v2153_v58  ;;  %v3238_v58 = vld [vmem:[%s6252_s3 + $0x380] sm:$0xff]  ;;  %vm2947_vm5 = vcmask 392192  }
 0x450   : > { %6333 = vst [vmem:[#allocation50_spill] sm:$0xff] %v5504_v15  ;;  %v2439_v6 = vadd.f32 %v5474_v52, %v2405_v2  ;;  %v5509_v24 = vpop.f32.mrb[13].mxu1  ;;  %v5513_v31 = vsel %vm259_vm3, %v2161_v5, -1e+30  ;;  %v5534_v2 = vpack.c.bf16 %v3239_v57, %v3238_v58  ;;  %vm2449_vm3 = vcmp.gt.f32.partialorder %v2441_v47, 0.0 }
 0x451   : > { %6334 = vst [vmem:[#allocation51_spill] sm:$0xff] %v5509_v24  ;;  %2178 = vmax.xlane.f32.xlu0 %v5513_v31  ;;  %v2465_v58 = vsel %vm2449_vm3, %v2441_v47, %v2457_v45  ;;  %vm2965_vm3 = vcmask 654336  }
 0x452   : > { %v2455_v15 = vmul.f32 0.2, %v2439_v6  ;;  %vm2447_vm6 = vcmp.gt.f32.partialorder %v2439_v6, 0.0  ;;  %4034 = vmatprep.subr.bf16.mxu1 %v5534_v2 }
 0x454   : > { %v2110_v9 = vpop.permute.xlu1 %2109  ;;  %v2463_v55 = vsel %vm2447_vm6, %v2439_v6, %v2455_v15  ;;  %v2140_v6 = vadd.f32 %v5437_v1, %v5452_v23  ;;  %v5552_v23 = vsel %vm260_vm4, %v2465_v58, -1e+30  ;;  %vm2956_vm6 = vcmask 523264  }
 0x455   : > { %v2138_v8 = vadd.f32 %v5437_v1, %v2110_v9  ;;  %2481 = vmax.xlane.f32.xlu0 %v5520_v10  ;;  %v5532_v28 = vsel %vm258_vm0, %v2463_v55, -1e+30 }
 0x456   : > { %2479 = vmax.xlane.f32.xlu1 %v5532_v28  ;;  %v2156_v24 = vmul.f32 0.2, %v2140_v6  ;;  %vm2148_vm10 = vcmp.gt.f32.partialorder %v2140_v6, 0.0 }
 0x457   : > { %v2154_v15 = vmul.f32 0.2, %v2138_v8  ;;  %v5539_v5 = vpop.f32.mrb[14].mxu1  ;;  %vm2146_vm9 = vcmp.gt.f32.partialorder %v2138_v8, 0.0 }
 0x458   : > { %6335 = vst [vmem:[#allocation52_spill] sm:$0xff] %v5539_v5  ;;  %v2114_v12 = vpop.permute.xlu1 %2113  ;;  %v5542_v9 = vpop.f32.mrb[15].mxu1  ;;  %v2164_v45 = vsel %vm2148_vm10, %v2140_v6, %v2156_v24 }
 0x459   : > { %6336 = vst [vmem:[#allocation53_spill] sm:$0xff] %v5542_v9  ;;  %v2139_v21 = vadd.f32 %v5437_v1, %v2114_v12  ;;  %v2162_v55 = vsel %vm2146_vm9, %v2138_v8, %v2154_v15  ;;  %v2425_v8 = vpop.permute.xlu0 %2424  ;;  %vm2974_vm9 = vcmask 785408  }
 0x45a   : > { %v5547_v57 = vsel %vm260_vm4, %v2162_v55, -1e+30  ;;  %v2444_v26 = vadd.f32 %v5474_v52, %v2425_v8 }
 0x45b   : > { %v2155_v44 = vmul.f32 0.2, %v2139_v21  ;;  %2180 = vmax.xlane.f32.xlu1 %v5547_v57  ;;  %vm2147_vm0 = vcmp.gt.f32.partialorder %v2139_v21, 0.0 }
 0x45c   : > { %v2460_v24 = vmul.f32 0.2, %v2444_v26  ;;  %vm2452_vm14 = vcmp.gt.f32.partialorder %v2444_v26, 0.0 }
 0x45d   : > { %v2417_v5 = vpop.permute.xlu1 %2416  ;;  %v2163_v9 = vsel %vm2147_vm0, %v2139_v21, %v2155_v44  ;;  %v5564_v44 = vsel %vm262_vm8, %v2164_v45, -1e+30  ;;  %v2429_v43 = vpop.permute.xlu0 %2428  ;;  %vm2983_vm0 = vcmask 916480  }
 0x45e   : > { %v2442_v12 = vadd.f32 %v5474_v52, %v2417_v5  ;;  %v5557_v47 = vsel %vm261_vm7, %v2163_v9, -1e+30  ;;  %v2468_v36 = vsel %vm2452_vm14, %v2444_v26, %v2460_v24 }
 0x45f   : > { %2182 = vmax.xlane.f32.xlu0 %v5557_v47  ;;  %2483 = vmax.xlane.f32.xlu1 %v5552_v23  ;;  %v5582_v11 = vsel %vm263_vm12, %v2468_v36, -1e+30 }
 0x460   : > { %v2458_v15 = vmul.f32 0.2, %v2442_v12  ;;  %vm2450_vm13 = vcmp.gt.f32.partialorder %v2442_v12, 0.0 }
 0x462   : > { %v2122_v55 = vpop.permute.xlu1 %2121  ;;  %v2466_v5 = vsel %vm2450_vm13, %v2442_v12, %v2458_v15 }
 0x463   : > { %v2141_v21 = vadd.f32 %v5437_v1, %v2122_v55  ;;  %2184 = vmax.xlane.f32.xlu1 %v5564_v44  ;;  %v5570_v9 = vsel %vm261_vm7, %v2466_v5, -1e+30  ;;  %v2445_v55 = vadd.f32 %v5474_v52, %v2429_v43 }
 0x464   : > { %2485 = vmax.xlane.f32.xlu0 %v5570_v9 }
 0x465   : > { %v2157_v6 = vmul.f32 0.2, %v2141_v21  ;;  %vm2149_vm4 = vcmp.gt.f32.partialorder %v2141_v21, 0.0  ;;  %v2461_v26 = vmul.f32 0.2, %v2445_v55  ;;  %vm2453_vm2 = vcmp.gt.f32.partialorder %v2445_v55, 0.0 }
 0x467   : > { %v2421_v58 = vpop.permute.xlu1 %2420  ;;  %v2165_v8 = vsel %vm2149_vm4, %v2141_v21, %v2157_v6  ;;  %v2469_v39 = vsel %vm2453_vm2, %v2445_v55, %v2461_v26 }
 0x468   : > { %v2443_v45 = vadd.f32 %v5474_v52, %v2421_v58  ;;  %v5576_v12 = vsel %vm263_vm12, %v2165_v8, -1e+30 }
 0x469   : > { %2186 = vmax.xlane.f32.xlu0 %v5576_v12 }
 0x46a   : > { %v2459_v15 = vmul.f32 0.2, %v2443_v45  ;;  %vm2451_vm7 = vcmp.gt.f32.partialorder %v2443_v45, 0.0 }
 0x46c   : > { %v2126_v5 = vpop.permute.xlu1 %2125  ;;  %v2467_v21 = vsel %vm2451_vm7, %v2443_v45, %v2459_v15 }
 0x46d   : > { %v2142_v6 = vadd.f32 %v5437_v1, %v2126_v5  ;;  %2489 = vmax.xlane.f32.xlu0 %v5582_v11  ;;  %v5588_v58 = vsel %vm262_vm8, %v2467_v21, -1e+30 }
 0x46e   : > { %2487 = vmax.xlane.f32.xlu1 %v5588_v58 }
 0x46f   : > { %v2158_v24 = vmul.f32 0.2, %v2142_v6  ;;  %vm2150_vm1 = vcmp.gt.f32.partialorder %v2142_v6, 0.0 }
 0x470   : > { %v2130_v43 = vpop.permute.xlu1 %2129 }
 0x471   : > { %v2143_v48 = vadd.f32 %v5437_v1, %v2130_v43  ;;  %v2166_v8 = vsel %vm2150_vm1, %v2142_v6, %v2158_v24  ;;  %v5604_v1 = vsel %vm264_vm11, %v2469_v39, -1e+30 }
 0x472   : > { %v5594_v45 = vsel %vm264_vm11, %v2166_v8, -1e+30  ;;  %vm2929_vm11 = vcmask 130048  }
 0x473   : > { %v2159_v36 = vmul.f32 0.2, %v2143_v48  ;;  %2188 = vmax.xlane.f32.xlu1 %v5594_v45  ;;  %vm2151_vm12 = vcmp.gt.f32.partialorder %v2143_v48, 0.0 }
 0x475   : > { %v2433_v15 = vpop.permute.xlu1 %2432  ;;  %v2167_v5 = vsel %vm2151_vm12, %v2143_v48, %v2159_v36 }
 0x476   : > { %v2446_v21 = vadd.f32 %v5474_v52, %v2433_v15  ;;  %v5600_v60 = vsel %vm265_vm15, %v2167_v5, -1e+30 }
 0x477   : > { %2190 = vmax.xlane.f32.xlu0 %v5600_v60  ;;  %2491 = vmax.xlane.f32.xlu1 %v5604_v1 }
 0x478   : > { %v2462_v6 = vmul.f32 0.2, %v2446_v21  ;;  %vm2454_vm8 = vcmp.gt.f32.partialorder %v2446_v21, 0.0 }
 0x47a   : > { %v2470_v24 = vsel %vm2454_vm8, %v2446_v21, %v2462_v6 }
 0x47b   : > { %v5610_v55 = vsel %vm265_vm15, %v2470_v24, -1e+30  ;;  %vm2938_vm15 = vcmask 261120  }
 0x47c   : > { %2493 = vmax.xlane.f32.xlu0 %v5610_v55 }
 0x4a7   : > { %v1573_v52 = vpop.xlane.xlu1 %1572 }
 0x4a8   : > { %v1587_v26 = vsub.f32 %v5310_v22, %v1573_v52 }
 0x4aa   : > { %v1596_v43 = vmul.f32 1.442695, %v1587_v26 }
 0x4ac   : > { %4180 = vpow2.f32 %v1596_v43  ;;  %v1571_v51 = vpop.xlane.xlu0 %1570  ;;  %v3224_v43 = vld [vmem:[%s6252_s3 + $0x318] sm:$0xff] }
 0x4ad   : > { %v1586_v48 = vsub.f32 %v5316_v13, %v1571_v51 }
 0x4af   : > { %v1594_v8 = vmul.f32 1.442695, %v1586_v48 }
 0x4b0   : > { %v1874_v36 = vpop.xlane.xlu0 %1873 }
 0x4b1   : > { %4182 = vpow2.f32 %v1594_v8  ;;  %v1889_v39 = vsub.f32 %v5322_v63, %v1874_v36  ;;  %v3223_v63 = vld [vmem:[%s6252_s3 + $0x310] sm:$0xff] }
 0x4b2   : > { %v4005_v36 = vpack.c.bf16 %v3224_v43, %v3223_v63 }
 0x4b3   : > { %v1897_v15 = vmul.f32 1.442695, %v1889_v39  ;;  %v3225_v39 = vld [vmem:[%s6252_s3 + $0x320] sm:$0xff] }
 0x4b4   : > { %v1575_v5 = vpop.xlane.xlu1 %1574  ;;  %v1876_v0 = vpop.xlane.xlu0 %1875 }
 0x4b5   : > { %4184 = vpow2.f32 %v1897_v15  ;;  %v1588_v21 = vsub.f32 %v5328_v49, %v1575_v5  ;;  %v1890_v6 = vsub.f32 %v5332_v62, %v1876_v0  ;;  %v3226_v15 = vld [vmem:[%s6252_s3 + $0x328] sm:$0xff] }
 0x4b6   : > { %v4181_v24 = vpop.eup %4180 }
 0x4b7   : > { %v1598_v22 = vmul.f32 1.442695, %v1588_v21  ;;  %v1899_v52 = vmul.f32 1.442695, %v1890_v6  ;;  %1612 = vadd.xlane.f32.xlu0 %v4181_v24  ;;  %v1659_v8 = vmul.f32 %v5195_v25, %v4181_v24  ;;  %v4009_v24 = vpack.c.bf16 %v3226_v15, %v3225_v39  ;;  %v3242_v15 = vld [vmem:[%s6252_s3 + $0x3a0] sm:$0xff] }
 0x4b8   : > { %v1577_v26 = vpop.xlane.xlu0 %1576 }
 0x4b9   : > { %4186 = vpow2.f32 %v1598_v22  ;;  %v1589_v13 = vsub.f32 %v5352_v4, %v1577_v26  ;;  %v3240_v26 = vld [vmem:[%s6252_s3 + $0x390] sm:$0xff] }
 0x4ba   : > { %4188 = vpow2.f32 %v1899_v52 }
 0x4bb   : > { %v4183_v49 = vpop.eup %4182  ;;  %v1600_v51 = vmul.f32 1.442695, %v1589_v13 }
 0x4bc   : > { %1610 = vadd.xlane.f32.xlu1 %v4183_v49  ;;  %v1658_v62 = vmul.f32 %v5191_v59, %v4183_v49 }
 0x4bd   : > { %4190 = vpow2.f32 %v1600_v51  ;;  %v1878_v48 = vpop.xlane.xlu1 %1877 }
 0x4be   : > { %v1891_v4 = vsub.f32 %v5371_v7, %v1878_v48  ;;  %3665 = vmatprep.mubr.f32.mxu0 %v1658_v62 }
 0x4bf   : > { %v5634_v5 = vpop.eup %4184  ;;  %3666 = vmatmul.mubr.f32.vlgmr.msra.gmra.mrb[16].mxu0 %v1659_v8 }
 0x4c0   : > { %v1901_v0 = vmul.f32 1.442695, %v1891_v4  ;;  %v1961_v21 = vmul.f32 %v5191_v59, %v5634_v5  ;;  %4004 = vmatpush3.bf16.msra.mxu0 %v5506_v19  ;;  %v3241_v59 = vld [vmem:[%s6252_s3 + $0x398] sm:$0xff]  ;;  %v3227_v19 = vld [vmem:[%s6252_s3 + $0x330] sm:$0xff] }
 0x4c1   : > { %v1579_v6 = vpop.xlane.xlu1 %1578  ;;  %v1880_v7 = vpop.xlane.xlu0 %1879  ;;  %4006 = vmatprep.subr.bf16.mxu0 %v4005_v36  ;;  %v4037_v48 = vpack.c.bf16 %v3241_v59, %v3240_v26 }
 0x4c2   : > { %4192 = vpow2.f32 %v1901_v0  ;;  %v1590_v22 = vsub.f32 %v5382_v34, %v1579_v6  ;;  %v1892_v52 = vsub.f32 %v5393_v56, %v1880_v7  ;;  %3709 = vmatprep.mubr.f32.mxu1 %v1961_v21  ;;  %v3228_v34 = vld [vmem:[%s6252_s3 + $0x338] sm:$0xff]  ;;  %v3230_v0 = vld [vmem:[%s6252_s3 + $0x348] sm:$0xff] }
 0x4c3   : > { %v4187_v13 = vpop.eup %4186  ;;  %v4013_v39 = vpack.c.bf16 %v3228_v34, %v3227_v19  ;;  %v5690_v19 = vld [vmem:[%s4543_s14 + $0x10] sm:$0xff] }
 0x4c4   : > { %v5653_v63 = vpop.eup %4188  ;;  %v1602_v56 = vmul.f32 1.442695, %v1590_v22  ;;  %v1903_v43 = vmul.f32 1.442695, %v1892_v52  ;;  %1614 = vadd.xlane.f32.xlu1 %v4187_v13  ;;  %v1660_v49 = vmul.f32 %v5200_v18, %v4187_v13  ;;  %4008 = vmatpush3.bf16.msra.mxu0 %v4005_v36  ;;  %v3243_v18 = vld [vmem:[%s6252_s3 + $0x3a8] sm:$0xff]  ;;  %v3244_v52 = vld [vmem:[%s6252_s3 + $0x3b0] sm:$0xff] }
 0x4c5   : > { %v1882_v51 = vpop.xlane.xlu1 %1881  ;;  %v1962_v62 = vmul.f32 %v5195_v25, %v5653_v63  ;;  %4010 = vmatprep.subr.bf16.mxu0 %v4009_v24  ;;  %v4041_v22 = vpack.c.bf16 %v3243_v18, %v3242_v15  ;;  %v3234_v15 = vld [vmem:[%s6252_s3 + $0x368] sm:$0xff] }
 0x4c6   : > { %4194 = vpow2.f32 %v1602_v56  ;;  %v1893_v8 = vsub.f32 %v5413_v3, %v1882_v51  ;;  %3668 = vmatprep.mubr.f32.mxu0 %v1660_v49  ;;  %v1581_v4 = vpop.xlane.xlu0 %1580  ;;  %v3229_v3 = vld [vmem:[%s6252_s3 + $0x340] sm:$0xff] }
 0x4c7   : > { %v4191_v36 = vpop.eup %4190  ;;  %4196 = vpow2.f32 %v1903_v43  ;;  %3710 = vmatmul.mubr.f32.vlgmr.msra.gmra.mrb[16].mxu1 %v1962_v62  ;;  %v1591_v25 = vsub.f32 %v5419_v41, %v1581_v4  ;;  %v4017_v41 = vpack.c.bf16 %v3230_v0, %v3229_v3  ;;  %v3246_v62 = vld [vmem:[%s6252_s3 + $0x3c0] sm:$0xff]  ;;  %v5715_v0 = vld [vmem:[%s4543_s14 + $0x18] sm:$0xff] }
 0x4c8   : > { %v1905_v21 = vmul.f32 1.442695, %v1893_v8  ;;  %1616 = vadd.xlane.f32.xlu0 %v4191_v36  ;;  %v1661_v6 = vmul.f32 %v5204_v14, %v4191_v36  ;;  %4036 = vmatpush3.bf16.msra.mxu1 %v5534_v2  ;;  %v3245_v14 = vld [vmem:[%s6252_s3 + $0x3b8] sm:$0xff]  ;;  %v3231_v2 = vld [vmem:[%s6252_s3 + $0x350] sm:$0xff] }
 0x4c9   : > { %v1604_v7 = vmul.f32 1.442695, %v1591_v25  ;;  %4012 = vmatpush3.bf16.msra.mxu0 %v4009_v24  ;;  %4038 = vmatprep.subr.bf16.mxu1 %v4037_v48  ;;  %v3232_v24 = vld [vmem:[%s6252_s3 + $0x358] sm:$0xff]  ;;  %v4045_v43 = vpack.c.bf16 %v3245_v14, %v3244_v52  ;;  %v5711_v25 = vld [vmem:[%s4543_s14 + $0x20] sm:$0xff]  ;;  %v3235_v52 = vld [vmem:[%s6252_s3 + $0x370] sm:$0xff] }
 0x4ca   : > { %4198 = vpow2.f32 %v1905_v21  ;;  %3669 = vmatmul.mubr.f32.gmra.mrb[18].mxu0 %v1661_v6  ;;  %4014 = vmatprep.subr.bf16.mxu0 %v4013_v39  ;;  %v4021_v49 = vpack.c.bf16 %v3232_v24, %v3231_v2 }
 0x4cb   : > { %4200 = vpow2.f32 %v1604_v7  ;;  %v1884_v26 = vpop.xlane.xlu0 %1883  ;;  %v3248_v7 = vld [vmem:[%s6252_s3 + $0x3d0] sm:$0xff] }
 0x4cc   : > { %v5686_v59 = vpop.eup %4192  ;;  %v1894_v13 = vsub.f32 %v5448_v17, %v1884_v26  ;;  %4040 = vmatpush3.bf16.msra.mxu1 %v4037_v48  ;;  %v3247_v17 = vld [vmem:[%s6252_s3 + $0x3c8] sm:$0xff]  ;;  %v3236_v26 = vld [vmem:[%s6252_s3 + $0x378] sm:$0xff] }
 0x4cd   : > { %v1963_v34 = vmul.f32 %v5690_v19, %v5686_v59  ;;  %4016 = vmatpush3.bf16.msra.mxu0 %v4013_v39  ;;  %4042 = vmatprep.subr.bf16.mxu1 %v4041_v22  ;;  %v3233_v39 = vld [vmem:[%s6252_s3 + $0x360] sm:$0xff]  ;;  %v4049_v6 = vpack.c.bf16 %v3247_v17, %v3246_v62  ;;  %v4029_v17 = vpack.c.bf16 %v3236_v26, %v3235_v52 }
 0x4ce   : > { %v1907_v56 = vmul.f32 1.442695, %v1894_v13  ;;  %4018 = vmatprep.subr.bf16.mxu0 %v4017_v41 }
 0x4cf   : > { %3712 = vmatprep.mubr.f32.mxu1 %v1963_v34  ;;  %v1585_v51 = vpop.xlane.xlu0 %1584 }
 0x4d0   : > { %v4195_v48 = vpop.eup %4194  ;;  %4202 = vpow2.f32 %v1907_v56  ;;  %v1593_v8 = vsub.f32 %v5462_v20, %v1585_v51  ;;  %v1583_v4 = vpop.xlane.xlu1 %1582  ;;  %4044 = vmatpush3.bf16.msra.mxu1 %v4041_v22  ;;  %v5737_v51 = vld [vmem:[%s4543_s14 + $0x28] sm:$0xff] }
 0x4d1   : > { %v5707_v18 = vpop.eup %4196  ;;  %v1592_v36 = vsub.f32 %v5468_v50, %v1583_v4  ;;  %1618 = vadd.xlane.f32.xlu1 %v4195_v48  ;;  %v1662_v3 = vmul.f32 %v5711_v25, %v4195_v48  ;;  %4020 = vmatpush3.bf16.msra.mxu0 %v4017_v41  ;;  %v3249_v50 = vld [vmem:[%s6252_s3 + $0x3d8] sm:$0xff]  ;;  %v4025_v41 = vpack.c.bf16 %v3234_v15, %v3233_v39 }
 0x4d2   : > { %v1608_v20 = vmul.f32 1.442695, %v1593_v8  ;;  %v1964_v21 = vmul.f32 %v5715_v0, %v5707_v18  ;;  %4046 = vmatprep.subr.bf16.mxu1 %v4045_v43  ;;  %4022 = vmatprep.subr.bf16.mxu0 %v4021_v49  ;;  %v4053_v34 = vpack.c.bf16 %v3249_v50, %v3248_v7  ;;  %v3250_v8 = vld [vmem:[%s6252_s3 + $0x3e0] sm:$0xff] }
 0x4d3   : > { %v1606_v22 = vmul.f32 1.442695, %v1592_v36  ;;  %3671 = vmatprep.mubr.f32.mxu0 %v1662_v3 }
 0x4d4   : > { %v5731_v14 = vpop.eup %4198  ;;  %4204 = vpow2.f32 %v1608_v20  ;;  %3713 = vmatmul.mubr.f32.gmra.mrb[18].mxu1 %v1964_v21 }
 0x4d5   : > { %v4201_v2 = vpop.eup %4200  ;;  %4206 = vpow2.f32 %v1606_v22  ;;  %v1886_v24 = vpop.xlane.xlu1 %1885  ;;  %v1965_v13 = vmul.f32 %v5711_v25, %v5731_v14  ;;  %4048 = vmatpush3.bf16.msra.mxu1 %v4045_v43  ;;  %4024 = vmatpush3.bf16.msra.mxu0 %v4021_v49  ;;  %v3251_v43 = vld [vmem:[%s6252_s3 + $0x3e8] sm:$0xff] }
 0x4d6   : > { %v1895_v56 = vsub.f32 %v5481_v30, %v1886_v24  ;;  %1620 = vadd.xlane.f32.xlu0 %v4201_v2  ;;  %v1663_v62 = vmul.f32 %v5737_v51, %v4201_v2  ;;  %4050 = vmatprep.subr.bf16.mxu1 %v4049_v6  ;;  %v4057_v3 = vpack.c.bf16 %v3251_v43, %v3250_v8  ;;  %v5761_v24 = vld [vmem:[%s4543_s14 + $0x38] sm:$0xff] }
 0x4d7   : > { %3715 = vmatprep.mubr.f32.mxu1 %v1965_v13  ;;  %4026 = vmatprep.subr.bf16.mxu0 %v4025_v41 }
 0x4d8   : > { %v1909_v48 = vmul.f32 1.442695, %v1895_v56  ;;  %3672 = vmatmul.mubr.f32.gmra.mrb[20].mxu0 %v1663_v62 }
 0x4d9   : > { %v2177_v30 = vpop.xlane.xlu1 %2176  ;;  %v1888_v49 = vpop.xlane.xlu0 %1887  ;;  %4052 = vmatpush3.bf16.msra.mxu1 %v4049_v6  ;;  %4028 = vmatpush3.bf16.msra.mxu0 %v4025_v41  ;;  %v3252_v6 = vld [vmem:[%s6252_s3 + $0x3f0] sm:$0xff] }
 0x4da   : > { %v4203_v4 = vpop.eup %4202  ;;  %4208 = vpow2.f32 %v1909_v48  ;;  %v2192_v39 = vsub.f32 %v5489_v53, %v2177_v30  ;;  %v1896_v15 = vsub.f32 %v5494_v61, %v1888_v49  ;;  %4054 = vmatprep.subr.bf16.mxu1 %v4053_v34  ;;  %4030 = vmatprep.subr.bf16.mxu0 %v4029_v17  ;;  %v3253_v53 = vld [vmem:[%s6252_s3 + $0x3f8] sm:$0xff]  ;;  %v5757_v41 = vld [vmem:[%s4543_s14 + $0x30] sm:$0xff] }
 0x4db   : > { %v1966_v36 = vmul.f32 %v5737_v51, %v4203_v4  ;;  %v4061_v26 = vpack.c.bf16 %v3253_v53, %v3252_v6 }
 0x4dc   : > { %v2200_v20 = vmul.f32 1.442695, %v2192_v39  ;;  %v1911_v21 = vmul.f32 1.442695, %v1896_v15 }
 0x4dd   : > { %3716 = vmatmul.mubr.f32.gmra.mrb[20].mxu1 %v1966_v36  ;;  %4032 = vmatpush3.bf16.msra.mxu0 %v4029_v17 }
 0x4de   : > { %v4205_v61 = vpop.eup %4204  ;;  %4210 = vpow2.f32 %v2200_v20  ;;  %v2179_v7 = vpop.xlane.xlu0 %2178  ;;  %4056 = vmatpush3.bf16.msra.mxu1 %v4053_v34 }
 0x4df   : > { %v4207_v50 = vpop.eup %4206  ;;  %4212 = vpow2.f32 %v1911_v21  ;;  %v2193_v22 = vsub.f32 %v5513_v31, %v2179_v7  ;;  %1624 = vadd.xlane.f32.xlu0 %v4205_v61  ;;  %4058 = vmatprep.subr.bf16.mxu1 %v4057_v3  ;;  %v1665_v13 = vmul.f32 %v5761_v24, %v4205_v61  ;;  %v4411_v21 = vld [vmem:[%s4543_s14 + $0x8] sm:$0xff] }
 0x4e0   : > { %1622 = vadd.xlane.f32.xlu1 %v4207_v50  ;;  %v1664_v52 = vmul.f32 %v5757_v41, %v4207_v50 }
 0x4e1   : > { %v2202_v2 = vmul.f32 1.442695, %v2193_v22 }
 0x4e2   : > { %3674 = vmatprep.mubr.f32.mxu0 %v1664_v52  ;;  %v2482_v56 = vpop.xlane.xlu0 %2481  ;;  %4060 = vmatpush3.bf16.msra.mxu1 %v4057_v3 }
 0x4e3   : > { %4214 = vpow2.f32 %v2202_v2  ;;  %v2496_v34 = vsub.f32 %v5520_v10, %v2482_v56  ;;  %v2480_v31 = vpop.xlane.xlu1 %2479  ;;  %1915 = vadd.xlane.f32.xlu0 %v5653_v63  ;;  %3675 = vmatmul.mubr.f32.gmra.mrb[22].mxu0 %v1665_v13 }
 0x4e4   : > { %v4209_v62 = vpop.eup %4208  ;;  %v2495_v17 = vsub.f32 %v5532_v28, %v2480_v31  ;;  %1913 = vadd.xlane.f32.xlu1 %v5634_v5  ;;  %4062 = vmatprep.subr.bf16.mxu1 %v4061_v26  ;;  %v4410_v5 = vld [vmem:[%s4543_s14] sm:$0xff]  ;;  %s4428_s14 = smov 16  }
 0x4e5   : > { %v2505_v48 = vmul.f32 1.442695, %v2496_v34  ;;  %v1967_v8 = vmul.f32 %v5757_v41, %v4209_v62 }
 0x4e6   : > { %v2503_v43 = vmul.f32 1.442695, %v2495_v17  ;;  %4064 = vmatpush3.bf16.msra.mxu1 %v4061_v26 }
 0x4e7   : > { %4216 = vpow2.f32 %v2505_v48  ;;  %3718 = vmatprep.mubr.f32.mxu1 %v1967_v8  ;;  %1919 = vadd.xlane.f32.xlu0 %v5707_v18 }
 0x4e8   : > { %v4211_v10 = vpop.eup %4210  ;;  %4218 = vpow2.f32 %v2503_v43  ;;  %v2181_v63 = vpop.xlane.xlu1 %2180  ;;  %1917 = vadd.xlane.f32.xlu1 %v5686_v59 }
 0x4e9   : > { %v4213_v30 = vpop.eup %4212  ;;  %v2194_v28 = vsub.f32 %v5547_v57, %v2181_v63  ;;  %v2264_v49 = vmul.f32 %v4410_v5, %v4211_v10 }
 0x4ea   : > { %v1968_v39 = vmul.f32 %v5761_v24, %v4213_v30 }
 0x4eb   : > { %v2204_v15 = vmul.f32 1.442695, %v2194_v28  ;;  %1923 = vadd.xlane.f32.xlu0 %v4203_v4  ;;  %3753 = vmatprep.mubr.f32.mxu0 %v2264_v49 }
 0x4ec   : > { %3719 = vmatmul.mubr.f32.gmra.mrb[22].mxu1 %v1968_v39  ;;  %v2484_v36 = vpop.xlane.xlu1 %2483  ;;  %1921 = vadd.xlane.f32.xlu1 %v5731_v14  ;;  %v2183_v18 = vpop.xlane.xlu0 %2182 }
 0x4ed   : > { %v4215_v3 = vpop.eup %4214  ;;  %4220 = vpow2.f32 %v2204_v15  ;;  %v2497_v59 = vsub.f32 %v5552_v23, %v2484_v36  ;;  %v2195_v20 = vsub.f32 %v5557_v47, %v2183_v18 }
 0x4ee   : > { %v2265_v57 = vmul.f32 %v4411_v21, %v4215_v3 }
 0x4ef   : > { %v2507_v6 = vmul.f32 1.442695, %v2497_v59  ;;  %v2206_v53 = vmul.f32 1.442695, %v2195_v20  ;;  %1927 = vadd.xlane.f32.xlu0 %v4213_v30 }
 0x4f0   : > { %v2185_v61 = vpop.xlane.xlu1 %2184  ;;  %1925 = vadd.xlane.f32.xlu1 %v4209_v62  ;;  %3754 = vmatmul.mubr.f32.vlgmr.msra.gmra.mrb[24].mxu0 %v2265_v57 }
 0x4f1   : > { %v5778_v4 = vpop.eup %4216  ;;  %4222 = vpow2.f32 %v2507_v6  ;;  %v2196_v14 = vsub.f32 %v5564_v44, %v2185_v61  ;;  %v2486_v7 = vpop.xlane.xlu0 %2485 }
 0x4f2   : > { %v5781_v50 = vpop.eup %4218  ;;  %4224 = vpow2.f32 %v2206_v53  ;;  %v2498_v23 = vsub.f32 %v5570_v9, %v2486_v7  ;;  %v2568_v26 = vmul.f32 %v4411_v21, %v5778_v4 }
 0x4f3   : > { %v2208_v47 = vmul.f32 1.442695, %v2196_v14  ;;  %2218 = vadd.xlane.f32.xlu0 %v4215_v3  ;;  %v2567_v22 = vmul.f32 %v4410_v5, %v5781_v50 }
 0x4f4   : > { %v2509_v52 = vmul.f32 1.442695, %v2498_v23  ;;  %2216 = vadd.xlane.f32.xlu1 %v4211_v10 }
 0x4f5   : > { %4226 = vpow2.f32 %v2208_v47  ;;  %3797 = vmatprep.mubr.f32.mxu1 %v2567_v22 }
 0x4f6   : > { %4228 = vpow2.f32 %v2509_v52  ;;  %3798 = vmatmul.mubr.f32.vlgmr.msra.gmra.mrb[24].mxu1 %v2568_v26  ;;  %v2187_v2 = vpop.xlane.xlu0 %2186 }
 0x4f7   : > { %v4221_v44 = vpop.eup %4220  ;;  %v2197_v13 = vsub.f32 %v5576_v12, %v2187_v2 }
 0x4f8   : > { %2220 = vadd.xlane.f32.xlu1 %v4221_v44  ;;  %v2266_v56 = vmul.f32 %v5690_v19, %v4221_v44 }
 0x4f9   : > { %v2210_v9 = vmul.f32 1.442695, %v2197_v13 }
 0x4fa   : > { %3756 = vmatprep.mubr.f32.mxu0 %v2266_v56  ;;  %v2490_v34 = vpop.xlane.xlu0 %2489 }
 0x4fb   : > { %v4223_v31 = vpop.eup %4222  ;;  %4230 = vpow2.f32 %v2210_v9  ;;  %v2500_v62 = vsub.f32 %v5582_v11, %v2490_v34  ;;  %v2488_v17 = vpop.xlane.xlu1 %2487 }
 0x4fc   : > { %v4225_v48 = vpop.eup %4224  ;;  %v2499_v8 = vsub.f32 %v5588_v58, %v2488_v17  ;;  %v2569_v43 = vmul.f32 %v5690_v19, %v4223_v31 }
 0x4fd   : > { %v2513_v10 = vmul.f32 1.442695, %v2500_v62  ;;  %2222 = vadd.xlane.f32.xlu0 %v4225_v48  ;;  %v2267_v12 = vmul.f32 %v5715_v0, %v4225_v48  ;;  %v6337_v48 = vld [vmem:[#allocation25_spill] sm:$0xff] }
 0x4fe   : > { %v2511_v63 = vmul.f32 1.442695, %v2499_v8  ;;  %3800 = vmatprep.mubr.f32.mxu1 %v2569_v43  ;;  %v6338_v43 = vld [vmem:[#allocation12_spill] sm:$0xff] }
 0x4ff   : > { %v4227_v30 = vpop.eup %4226  ;;  %4232 = vpow2.f32 %v2513_v10  ;;  %3757 = vmatmul.mubr.f32.gmra.mrb[26].mxu0 %v2267_v12 }
 0x500   : > { %v4229_v28 = vpop.eup %4228  ;;  %4234 = vpow2.f32 %v2511_v63  ;;  %v2189_v5 = vpop.xlane.xlu1 %2188  ;;  %2224 = vadd.xlane.f32.xlu1 %v4227_v30  ;;  %v2268_v11 = vmul.f32 %v5711_v25, %v4227_v30 }
 0x501   : > { %v2198_v49 = vsub.f32 %v5594_v45, %v2189_v5  ;;  %v2570_v58 = vmul.f32 %v5715_v0, %v4229_v28 }
 0x502   : > { %3759 = vmatprep.mubr.f32.mxu0 %v2268_v11 }
 0x503   : > { %v2212_v19 = vmul.f32 1.442695, %v2198_v49  ;;  %3801 = vmatmul.mubr.f32.gmra.mrb[26].mxu1 %v2570_v58  ;;  %v6341_v58 = vld [vmem:[#allocation11_spill] sm:$0xff] }
 0x504   : > { %v2492_v39 = vpop.xlane.xlu1 %2491  ;;  %v2191_v15 = vpop.xlane.xlu0 %2190 }
 0x505   : > { %v4231_v36 = vpop.eup %4230  ;;  %4236 = vpow2.f32 %v2212_v19  ;;  %v2501_v18 = vsub.f32 %v5604_v1, %v2492_v39  ;;  %v2199_v3 = vsub.f32 %v5600_v60, %v2191_v15  ;;  %v6342_v39 = vld [vmem:[#allocation29_spill] sm:$0xff] }
 0x506   : > { %2226 = vadd.xlane.f32.xlu0 %v4231_v36  ;;  %v2269_v59 = vmul.f32 %v5737_v51, %v4231_v36  ;;  %v6343_v36 = vld [vmem:[#allocation10_spill] sm:$0xff] }
 0x507   : > { %v2515_v20 = vmul.f32 1.442695, %v2501_v18  ;;  %v2214_v21 = vmul.f32 1.442695, %v2199_v3 }
 0x508   : > { %3760 = vmatmul.mubr.f32.gmra.mrb[28].mxu0 %v2269_v59 }
 0x509   : > { %v4233_v45 = vpop.eup %4232  ;;  %4238 = vpow2.f32 %v2515_v20  ;;  %v2494_v0 = vpop.xlane.xlu0 %2493  ;;  %v6344_v20 = vld [vmem:[#allocation28_spill] sm:$0xff] }
 0x50a   : > { %v4235_v57 = vpop.eup %4234  ;;  %4240 = vpow2.f32 %v2214_v21  ;;  %v2502_v6 = vsub.f32 %v5610_v55, %v2494_v0  ;;  %v2572_v1 = vmul.f32 %v5737_v51, %v4233_v45 }
 0x50b   : > { %v2571_v53 = vmul.f32 %v5711_v25, %v4235_v57 }
 0x50c   : > { %v2517_v61 = vmul.f32 1.442695, %v2502_v6 }
 0x50d   : > { %3803 = vmatprep.mubr.f32.mxu1 %v2571_v53  ;;  %v6346_v53 = vld [vmem:[#allocation38_spill] sm:$0xff] }
 0x50e   : > { %4242 = vpow2.f32 %v2517_v61  ;;  %3804 = vmatmul.mubr.f32.gmra.mrb[28].mxu1 %v2572_v1  ;;  %v6347_v61 = vld [vmem:[#allocation14_spill] sm:$0xff] }
 0x50f   : > { %v4237_v60 = vpop.eup %4236  ;;  %4244 = vrcp.f32 %v5066_v29 }
 0x510   : > { %2228 = vadd.xlane.f32.xlu1 %v4237_v60  ;;  %v2270_v14 = vmul.f32 %v5757_v41, %v4237_v60  ;;  %4246 = vrcp.f32 %v5070_v35 }
 0x511   : > { %4248 = vrcp.f32 %v5068_v32 }
 0x512   : > { %3762 = vmatprep.mubr.f32.mxu0 %v2270_v14  ;;  %4250 = vrcp.f32 %v5064_v27 }
 0x513   : > { %v4239_v7 = vpop.eup %4238  ;;  %4252 = vrcp.f32 %v5072_v33 }
 0x514   : > { %v4241_v23 = vpop.eup %4240  ;;  %2519 = vadd.xlane.f32.xlu1 %v5781_v50  ;;  %v2573_v47 = vmul.f32 %v5757_v41, %v4239_v7  ;;  %4254 = vrcp.f32 %v5074_v37 }
 0x515   : > { %2230 = vadd.xlane.f32.xlu0 %v4241_v23  ;;  %v2271_v55 = vmul.f32 %v5761_v24, %v4241_v23  ;;  %4256 = vrcp.f32 %v5076_v46  ;;  %v6348_v23 = vld [vmem:[#allocation39_spill] sm:$0xff] }
 0x516   : > { %3806 = vmatprep.mubr.f32.mxu1 %v2573_v47  ;;  %4258 = vrcp.f32 %v5078_v38  ;;  %v6349_v47 = vld [vmem:[#allocation15_spill] sm:$0xff] }
 0x517   : > { %3763 = vmatmul.mubr.f32.gmra.mrb[30].mxu0 %v2271_v55  ;;  %4260 = vrcp.f32 %v5082_v42 }
 0x518   : > { %v4243_v25 = vpop.eup %4242  ;;  %2523 = vadd.xlane.f32.xlu1 %v4223_v31  ;;  %4262 = vrcp.f32 %v5080_v40 }
 0x519   : > { %2521 = vadd.xlane.f32.xlu0 %v5778_v4  ;;  %v2574_v51 = vmul.f32 %v5761_v24, %v4243_v25  ;;  %v4245_v50 = vpop.eup %4244  ;;  %4264 = vrcp.f32 %v5084_v54 }
 0x51a   : > { %v725_v41 = vmul.f32 %v4245_v50, %v5066_v29  ;;  %v4247_v22 = vpop.eup %4246  ;;  %4266 = vrcp.f32 %v6337_v48 }
 0x51b   : > { %3807 = vmatmul.mubr.f32.gmra.mrb[30].mxu1 %v2574_v51  ;;  %v727_v4 = vmul.f32 %v4247_v22, %v5070_v35  ;;  %v4249_v52 = vpop.eup %4248 }
 0x51c   : > { %2527 = vadd.xlane.f32.xlu1 %v4235_v57  ;;  %v733_v24 = vsub.f32 2.0, %v725_v41  ;;  %v4251_v44 = vpop.eup %4250  ;;  %v728_v29 = vmul.f32 %v4249_v52, %v5068_v32  ;;  %v6350_v41 = vld [vmem:[#allocation41_spill] sm:$0xff] }
 0x51d   : > { %2525 = vadd.xlane.f32.xlu0 %v4229_v28  ;;  %v735_v26 = vsub.f32 2.0, %v727_v4  ;;  %v4253_v13 = vpop.eup %4252  ;;  %v726_v56 = vmul.f32 %v4251_v44, %v5064_v27  ;;  %v6340_v28 = vld [vmem:[#allocation27_spill] sm:$0xff] }
 0x51e   : > { %v741_v2 = vmul.f32 %v4245_v50, %v733_v24  ;;  %v4255_v34 = vpop.eup %4254  ;;  %v736_v31 = vsub.f32 2.0, %v728_v29  ;;  %v730_v62 = vmul.f32 %v4253_v13, %v5072_v33 }
 0x51f   : > { %v743_v35 = vmul.f32 %v4247_v22, %v735_v26  ;;  %v4257_v17 = vpop.eup %4256  ;;  %v734_v32 = vsub.f32 2.0, %v726_v56  ;;  %v729_v8 = vmul.f32 %v4255_v34, %v5074_v37  ;;  %v6351_v22 = vld [vmem:[#allocation16_spill] sm:$0xff] }
 0x520   : > { %2531 = vadd.xlane.f32.xlu1 %v4239_v7  ;;  %v879_v9 = vmul.f32 %v4998_v16, %v741_v2  ;;  %v4259_v10 = vpop.eup %4258  ;;  %v6339_v16 = vld [vmem:[#allocation26_spill] sm:$0xff]  ;;  %v738_v12 = vsub.f32 2.0, %v730_v62  ;;  %v732_v63 = vmul.f32 %v4257_v17, %v5076_v46  ;;  %v744_v30 = vmul.f32 %v4249_v52, %v736_v31  ;;  %v6352_v2 = vld [vmem:[#allocation40_spill] sm:$0xff] }
 0x521   : > { %2529 = vadd.xlane.f32.xlu0 %v4233_v45  ;;  %v881_v27 = vmul.f32 %v6338_v43, %v743_v35  ;;  %4268 = vrcp.f32 %v6339_v16  ;;  %v4261_v33 = vpop.eup %4260  ;;  %v737_v5 = vsub.f32 2.0, %v729_v8  ;;  %v731_v11 = vmul.f32 %v4259_v10, %v5078_v38  ;;  %v6345_v45 = vld [vmem:[#allocation13_spill] sm:$0xff]  ;;  %v6356_v43 = vld [vmem:[#allocation42_spill] sm:$0xff] }
 0x522   : > { %4270 = vrcp.f32 %v6340_v28  ;;  %v742_v49 = vmul.f32 %v4251_v44, %v734_v32  ;;  %v882_v37 = vmul.f32 %v6341_v58, %v744_v30  ;;  %v4263_v19 = vpop.eup %4262  ;;  %v740_v15 = vsub.f32 2.0, %v732_v63 }
 0x523   : > { %4272 = vrcp.f32 %v6342_v39  ;;  %v746_v3 = vmul.f32 %v4253_v13, %v738_v12  ;;  %v1029_v46 = vmul.f32 %v4261_v33, %v5082_v42  ;;  %v4265_v59 = vpop.eup %4264  ;;  %v739_v21 = vsub.f32 2.0, %v731_v11  ;;  %v6353_v13 = vld [vmem:[#allocation30_spill] sm:$0xff] }
 0x524   : > { %v880_v18 = vmul.f32 %v6343_v36, %v742_v49  ;;  %4274 = vrcp.f32 %v6344_v20  ;;  %v745_v0 = vmul.f32 %v4255_v34, %v737_v5  ;;  %v1028_v57 = vmul.f32 %v4263_v19, %v5080_v40  ;;  %v4267_v6 = vpop.eup %4266  ;;  %v6354_v34 = vld [vmem:[#allocation43_spill] sm:$0xff]  ;;  %v6359_v5 = vld [vmem:[#allocation33_spill] sm:$0xff] }
 0x525   : > { %2533 = vadd.xlane.f32.xlu0 %v4243_v25  ;;  %v884_v38 = vmul.f32 %v6345_v45, %v746_v3  ;;  %4276 = vrcp.f32 %v6346_v53  ;;  %v748_v60 = vmul.f32 %v4257_v17, %v740_v15  ;;  %v1037_v42 = vsub.f32 2.0, %v1029_v46  ;;  %v6355_v17 = vld [vmem:[#allocation31_spill] sm:$0xff]  ;;  %v6361_v15 = vld [vmem:[#allocation34_spill] sm:$0xff] }
 0x526   : > { %v883_v1 = vmul.f32 %v6347_v61, %v745_v0  ;;  %v1031_v14 = vmul.f32 %v4265_v59, %v5084_v54  ;;  %4278 = vrcp.f32 %v6348_v23  ;;  %v747_v25 = vmul.f32 %v4259_v10, %v739_v21 }
 0x527   : > { %v886_v55 = vmul.f32 %v6349_v47, %v748_v60  ;;  %v1036_v40 = vsub.f32 2.0, %v1028_v57  ;;  %v1030_v51 = vmul.f32 %v4267_v6, %v6337_v48  ;;  %4280 = vrcp.f32 %v6350_v41  ;;  %v6363_v57 = vld [vmem:[#allocation36_spill] sm:$0xff] }
 0x528   : > { %v885_v24 = vmul.f32 %v6351_v22, %v747_v25  ;;  %v1039_v4 = vsub.f32 2.0, %v1031_v14  ;;  %v1045_v52 = vmul.f32 %v4261_v33, %v1037_v42  ;;  %4282 = vrcp.f32 %v6352_v2  ;;  %v6358_v33 = vld [vmem:[#allocation45_spill] sm:$0xff] }
 0x529   : > { %v1038_v44 = vsub.f32 2.0, %v1030_v51  ;;  %4284 = vrcp.f32 %v6354_v34  ;;  %v6364_v42 = vld [vmem:[#allocation37_spill] sm:$0xff]  ;;  %v6365_v51 = vld [vmem:[#allocation46_spill] sm:$0xff] }
 0x52a   : > { %v1183_v56 = vmul.f32 %v6353_v13, %v1045_v52  ;;  %v1047_v32 = vmul.f32 %v4265_v59, %v1039_v4  ;;  %4286 = vrcp.f32 %v6356_v43  ;;  %v6362_v59 = vld [vmem:[#allocation35_spill] sm:$0xff] }
 0x52b   : > { %v4269_v7 = vpop.eup %4268  ;;  %v1046_v63 = vmul.f32 %v4267_v6, %v1038_v44  ;;  %4288 = vrcp.f32 %v6358_v33 }
 0x52c   : > { %v4271_v50 = vpop.eup %4270  ;;  %v1033_v54 = vmul.f32 %v4269_v7, %v6339_v16  ;;  %v6357_v16 = vld [vmem:[#allocation32_spill] sm:$0xff] }
 0x52d   : > { %v4273_v26 = vpop.eup %4272  ;;  %v1032_v29 = vmul.f32 %v4271_v50, %v6340_v28  ;;  %v1185_v12 = vmul.f32 %v6357_v16, %v1047_v32  ;;  %v1184_v11 = vmul.f32 %v6359_v5, %v1046_v63  ;;  %v6372_v63 = vld [vmem:[#allocation53_spill] sm:$0xff] }
 0x52e   : > { %v4275_v35 = vpop.eup %4274  ;;  %v1041_v31 = vsub.f32 2.0, %v1033_v54  ;;  %v1035_v62 = vmul.f32 %v4273_v26, %v6342_v39  ;;  %v6366_v54 = vld [vmem:[#allocation47_spill] sm:$0xff] }
 0x52f   : > { %v4277_v8 = vpop.eup %4276  ;;  %v1034_v10 = vmul.f32 %v4275_v35, %v6344_v20 }
 0x530   : > { %v4279_v30 = vpop.eup %4278  ;;  %v1043_v28 = vsub.f32 2.0, %v1035_v62  ;;  %v1049_v49 = vmul.f32 %v4269_v7, %v1041_v31  ;;  %v1332_v58 = vmul.f32 %v4277_v8, %v6346_v53 }
 0x531   : > { %2713 = vrot.lane.b32.xlu1 %v879_v9, %s4428_s14  ;;  %v1044_v9 = vmul.f32 %v4263_v19, %v1036_v40  ;;  %v6360_v19 = vld [vmem:[#allocation44_spill] sm:$0xff]  ;;  %v1042_v39 = vsub.f32 2.0, %v1034_v10  ;;  %v1331_v3 = vmul.f32 %v4279_v30, %v6348_v23 }
 0x532   : > { %4290 = vrcp.f32 %v6360_v19  ;;  %v1187_v36 = vmul.f32 %v6361_v15, %v1049_v49  ;;  %v1051_v21 = vmul.f32 %v4273_v26, %v1043_v28  ;;  %v1340_v45 = vsub.f32 2.0, %v1332_v58  ;;  %v6371_v10 = vld [vmem:[#allocation52_spill] sm:$0xff] }
 0x533   : > { %v1182_v48 = vmul.f32 %v6355_v17, %v1044_v9  ;;  %v1050_v53 = vmul.f32 %v4275_v35, %v1042_v39  ;;  %v1339_v61 = vsub.f32 2.0, %v1331_v3  ;;  %v6368_v35 = vld [vmem:[#allocation49_spill] sm:$0xff]  ;;  %v6369_v17 = vld [vmem:[#allocation50_spill] sm:$0xff] }
 0x534   : > { %v1189_v6 = vmul.f32 %v6363_v57, %v1051_v21  ;;  %v1348_v47 = vmul.f32 %v4277_v8, %v1340_v45  ;;  %v6370_v8 = vld [vmem:[#allocation51_spill] sm:$0xff] }
 0x535   : > { %2717 = vrot.lane.b32.xlu1 %v881_v27, %s4428_s14  ;;  %v1040_v27 = vsub.f32 2.0, %v1032_v29  ;;  %v1188_v14 = vmul.f32 %v6364_v42, %v1050_v53  ;;  %v6367_v29 = vld [vmem:[#allocation48_spill] sm:$0xff] }
 0x539   : > { %2719 = vrot.lane.b32.xlu1 %v882_v37, %s4428_s14  ;;  %v4281_v37 = vpop.eup %4280 }
 0x53a   : > { %v4283_v46 = vpop.eup %4282 }
 0x53b   : > { %2715 = vrot.lane.b32.xlu0 %v880_v18, %s4428_s14  ;;  %v1048_v18 = vmul.f32 %v4271_v50, %v1040_v27  ;;  %v4285_v0 = vpop.eup %4284  ;;  %v1486_v50 = vmul.f32 %v6365_v51, %v1348_v47  ;;  %v6373_v47 = vld [vmem:[#allocation18_spill] sm:$0xff] }
 0x53c   : > { %v4287_v60 = vpop.eup %4286  ;;  %v1336_v23 = vmul.f32 %v4285_v0, %v6354_v34 }
 0x53d   : > { %2723 = vrot.lane.b32.xlu1 %v884_v38, %s4428_s14  ;;  %v1186_v20 = vmul.f32 %v6362_v59, %v1048_v18  ;;  %v1334_v38 = vmul.f32 %v4281_v37, %v6350_v41  ;;  %v1335_v40 = vmul.f32 %v4287_v60, %v6356_v43  ;;  %v1347_v41 = vmul.f32 %v4279_v30, %v1339_v61 }
 0x53f   : > { %2721 = vrot.lane.b32.xlu0 %v883_v1, %s4428_s14  ;;  %v1333_v1 = vmul.f32 %v4283_v46, %v6352_v2  ;;  %v1342_v7 = vsub.f32 2.0, %v1334_v38  ;;  %v1485_v52 = vmul.f32 %v6366_v54, %v1347_v41  ;;  %v1343_v2 = vsub.f32 2.0, %v1335_v40 }
 0x541   : > { %2727 = vrot.lane.b32.xlu1 %v886_v55, %s4428_s14  ;;  %v4289_v55 = vpop.eup %4288  ;;  %v1341_v25 = vsub.f32 2.0, %v1333_v1  ;;  %v1350_v26 = vmul.f32 %v4281_v37, %v1342_v7  ;;  %v1351_v32 = vmul.f32 %v4287_v60, %v1343_v2  ;;  %v6375_v2 = vld [vmem:[#allocation17_spill] sm:$0xff] }
 0x542   : > { %v4291_v22 = vpop.eup %4290  ;;  %v1338_v4 = vmul.f32 %v4289_v55, %v6358_v33 }
 0x543   : > { %2725 = vrot.lane.b32.xlu0 %v885_v24, %s4428_s14  ;;  %v1344_v24 = vsub.f32 2.0, %v1336_v23  ;;  %v1337_v44 = vmul.f32 %v4291_v22, %v6360_v19  ;;  %v1488_v13 = vmul.f32 %v6367_v29, %v1350_v26  ;;  %v1489_v43 = vmul.f32 %v6370_v8, %v1351_v32 }
 0x544   : > { %v1346_v9 = vsub.f32 2.0, %v1338_v4  ;;  %v1613_v5 = vpop.xlane.xlu0 %1612 }
 0x545   : > { %2747 = vrot.lane.b32.xlu1 %v1183_v56, %s4429_s15  ;;  %v1349_v56 = vmul.f32 %v4283_v46, %v1341_v25  ;;  %v1352_v31 = vmul.f32 %v4285_v0, %v1344_v24  ;;  %v1345_v62 = vsub.f32 2.0, %v1337_v44  ;;  %4292 = vrcp.f32 %v1613_v5 }
 0x546   : > { %v1354_v27 = vmul.f32 %v4289_v55, %v1346_v9 }
 0x547   : > { %2745 = vrot.lane.b32.xlu0 %v1182_v48, %s4429_s15  ;;  %v1487_v34 = vmul.f32 %v6368_v35, %v1349_v56  ;;  %v1490_v48 = vmul.f32 %v6369_v17, %v1352_v31  ;;  %v6376_v35 = vld [vmem:[#allocation19_spill] sm:$0xff] }
 0x548   : > { %v1492_v16 = vmul.f32 %v6371_v10, %v1354_v27  ;;  %v6378_v27 = vld [vmem:[#allocation21_spill] sm:$0xff] }
 0x549   : > { %2751 = vrot.lane.b32.xlu1 %v1185_v12, %s4429_s15  ;;  %v1353_v12 = vmul.f32 %v4291_v22, %v1345_v62  ;;  %v1611_v33 = vpop.xlane.xlu1 %1610 }
 0x54a   : > { %4294 = vrcp.f32 %v1611_v33 }
 0x54b   : > { %2749 = vrot.lane.b32.xlu0 %v1184_v11, %s4429_s15  ;;  %v1491_v30 = vmul.f32 %v6372_v63, %v1353_v12  ;;  %v6379_v63 = vld [vmem:[#allocation24_spill] sm:$0xff] }
 0x54d   : > { %2755 = vrot.lane.b32.xlu1 %v1187_v36, %s4429_s15 }
 0x54f   : > { %2753 = vrot.lane.b32.xlu0 %v1186_v20, %s4429_s15  ;;  %v4293_v46 = vpop.eup %4292 }
 0x550   : > { %v1635_v20 = vmul.f32 %v4293_v46, %v1613_v5 }
 0x551   : > { %2759 = vrot.lane.b32.xlu1 %v1189_v6, %s4429_s15  ;;  %v1615_v28 = vpop.xlane.xlu1 %1614 }
 0x552   : > { %v1643_v0 = vsub.f32 2.0, %v1635_v20 }
 0x553   : > { %2757 = vrot.lane.b32.xlu0 %v1188_v14, %s4429_s15 }
 0x554   : > { %v4295_v59 = vpop.eup %4294  ;;  %v1651_v1 = vmul.f32 %v4293_v46, %v1643_v0 }
 0x555   : > { %2779 = vrot.lane.b32.xlu1 %v1486_v50, %s4430_s16  ;;  %v1617_v49 = vpop.xlane.xlu0 %1616  ;;  %v1634_v45 = vmul.f32 %v4295_v59, %v1611_v33 }
 0x556   : > { %4296 = vrcp.f32 %v1617_v49 }
 0x557   : > { %2777 = vrot.lane.b32.xlu0 %v1485_v52, %s4430_s16  ;;  %4298 = vrcp.f32 %v1615_v28  ;;  %v1642_v57 = vsub.f32 2.0, %v1634_v45  ;;  %v6374_v52 = vld [vmem:[#allocation20_spill] sm:$0xff] }
 0x558   : > { %4300 = vrcp.f32 %v6373_v47 }
 0x559   : > { %2783 = vrot.lane.b32.xlu1 %v1488_v13, %s4430_s16  ;;  %v1650_v14 = vmul.f32 %v4295_v59, %v1642_v57 }
 0x55b   : > { %2781 = vrot.lane.b32.xlu0 %v1487_v34, %s4430_s16 }
 0x55d   : > { %2787 = vrot.lane.b32.xlu1 %v1490_v48, %s4430_s16  ;;  %v6377_v48 = vld [vmem:[#allocation22_spill] sm:$0xff] }
 0x55e   : > { %v5895_v11 = vpop.xlane.xlu1 %1618 }
 0x55f   : > { %2785 = vrot.lane.b32.xlu0 %v1489_v43, %s4430_s16 }
 0x560   : > { %v4297_v61 = vpop.eup %4296 }
 0x561   : > { %2791 = vrot.lane.b32.xlu1 %v1492_v16, %s4430_s16  ;;  %v4299_v60 = vpop.eup %4298  ;;  %v1637_v55 = vmul.f32 %v4297_v61, %v1617_v49  ;;  %v6380_v49 = vld [vmem:[#allocation23_spill] sm:$0xff] }
 0x562   : > { %v1636_v40 = vmul.f32 %v4299_v60, %v1615_v28  ;;  %v4301_v9 = vpop.eup %4300 }
 0x563   : > { %2789 = vrot.lane.b32.xlu0 %v1491_v30, %s4430_s16  ;;  %v5899_v37 = vpop.xlane.xlu0 %1620  ;;  %v1645_v41 = vsub.f32 2.0, %v1637_v55  ;;  %v423_v12 = vmul.f32 %v4301_v9, %v6373_v47 }
 0x564   : > { %4302 = vrcp.f32 %v5899_v37  ;;  %v1644_v22 = vsub.f32 2.0, %v1636_v40 }
 0x565   : > { %4304 = vrcp.f32 %v5895_v11  ;;  %v1653_v44 = vmul.f32 %v4297_v61, %v1645_v41  ;;  %v431_v59 = vsub.f32 2.0, %v423_v12  ;;  %v6383_v12 = vld [vmem:[#allocation3_spill] sm:$0xff] }
 0x566   : > { %4306 = vrcp.f32 %v6374_v52  ;;  %v1652_v56 = vmul.f32 %v4299_v60, %v1644_v22 }
 0x567   : > { %4308 = vrcp.f32 %v6375_v2  ;;  %v439_v55 = vmul.f32 %v4301_v9, %v431_v59 }
 0x568   : > { %4310 = vrcp.f32 %v6376_v35 }
 0x569   : > { %4312 = vrcp.f32 %v6377_v48 }
 0x56c   : > { %v5903_v39 = vpop.xlane.xlu0 %1624 }
 0x56d   : > { %v5897_v58 = vpop.xlane.xlu1 %1622  ;;  %4314 = vrcp.f32 %v5903_v39 }
 0x56e   : > { %v4303_v17 = vpop.eup %4302  ;;  %4316 = vrcp.f32 %v5897_v58 }
 0x56f   : > { %v4305_v8 = vpop.eup %4304  ;;  %4318 = vrcp.f32 %v6378_v27  ;;  %v1639_v10 = vmul.f32 %v4303_v17, %v5899_v37 }
 0x570   : > { %v5907_v36 = vpop.xlane.xlu0 %1915  ;;  %4320 = vrcp.f32 %v6379_v63  ;;  %v1638_v30 = vmul.f32 %v4305_v8, %v5895_v11  ;;  %v4307_v33 = vpop.eup %4306 }
 0x571   : > { %v5901_v19 = vpop.xlane.xlu1 %1913  ;;  %4322 = vrcp.f32 %v5907_v36  ;;  %v4309_v5 = vpop.eup %4308  ;;  %v1647_v46 = vsub.f32 2.0, %v1639_v10  ;;  %v425_v11 = vmul.f32 %v4307_v33, %v6374_v52 }
 0x572   : > { %4324 = vrcp.f32 %v5901_v19  ;;  %v1646_v20 = vsub.f32 2.0, %v1638_v30  ;;  %v4311_v0 = vpop.eup %4310 }
 0x573   : > { %4326 = vrcp.f32 %v6380_v49  ;;  %v4313_v61 = vpop.eup %4312  ;;  %v426_v47 = vmul.f32 %v4311_v0, %v6376_v35  ;;  %v433_v22 = vsub.f32 2.0, %v425_v11 }
 0x574   : > { %v5911_v3 = vpop.xlane.xlu0 %1919  ;;  %v1654_v40 = vmul.f32 %v4305_v8, %v1646_v20  ;;  %v427_v52 = vmul.f32 %v4313_v61, %v6377_v48 }
 0x575   : > { %v5905_v15 = vpop.xlane.xlu1 %1917  ;;  %4328 = vrcp.f32 %v5911_v3  ;;  %v434_v8 = vsub.f32 2.0, %v426_v47  ;;  %v441_v20 = vmul.f32 %v4307_v33, %v433_v22 }
 0x576   : > { %4330 = vrcp.f32 %v5905_v15 }
 0x578   : > { %v5915_v38 = vpop.xlane.xlu0 %1923 }
 0x579   : > { %v5909_v18 = vpop.xlane.xlu1 %1921  ;;  %4332 = vrcp.f32 %v5915_v38 }
 0x57a   : > { %4334 = vrcp.f32 %v5909_v18 }
 0x57c   : > { %v5919_v53 = vpop.xlane.xlu0 %1927 }
 0x57d   : > { %v5913_v21 = vpop.xlane.xlu1 %1925  ;;  %4336 = vrcp.f32 %v5919_v53 }
 0x57e   : > { %4338 = vrcp.f32 %v5913_v21 }
 0x580   : > { %v5927_v50 = vpop.xlane.xlu0 %2218 }
 0x581   : > { %v5917_v6 = vpop.xlane.xlu1 %2216  ;;  %4340 = vrcp.f32 %v5927_v50 }
 0x582   : > { %4342 = vrcp.f32 %v5917_v6 }
 0x585   : > { %v5923_v51 = vpop.xlane.xlu1 %2220 }
 0x58a   : > { %v5932_v4 = vpop.xlane.xlu0 %2222 }
 0x58b   : > { %4344 = vrcp.f32 %v5932_v4 }
 0x58d   : > { %v5930_v24 = vpop.xlane.xlu1 %2224 }
 0x592   : > { %v3667_v42 = vpop.f32.mrb[16].mxu0 }
 0x593   : > { %v1789_v7 = vmul.f32 %v3667_v42, %v1651_v1  ;;  %v1749_v23 = vpop.f32.mrb[17].mxu0  ;;  %v5943_v34 = vpop.xlane.xlu0 %2226  ;;  %v424_v1 = vmul.f32 %v4309_v5, %v6375_v2 }
 0x594   : > { %v1788_v25 = vmul.f32 %v1749_v23, %v1650_v14  ;;  %v4315_v42 = vpop.eup %4314  ;;  %4346 = vrcp.f32 %v5923_v51 }
 0x595   : > { %2811 = vrot.lane.b32.xlu1 %v1789_v7, %s4431_s17  ;;  %v1655_v7 = vmul.f32 %v4303_v17, %v1647_v46  ;;  %v5978_v23 = vpop.eup %4316  ;;  %v435_v46 = vsub.f32 2.0, %v427_v52  ;;  %4348 = vrcp.f32 %v5943_v34 }
 0x596   : > { %2809 = vrot.lane.b32.xlu0 %v1788_v25, %s4431_s17  ;;  %v5981_v41 = vpop.eup %4318  ;;  %v1640_v17 = vmul.f32 %v5978_v23, %v5897_v58  ;;  %4350 = vrcp.f32 %v5930_v24 }
 0x597   : > { %v428_v10 = vmul.f32 %v5981_v41, %v6378_v27 }
 0x599   : > { %v436_v52 = vsub.f32 2.0, %v428_v10 }
 0x59a   : > { %v5934_v54 = vpop.f32.mrb[16].mxu1 }
 0x59b   : > { %v5937_v26 = vpop.f32.mrb[17].mxu1 }
 0x59d   : > { %v5940_v29 = vpop.xlane.xlu1 %2228  ;;  %v3670_v13 = vpop.f32.mrb[18].mxu0 }
 0x59e   : > { %v1791_v31 = vmul.f32 %v3670_v13, %v1653_v44  ;;  %v1759_v62 = vpop.f32.mrb[19].mxu0  ;;  %v4321_v13 = vpop.eup %4320 }
 0x59f   : > { %v1790_v32 = vmul.f32 %v1759_v62, %v1652_v56  ;;  %v432_v56 = vsub.f32 2.0, %v424_v1  ;;  %v4323_v9 = vpop.eup %4322  ;;  %v429_v59 = vmul.f32 %v4321_v13, %v6379_v63 }
 0x5a0   : > { %2815 = vrot.lane.b32.xlu1 %v1791_v31, %s4431_s17  ;;  %v1641_v31 = vmul.f32 %v4315_v42, %v5903_v39  ;;  %v4325_v48 = vpop.eup %4324  ;;  %v576_v39 = vmul.f32 %v6383_v12, %v439_v55  ;;  %v443_v12 = vmul.f32 %v4313_v61, %v435_v46 }
 0x5a1   : > { %v5949_v43 = vpop.xlane.xlu1 %2519  ;;  %2813 = vrot.lane.b32.xlu0 %v1790_v32, %s4431_s17  ;;  %v4327_v30 = vpop.eup %4326  ;;  %v440_v11 = vmul.f32 %v4309_v5, %v432_v56  ;;  %v437_v56 = vsub.f32 2.0, %v429_v59 }
 0x5a2   : > { %v5954_v16 = vpop.xlane.xlu0 %2230  ;;  %v1649_v1 = vsub.f32 2.0, %v1641_v31  ;;  %v4329_v55 = vpop.eup %4328  ;;  %v430_v5 = vmul.f32 %v4327_v30, %v6380_v49  ;;  %v6386_v31 = vld [vmem:[#allocation5_spill] sm:$0xff] }
 0x5a3   : > { %v4331_v22 = vpop.eup %4330  ;;  %4352 = vrcp.f32 %v5954_v16 }
 0x5a4   : > { %v1939_v49 = vmul.f32 %v4331_v22, %v5905_v15  ;;  %v438_v59 = vsub.f32 2.0, %v430_v5  ;;  %4354 = vrcp.f32 %v5940_v29 }
 0x5a5   : > { %v5961_v28 = vpop.xlane.xlu1 %2523 }
 0x5a6   : > { %v5964_v37 = vpop.xlane.xlu0 %2521  ;;  %v1947_v5 = vsub.f32 2.0, %v1939_v49 }
 0x5a7   : > { %v5966_v45 = vpop.f32.mrb[18].mxu1  ;;  %4356 = vrcp.f32 %v5964_v37 }
 0x5a8   : > { %v5970_v57 = vpop.f32.mrb[19].mxu1  ;;  %4358 = vrcp.f32 %v5949_v43 }
 0x5a9   : > { %v5974_v60 = vpop.xlane.xlu1 %2527 }
 0x5aa   : > { %6381 = vst [vmem:[#allocation25_spill] sm:$0xff] %v5974_v60  ;;  %v5976_v14 = vpop.xlane.xlu0 %2525 }
 0x5ab   : > { %v3673_v25 = vpop.f32.mrb[20].mxu0  ;;  %4360 = vrcp.f32 %v5976_v14 }
 0x5ac   : > { %v1793_v2 = vmul.f32 %v3673_v25, %v1655_v7  ;;  %v1769_v44 = vpop.f32.mrb[21].mxu0  ;;  %v1938_v7 = vmul.f32 %v4323_v9, %v5907_v36  ;;  %v1648_v25 = vsub.f32 2.0, %v1640_v17  ;;  %4362 = vrcp.f32 %v5961_v28 }
 0x5ad   : > { %v1792_v62 = vmul.f32 %v1769_v44, %v1654_v40  ;;  %v5987_v35 = vpop.xlane.xlu1 %2531  ;;  %v1937_v40 = vmul.f32 %v4325_v48, %v5901_v19  ;;  %v442_v44 = vmul.f32 %v4311_v0, %v434_v8  ;;  %v1940_v19 = vmul.f32 %v4329_v55, %v5911_v3 }
 0x5ae   : > { %6382 = vst [vmem:[#allocation12_spill] sm:$0xff] %v5987_v35  ;;  %v5991_v32 = vpop.xlane.xlu0 %2529  ;;  %2819 = vrot.lane.b32.xlu1 %v1793_v2, %s4431_s17  ;;  %v6385_v2 = vld [vmem:[#allocation2_spill] sm:$0xff]  ;;  %v1946_v17 = vsub.f32 2.0, %v1938_v7  ;;  %v4333_v35 = vpop.eup %4332  ;;  %v1656_v61 = vmul.f32 %v5978_v23, %v1648_v25 }
 0x5af   : > { %2817 = vrot.lane.b32.xlu0 %v1792_v62, %s4431_s17  ;;  %v577_v36 = vmul.f32 %v6385_v2, %v440_v11  ;;  %v578_v62 = vmul.f32 %v6386_v31, %v441_v20  ;;  %v1945_v10 = vsub.f32 2.0, %v1937_v40  ;;  %v4335_v46 = vpop.eup %4334  ;;  %v6387_v2 = vld [vmem:[#allocation4_spill] sm:$0xff]  ;;  %v445_v40 = vmul.f32 %v4321_v13, %v437_v56  ;;  %v6388_v31 = vld [vmem:[#allocation7_spill] sm:$0xff] }
 0x5b0   : > { %v6000_v58 = vpop.f32.mrb[20].mxu1  ;;  %v1954_v60 = vmul.f32 %v4323_v9, %v1946_v17  ;;  %v4337_v25 = vpop.eup %4336  ;;  %v6389_v9 = vld [vmem:[#allocation6_spill] sm:$0xff]  ;;  %v6390_v17 = vld [vmem:[#allocation9_spill] sm:$0xff]  ;;  %4364 = vrcp.f32 %v5991_v32 }
 0x5b1   : > { %v2714_v27 = vpop.permute.xlu1 %2713  ;;  %v6004_v47 = vpop.f32.mrb[21].mxu1 }
 0x5b2   : > { %v6008_v63 = vsel %vm2929_vm11, %v576_v39, %v2714_v27  ;;  %v6010_v33 = vpop.xlane.xlu0 %2533  ;;  %v1657_v27 = vmul.f32 %v4315_v42, %v1649_v1  ;;  %v579_v42 = vmul.f32 %v6387_v2, %v442_v44  ;;  %v444_v1 = vmul.f32 %v5981_v41, %v436_v52  ;;  %v4339_v13 = vpop.eup %4338 }
 0x5b3   : > { %6384 = vst [vmem:[#allocation26_spill] sm:$0xff] %v6010_v33  ;;  %v1942_v33 = vmul.f32 %v4333_v35, %v5915_v38  ;;  %v446_v52 = vmul.f32 %v4327_v30, %v438_v59  ;;  %v2092_v56 = vmul.f32 %v5934_v54, %v1954_v60  ;;  %v4341_v54 = vpop.eup %4340 }
 0x5b5   : > { %v2718_v39 = vpop.permute.xlu1 %2717 }
 0x5b6   : > { %v6020_v11 = vsel %vm2929_vm11, %v578_v62, %v2718_v39  ;;  %v2716_v0 = vpop.permute.xlu0 %2715  ;;  %v3676_v8 = vpop.f32.mrb[22].mxu0  ;;  %v580_v62 = vmul.f32 %v6388_v31, %v443_v12  ;;  %v1948_v39 = vsub.f32 2.0, %v1940_v19  ;;  %v581_v12 = vmul.f32 %v6389_v9, %v444_v1 }
 0x5b7   : > { %v6024_v20 = vsel %vm2929_vm11, %v577_v36, %v2716_v0  ;;  %v1795_v3 = vmul.f32 %v3676_v8, %v1657_v27  ;;  %v1779_v7 = vpop.f32.mrb[23].mxu0  ;;  %v1941_v36 = vmul.f32 %v4335_v46, %v5909_v18  ;;  %v1953_v27 = vmul.f32 %v4325_v48, %v1945_v10 }
 0x5b8   : > { %v1794_v15 = vmul.f32 %v1779_v7, %v1656_v61  ;;  %v582_v19 = vmul.f32 %v6390_v17, %v445_v40  ;;  %v1950_v48 = vsub.f32 2.0, %v1942_v33  ;;  %v1944_v10 = vmul.f32 %v4337_v25, %v5919_v53 }
 0x5b9   : > { %v2720_v23 = vpop.permute.xlu1 %2719  ;;  %2823 = vrot.lane.b32.xlu1 %v1795_v3, %s4431_s17  ;;  %v2091_v18 = vmul.f32 %v5937_v26, %v1953_v27  ;;  %v1956_v49 = vmul.f32 %v4329_v55, %v1948_v39  ;;  %v1949_v60 = vsub.f32 2.0, %v1941_v36  ;;  %v1943_v0 = vmul.f32 %v4339_v13, %v5913_v21  ;;  %v4343_v26 = vpop.eup %4342  ;;  %v6391_v3 = vld [vmem:[#allocation8_spill] sm:$0xff] }
 0x5ba   : > { %v6033_v44 = vsel %vm2929_vm11, %v579_v42, %v2720_v23  ;;  %v2722_v41 = vpop.permute.xlu0 %2721  ;;  %2821 = vrot.lane.b32.xlu0 %v1794_v15, %s4431_s17  ;;  %v1955_v8 = vmul.f32 %v4331_v22, %v1947_v5  ;;  %v583_v7 = vmul.f32 %v6391_v3, %v446_v52  ;;  %v1952_v21 = vsub.f32 2.0, %v1944_v10  ;;  %v4345_v27 = vpop.eup %4344 }
 0x5bb   : > { %v6038_v38 = vsel %vm2929_vm11, %v580_v62, %v2722_v41  ;;  %v2094_v53 = vmul.f32 %v5966_v45, %v1956_v49  ;;  %v2241_v22 = vmul.f32 %v4341_v54, %v5927_v50  ;;  %v1958_v1 = vmul.f32 %v4333_v35, %v1950_v48 }
 0x5bc   : > { %v2093_v2 = vmul.f32 %v5970_v57, %v1955_v8  ;;  %v1951_v15 = vsub.f32 2.0, %v1943_v0  ;;  %v2240_v31 = vmul.f32 %v4343_v26, %v5917_v6  ;;  %v1957_v45 = vmul.f32 %v4335_v46, %v1949_v60 }
 0x5bd   : > { %v2724_v30 = vpop.permute.xlu1 %2723  ;;  %2843 = vrot.lane.b32.xlu1 %v2092_v56, %s4432_s19  ;;  %v2096_v57 = vmul.f32 %v6000_v58, %v1958_v1  ;;  %v2249_v36 = vsub.f32 2.0, %v2241_v22  ;;  %v1960_v6 = vmul.f32 %v4337_v25, %v1952_v21 }
 0x5be   : > { %v6049_v61 = vsel %vm2929_vm11, %v581_v12, %v2724_v30  ;;  %v2726_v59 = vpop.permute.xlu0 %2725  ;;  %2841 = vrot.lane.b32.xlu0 %v2091_v18, %s4432_s19  ;;  %v2095_v35 = vmul.f32 %v6004_v47, %v1957_v45  ;;  %v2248_v41 = vsub.f32 2.0, %v2240_v31  ;;  %v1959_v58 = vmul.f32 %v4339_v13, %v1951_v15  ;;  %v4347_v47 = vpop.eup %4346 }
 0x5bf   : > { %v2936_v55 = vsel %vm2929_vm11, %v582_v19, %v2726_v59  ;;  %v3720_v33 = vpop.f32.mrb[22].mxu1  ;;  %v2243_v12 = vmul.f32 %v4345_v27, %v5932_v4  ;;  %v2257_v17 = vmul.f32 %v4341_v54, %v2249_v36  ;;  %v4349_v8 = vpop.eup %4348 }
 0x5c0   : > { %v2082_v42 = vpop.f32.mrb[23].mxu1  ;;  %v2098_v56 = vmul.f32 %v3720_v33, %v1960_v6  ;;  %v2256_v13 = vmul.f32 %v4343_v26, %v2248_v41  ;;  %v2245_v33 = vmul.f32 %v4349_v8, %v5943_v34 }
 0x5c1   : > { %v2728_v40 = vpop.permute.xlu1 %2727  ;;  %2847 = vrot.lane.b32.xlu1 %v2094_v53, %s4432_s19  ;;  %v2097_v9 = vmul.f32 %v2082_v42, %v1959_v58  ;;  %v2251_v54 = vsub.f32 2.0, %v2243_v12  ;;  %v6393_v58 = vld [vmem:[#allocation26_spill] sm:$0xff] }
 0x5c2   : > { %v2937_v62 = vsel %vm2929_vm11, %v583_v7, %v2728_v40  ;;  %v2746_v39 = vpop.permute.xlu0 %2745  ;;  %2845 = vrot.lane.b32.xlu0 %v2093_v2, %s4432_s19 }
 0x5c3   : > { %v6064_v23 = vsel %vm2938_vm15, %v6008_v63, %v2746_v39  ;;  %v3755_v50 = vpop.f32.mrb[24].mxu0  ;;  %v2259_v53 = vmul.f32 %v4345_v27, %v2251_v54 }
 0x5c4   : > { %v2355_v5 = vpop.f32.mrb[25].mxu0 }
 0x5c5   : > { %v2748_v46 = vpop.permute.xlu1 %2747  ;;  %2851 = vrot.lane.b32.xlu1 %v2096_v57, %s4432_s19  ;;  %v2394_v30 = vmul.f32 %v2355_v5, %v2256_v13  ;;  %v6392_v5 = vld [vmem:[#allocation25_spill] sm:$0xff] }
 0x5c6   : > { %v6072_v63 = vsel %vm2938_vm15, %v6024_v20, %v2748_v46  ;;  %v2750_v52 = vpop.permute.xlu0 %2749  ;;  %2849 = vrot.lane.b32.xlu0 %v2095_v35, %s4432_s19  ;;  %v2242_v20 = vmul.f32 %v4347_v47, %v5923_v51  ;;  %4366 = vrcp.f32 %v6392_v5 }
 0x5c7   : > { %v6077_v25 = vsel %vm2938_vm15, %v6020_v11, %v2750_v52  ;;  %v2395_v11 = vmul.f32 %v3755_v50, %v2257_v17  ;;  %4368 = vrcp.f32 %v6393_v58 }
 0x5c8   : > { %v2250_v51 = vsub.f32 2.0, %v2242_v20 }
 0x5c9   : > { %v2752_v19 = vpop.permute.xlu1 %2751  ;;  %v6080_v18 = vpop.f32.mrb[24].mxu1  ;;  %2855 = vrot.lane.b32.xlu1 %v2098_v56, %s4432_s19  ;;  %v6394_v56 = vld [vmem:[#allocation12_spill] sm:$0xff] }
 0x5ca   : > { %v6086_v48 = vsel %vm2938_vm15, %v6033_v44, %v2752_v19  ;;  %v2754_v10 = vpop.permute.xlu0 %2753  ;;  %v6088_v49 = vpop.f32.mrb[25].mxu1  ;;  %2853 = vrot.lane.b32.xlu0 %v2097_v9, %s4432_s19  ;;  %v2258_v2 = vmul.f32 %v4347_v47, %v2250_v51  ;;  %4370 = vrcp.f32 %v6394_v56 }
 0x5cb   : > { %v6093_v4 = vsel %vm2938_vm15, %v6038_v38, %v2754_v10  ;;  %v4351_v38 = vpop.eup %4350 }
 0x5cc   : > { %v4353_v57 = vpop.eup %4352 }
 0x5cd   : > { %v2756_v60 = vpop.permute.xlu1 %2755  ;;  %2875 = vrot.lane.b32.xlu1 %v2395_v11, %s4433_s20  ;;  %v4355_v50 = vpop.eup %4354  ;;  %v2247_v35 = vmul.f32 %v4353_v57, %v5954_v16 }
 0x5ce   : > { %v6098_v44 = vsel %vm2938_vm15, %v6049_v61, %v2756_v60  ;;  %v2758_v0 = vpop.permute.xlu0 %2757  ;;  %2873 = vrot.lane.b32.xlu0 %v2394_v30, %s4433_s20  ;;  %v2244_v61 = vmul.f32 %v4351_v38, %v5930_v24  ;;  %v4357_v6 = vpop.eup %4356  ;;  %v2246_v46 = vmul.f32 %v4355_v50, %v5940_v29 }
 0x5cf   : > { %v6102_v59 = vsel %vm2938_vm15, %v2936_v55, %v2758_v0  ;;  %v2253_v55 = vsub.f32 2.0, %v2245_v33  ;;  %v4359_v41 = vpop.eup %4358  ;;  %v2255_v52 = vsub.f32 2.0, %v2247_v35  ;;  %v2544_v47 = vmul.f32 %v4357_v6, %v5964_v37 }
 0x5d0   : > { %v2252_v1 = vsub.f32 2.0, %v2244_v61  ;;  %v4361_v9 = vpop.eup %4360  ;;  %v2254_v12 = vsub.f32 2.0, %v2246_v46  ;;  %v2543_v17 = vmul.f32 %v4359_v41, %v5949_v43 }
 0x5d1   : > { %v2760_v26 = vpop.permute.xlu1 %2759  ;;  %v2261_v24 = vmul.f32 %v4349_v8, %v2253_v55  ;;  %v4363_v16 = vpop.eup %4362  ;;  %v2552_v19 = vsub.f32 2.0, %v2544_v47  ;;  %v2546_v20 = vmul.f32 %v4361_v9, %v5976_v14  ;;  %v2263_v13 = vmul.f32 %v4353_v57, %v2255_v52 }
 0x5d2   : > { %v6106_v3 = vsel %vm2938_vm15, %v2937_v62, %v2760_v26  ;;  %v3758_v7 = vpop.f32.mrb[26].mxu0  ;;  %v2260_v31 = vmul.f32 %v4351_v38, %v2252_v1  ;;  %v4365_v10 = vpop.eup %4364  ;;  %v2551_v29 = vsub.f32 2.0, %v2543_v17  ;;  %v2545_v11 = vmul.f32 %v4363_v16, %v5961_v28 }
 0x5d3   : > { %v2397_v42 = vmul.f32 %v3758_v7, %v2259_v53  ;;  %v2365_v21 = vpop.f32.mrb[27].mxu0  ;;  %v2262_v54 = vmul.f32 %v4355_v50, %v2254_v12  ;;  %v4367_v60 = vpop.eup %4366  ;;  %v2554_v8 = vsub.f32 2.0, %v2546_v20  ;;  %v2548_v38 = vmul.f32 %v4365_v10, %v5991_v32 }
 0x5d4   : > { %v2396_v22 = vmul.f32 %v2365_v21, %v2258_v2  ;;  %v2560_v26 = vmul.f32 %v4357_v6, %v2552_v19  ;;  %v4369_v43 = vpop.eup %4368  ;;  %v2553_v53 = vsub.f32 2.0, %v2545_v11  ;;  %v2547_v14 = vmul.f32 %v4367_v60, %v6392_v5 }
 0x5d5   : > { %2879 = vrot.lane.b32.xlu1 %v2397_v42, %s4433_s20  ;;  %v2559_v33 = vmul.f32 %v4359_v41, %v2551_v29  ;;  %v4371_v7 = vpop.eup %4370  ;;  %v2556_v21 = vsub.f32 2.0, %v2548_v38  ;;  %v2550_v32 = vmul.f32 %v4369_v43, %v6393_v58  ;;  %v2780_v46 = vpop.permute.xlu1 %2779 }
 0x5d6   : > { %2877 = vrot.lane.b32.xlu0 %v2396_v22, %s4433_s20  ;;  %v6113_v34 = vpop.f32.mrb[26].mxu1  ;;  %v2698_v2 = vmul.f32 %v6080_v18, %v2560_v26  ;;  %v2562_v22 = vmul.f32 %v4361_v9, %v2554_v8  ;;  %v2555_v55 = vsub.f32 2.0, %v2547_v14  ;;  %v2549_v1 = vmul.f32 %v4371_v7, %v6394_v56 }
 0x5d7   : > { %v6115_v40 = vpop.f32.mrb[27].mxu1  ;;  %v2697_v42 = vmul.f32 %v6088_v49, %v2559_v33  ;;  %v2564_v18 = vmul.f32 %v4365_v10, %v2556_v21  ;;  %v2949_v14 = vsel %vm2947_vm5, %v6072_v63, %v2780_v46 }
 0x5d8   : > { %v2563_v49 = vmul.f32 %v4367_v60, %v2555_v55 }
 0x5d9   : > { %v2784_v41 = vpop.permute.xlu1 %2783 }
 0x5db   : > { %v3761_v15 = vpop.f32.mrb[28].mxu0 }
 0x5dc   : > { %v2399_v45 = vmul.f32 %v3761_v15, %v2261_v24  ;;  %v2375_v62 = vpop.f32.mrb[29].mxu0  ;;  %v2561_v24 = vmul.f32 %v4363_v16, %v2553_v53  ;;  %v2700_v15 = vmul.f32 %v6113_v34, %v2562_v22  ;;  %v2778_v34 = vpop.permute.xlu0 %2777 }
 0x5dd   : > { %v2398_v39 = vmul.f32 %v2375_v62, %v2260_v31  ;;  %v2557_v62 = vsub.f32 2.0, %v2549_v1  ;;  %v2788_v58 = vpop.permute.xlu1 %2787 }
 0x5de   : > { %2883 = vrot.lane.b32.xlu1 %v2399_v45, %s4433_s20  ;;  %v2699_v31 = vmul.f32 %v6115_v40, %v2561_v24  ;;  %v2558_v45 = vsub.f32 2.0, %v2550_v32 }
 0x5df   : > { %2881 = vrot.lane.b32.xlu0 %v2398_v39, %s4433_s20  ;;  %v2565_v35 = vmul.f32 %v4371_v7, %v2557_v62 }
 0x5e0   : > { %v2566_v50 = vmul.f32 %v4369_v43, %v2558_v45  ;;  %v2782_v40 = vpop.permute.xlu0 %2781 }
 0x5e1   : > { %v3805_v36 = vpop.f32.mrb[28].mxu1  ;;  %v6143_v47 = vpop.permute.xlu1 %2791  ;;  %v2950_v24 = vsel %vm2947_vm5, %v6077_v25, %v2782_v40 }
 0x5e2   : > { %v2678_v27 = vpop.f32.mrb[29].mxu1  ;;  %v2702_v39 = vmul.f32 %v3805_v36, %v2564_v18 }
 0x5e3   : > { %v2701_v57 = vmul.f32 %v2678_v27, %v2563_v49 }
 0x5e4   : > { %v2786_v52 = vpop.permute.xlu0 %2785 }
 0x5e5   : > { %v2952_v49 = vsel %vm2947_vm5, %v6093_v4, %v2786_v52 }
 0x5e8   : > { %v6145_v56 = vpop.permute.xlu0 %2789 }
 0x5ea   : > { %v3764_v30 = vpop.f32.mrb[30].mxu0 }
 0x5eb   : > { %v2401_v51 = vmul.f32 %v3764_v30, %v2263_v13  ;;  %v2385_v37 = vpop.f32.mrb[31].mxu0 }
 0x5ec   : > { %v2400_v0 = vmul.f32 %v2385_v37, %v2262_v54 }
 0x5ed   : > { %2887 = vrot.lane.b32.xlu1 %v2401_v51, %s4433_s20 }
 0x5ee   : > { %2885 = vrot.lane.b32.xlu0 %v2400_v0, %s4433_s20  ;;  %v3808_v28 = vpop.f32.mrb[30].mxu1 }
 0x5ef   : > { %v2688_v61 = vpop.f32.mrb[31].mxu1  ;;  %v2704_v5 = vmul.f32 %v3808_v28, %v2566_v50  ;;  %v2948_v28 = vsel %vm2947_vm5, %v6064_v23, %v2778_v34  ;;  %v2951_v23 = vsel %vm2947_vm5, %v6086_v48, %v2784_v41 }
 0x5f0   : > { %v2703_v6 = vmul.f32 %v2688_v61, %v2565_v35  ;;  %v2953_v35 = vsel %vm2947_vm5, %v6098_v44, %v2788_v58  ;;  %v2954_v58 = vsel %vm2947_vm5, %v6102_v59, %v6145_v56 }
 0x5f1   : > { %2907 = vrot.lane.b32.xlu1 %v2698_v2, %s4434_s22 }
 0x5f2   : > { %2905 = vrot.lane.b32.xlu0 %v2697_v42, %s4434_s22  ;;  %v6165_v42 = vld [vmem:[%s6253_s4] ss:$0 sm:$0xff] }
 0x5f5   : > { %2911 = vrot.lane.b32.xlu1 %v2700_v15, %s4434_s22 }
 0x5f6   : > { %2909 = vrot.lane.b32.xlu0 %v2699_v31, %s4434_s22 }
 0x5f9   : > { %2915 = vrot.lane.b32.xlu1 %v2702_v39, %s4434_s22 }
 0x5fa   : > { %2913 = vrot.lane.b32.xlu0 %v2701_v57, %s4434_s22 }
 0x5fd   : > { %2919 = vrot.lane.b32.xlu1 %v2704_v5, %s4434_s22 }
 0x5fe   : > { %2917 = vrot.lane.b32.xlu0 %v2703_v6, %s4434_s22 }
 0x607   : > { %v2812_v36 = vpop.permute.xlu1 %2811 }
 0x608   : > { %v2810_v27 = vpop.permute.xlu0 %2809  ;;  %v2958_v7 = vsel %vm2956_vm6, %v2949_v14, %v2812_v36 }
 0x609   : > { %v2957_v2 = vsel %vm2956_vm6, %v2948_v28, %v2810_v27 }
 0x612   : > { %v2816_v9 = vpop.permute.xlu1 %2815 }
 0x613   : > { %v2814_v12 = vpop.permute.xlu0 %2813  ;;  %v2960_v15 = vsel %vm2956_vm6, %v2951_v23, %v2816_v9 }
 0x614   : > { %v2959_v18 = vsel %vm2956_vm6, %v2950_v24, %v2814_v12 }
 0x620   : > { %v2820_v17 = vpop.permute.xlu1 %2819 }
 0x621   : > { %v2818_v16 = vpop.permute.xlu0 %2817  ;;  %v2962_v41 = vsel %vm2956_vm6, %v2953_v35, %v2820_v17 }
 0x622   : > { %v2961_v52 = vsel %vm2956_vm6, %v2952_v49, %v2818_v16 }
 0x62b   : > { %v6147_v19 = vpop.permute.xlu1 %2823 }
 0x62c   : > { %v6149_v20 = vpop.permute.xlu0 %2821 }
 0x62f   : > { %v2844_v13 = vpop.permute.xlu1 %2843 }
 0x630   : > { %v2842_v10 = vpop.permute.xlu0 %2841  ;;  %v2967_v61 = vsel %vm2965_vm3, %v2958_v7, %v2844_v13  ;;  %v2955_v13 = vsel %vm2947_vm5, %v6106_v3, %v6143_v47 }
 0x631   : > { %v2966_v21 = vsel %vm2965_vm3, %v2957_v2, %v2842_v10 }
 0x633   : > { %v2848_v29 = vpop.permute.xlu1 %2847 }
 0x634   : > { %v2846_v11 = vpop.permute.xlu0 %2845  ;;  %v2969_v62 = vsel %vm2965_vm3, %v2960_v15, %v2848_v29 }
 0x635   : > { %v2968_v39 = vsel %vm2965_vm3, %v2959_v18, %v2846_v11 }
 0x637   : > { %v2852_v30 = vpop.permute.xlu1 %2851 }
 0x638   : > { %v2850_v54 = vpop.permute.xlu0 %2849  ;;  %v2971_v36 = vsel %vm2965_vm3, %v2962_v41, %v2852_v30  ;;  %v2964_v30 = vsel %vm2956_vm6, %v2955_v13, %v6147_v19 }
 0x639   : > { %v2970_v27 = vsel %vm2965_vm3, %v2961_v52, %v2850_v54  ;;  %v2963_v54 = vsel %vm2956_vm6, %v2954_v58, %v6149_v20 }
 0x63b   : > { %v6151_v60 = vpop.permute.xlu1 %2855 }
 0x63c   : > { %v6153_v51 = vpop.permute.xlu0 %2853  ;;  %v2973_v3 = vsel %vm2965_vm3, %v2964_v30, %v6151_v60 }
 0x63f   : > { %v2876_v37 = vpop.permute.xlu1 %2875 }
 0x640   : > { %v2874_v0 = vpop.permute.xlu0 %2873  ;;  %v2976_v63 = vsel %vm2974_vm9, %v2967_v61, %v2876_v37  ;;  %v2972_v37 = vsel %vm2965_vm3, %v2963_v54, %v6153_v51 }
 0x641   : > { %v2975_v22 = vsel %vm2974_vm9, %v2966_v21, %v2874_v0 }
 0x647   : > { %v2880_v8 = vpop.permute.xlu1 %2879 }
 0x648   : > { %v2878_v38 = vpop.permute.xlu0 %2877  ;;  %v2978_v25 = vsel %vm2974_vm9, %v2969_v62, %v2880_v8 }
 0x649   : > { %v2977_v5 = vsel %vm2974_vm9, %v2968_v39, %v2878_v38 }
 0x650   : > { %v2884_v26 = vpop.permute.xlu1 %2883 }
 0x651   : > { %v2882_v43 = vpop.permute.xlu0 %2881  ;;  %v2980_v9 = vsel %vm2974_vm9, %v2971_v36, %v2884_v26 }
 0x652   : > { %v2979_v16 = vsel %vm2974_vm9, %v2970_v27, %v2882_v43 }
 0x65f   : > { %v2888_v53 = vpop.permute.xlu1 %2887 }
 0x660   : > { %v2886_v33 = vpop.permute.xlu0 %2885  ;;  %v2982_v19 = vsel %vm2974_vm9, %v2973_v3, %v2888_v53 }
 0x661   : > { %v2981_v38 = vsel %vm2974_vm9, %v2972_v37, %v2886_v33 }
 0x663   : > { %v2908_v32 = vpop.permute.xlu1 %2907 }
 0x664   : > { %v2985_v55 = vsel %vm2983_vm0, %v2976_v63, %v2908_v32  ;;  %v2906_v1 = vpop.permute.xlu0 %2905 }
 0x665   : > { %v6177_v31 = vadd.f32 %v6165_v42, %v2985_v55  ;;  %v2984_v45 = vsel %vm2983_vm0, %v2975_v22, %v2906_v1 }
 0x666   : > { %v6183_v48 = vadd.f32 %v6165_v42, %v2984_v45 }
 0x667   : > { %v3017_v57 = vmul.f32 1.442695, %v6177_v31  ;;  %v2912_v50 = vpop.permute.xlu1 %2911  ;;  %vm3008_vm10 = vcmp.gt.f32.partialorder %v6177_v31, 0.0 }
 0x668   : > { %v3015_v6 = vmul.f32 1.442695, %v6183_v48  ;;  %v2987_v46 = vsel %vm2983_vm0, %v2978_v25, %v2912_v50  ;;  %v2910_v34 = vpop.permute.xlu0 %2909  ;;  %vm3007_vm13 = vcmp.gt.f32.partialorder %v6183_v48, 0.0 }
 0x669   : > { %4372 = vpow2.f32 %v3017_v57  ;;  %v3002_v4 = vadd.f32 %v6165_v42, %v2987_v46  ;;  %v2986_v40 = vsel %vm2983_vm0, %v2977_v5, %v2910_v34 }
 0x66a   : > { %4374 = vpow2.f32 %v3015_v6  ;;  %v3001_v44 = vadd.f32 %v6165_v42, %v2986_v40 }
 0x66b   : > { %v3021_v12 = vmul.f32 1.442695, %v3002_v4  ;;  %v2916_v17 = vpop.permute.xlu1 %2915  ;;  %vm3010_vm4 = vcmp.gt.f32.partialorder %v3002_v4, 0.0 }
 0x66c   : > { %v3019_v10 = vmul.f32 1.442695, %v3001_v44  ;;  %v2989_v29 = vsel %vm2983_vm0, %v2980_v9, %v2916_v17  ;;  %v2914_v11 = vpop.permute.xlu0 %2913  ;;  %vm3009_vm14 = vcmp.gt.f32.partialorder %v3001_v44, 0.0 }
 0x66d   : > { %4376 = vpow2.f32 %v3021_v12  ;;  %v3004_v59 = vadd.f32 %v6165_v42, %v2989_v29  ;;  %v2988_v56 = vsel %vm2983_vm0, %v2979_v16, %v2914_v11 }
 0x66e   : > { %4378 = vpow2.f32 %v3019_v10  ;;  %v3003_v47 = vadd.f32 %v6165_v42, %v2988_v56 }
 0x66f   : > { %v3025_v0 = vmul.f32 1.442695, %v3004_v59  ;;  %v2920_v8 = vpop.permute.xlu1 %2919  ;;  %vm3012_vm7 = vcmp.gt.f32.partialorder %v3004_v59, 0.0 }
 0x670   : > { %v3023_v26 = vmul.f32 1.442695, %v3003_v47  ;;  %v2991_v43 = vsel %vm2983_vm0, %v2982_v19, %v2920_v8  ;;  %v2918_v20 = vpop.permute.xlu0 %2917  ;;  %vm3011_vm1 = vcmp.gt.f32.partialorder %v3003_v47, 0.0 }
 0x671   : > { %4380 = vpow2.f32 %v3025_v0  ;;  %v3006_v60 = vadd.f32 %v6165_v42, %v2991_v43  ;;  %v2990_v14 = vsel %vm2983_vm0, %v2981_v38, %v2918_v20 }
 0x672   : > { %4382 = vpow2.f32 %v3023_v26  ;;  %v3005_v28 = vadd.f32 %v6165_v42, %v2990_v14 }
 0x673   : > { %v4373_v51 = vpop.eup %4372  ;;  %v3029_v7 = vmul.f32 1.442695, %v3006_v60  ;;  %vm3014_vm2 = vcmp.gt.f32.partialorder %v3006_v60, 0.0 }
 0x674   : > { %v4375_v2 = vpop.eup %4374  ;;  %v3256_v53 = vadd.f32 -1.0, %v4373_v51  ;;  %v3027_v33 = vmul.f32 1.442695, %v3005_v28  ;;  %vm3013_vm12 = vcmp.gt.f32.partialorder %v3005_v28, 0.0 }
 0x675   : > { %v3255_v61 = vadd.f32 -1.0, %v4375_v2  ;;  %4384 = vpow2.f32 %v3029_v7 }
 0x676   : > { %v3040_v21 = vsel %vm3008_vm10, %v6177_v31, %v3256_v53  ;;  %4386 = vpow2.f32 %v3027_v33 }
 0x677   : > { %v4377_v42 = vpop.eup %4376  ;;  %3048 = vst [vmem:[%s6232_s28 + $0x8] sm:$0xff] %v3040_v21  ;;  %v3039_v63 = vsel %vm3007_vm13, %v6183_v48, %v3255_v61 }
 0x678   : > { %v4379_v32 = vpop.eup %4378  ;;  %3047 = vst [vmem:[%s6232_s28] sm:$0xff] %v3039_v63  ;;  %v3258_v23 = vadd.f32 -1.0, %v4377_v42 }
 0x679   : > { %v3257_v22 = vadd.f32 -1.0, %v4379_v32 }
 0x67a   : > { %v3042_v55 = vsel %vm3010_vm4, %v3002_v4, %v3258_v23 }
 0x67b   : > { %v4381_v1 = vpop.eup %4380  ;;  %3050 = vst [vmem:[%s6232_s28 + $0x18] sm:$0xff] %v3042_v55  ;;  %v3041_v24 = vsel %vm3009_vm14, %v3001_v44, %v3257_v22 }
 0x67c   : > { %v4383_v15 = vpop.eup %4382  ;;  %3049 = vst [vmem:[%s6232_s28 + $0x10] sm:$0xff] %v3041_v24  ;;  %v3260_v31 = vadd.f32 -1.0, %v4381_v1 }
 0x67d   : > { %v3259_v45 = vadd.f32 -1.0, %v4383_v15 }
 0x67e   : > { %v3044_v18 = vsel %vm3012_vm7, %v3004_v59, %v3260_v31 }
 0x67f   : > { %v4385_v62 = vpop.eup %4384  ;;  %3052 = vst [vmem:[%s6232_s28 + $0x28] sm:$0xff] %v3044_v18  ;;  %v3043_v48 = vsel %vm3011_vm1, %v3003_v47, %v3259_v45 }
 0x680   : > { %v4387_v49 = vpop.eup %4386  ;;  %3051 = vst [vmem:[%s6232_s28 + $0x20] sm:$0xff] %v3043_v48  ;;  %v3262_v39 = vadd.f32 -1.0, %v4385_v62 }
 0x681   : > { %v3261_v25 = vadd.f32 -1.0, %v4387_v49 }
 0x682   : > { %v3046_v57 = vsel %vm3014_vm2, %v3006_v60, %v3262_v39 }
 0x683   : > { %3054 = vst [vmem:[%s6232_s28 + $0x38] sm:$0xff] %v3046_v57  ;;  %v3045_v50 = vsel %vm3013_vm12, %v3005_v28, %v3261_v25 }
 0x684   : > { %3053 = vst [vmem:[%s6232_s28 + $0x30] sm:$0xff] %v3045_v50 }
 0x685 PF: > { %s15_s18 = sadd.s32 1, %s4418_s18  }
 0x686   : > { %p12_p4 = scmp.ge.s32.totalorder %s15_s18, 4  }
 0x688   :  { %14 = sbr.rel (!%p12_p4) target bundleno = 1 (0x1), region = 80 }

</bundles_post_ra>
